<compile_context>
chip_gen: v6e
topology: v6e:2x2x1
jax: 0.10.0
libtpu: 0.0.40
codegen_flags: <defaults>
</compile_context>

<pallas_src>
import math
import numpy as np
import jax
import jax.numpy as jnp
from jax import lax
from jax.experimental import pallas as pl
from jax.experimental.pallas import tpu as pltpu


def _round_up(n, m):
    return ((n + m - 1) // m) * m


# ----------------------------------------------------------------------------
# Kernel 1: fused conv stack (init 1x1 conv + 3 depthwise-separable blocks)
# ----------------------------------------------------------------------------
def _conv_stack_kernel(x_ref, wi_ref, bi_ref,
                       w1d_ref, b1d_ref, w1p_ref, b1p_ref,
                       w2d_ref, b2d_ref, w2p_ref, b2p_ref,
                       w3d_ref, b3d_ref, w3p_ref, b3p_ref,
                       y3_ref,
                       h0_ref, h1_ref, h2_ref):
    B = y3_ref.shape[0]
    L = x_ref.shape[0] // B
    S = h0_ref.shape[0] // B          # per-batch segment rows (multiple of 8)
    OFF = 8                            # interior starts at an 8-aligned row

    # Zero ONLY the rows read by the depthwise taps that are never overwritten:
    # the 8-row head (contains the 2 conv zero-pads at rows 6,7) and the tail
    # rows beyond the interior.  Interiors are fully overwritten below.
    def zero_pads(h_ref, interior_len):
        c = h_ref.shape[1]
        for b in range(B):
            h_ref[b * S:b * S + OFF, :] = jnp.zeros((OFF, c), jnp.float32)
            tail0 = b * S + OFF + interior_len
            h_ref[tail0:(b + 1) * S, :] = jnp.zeros(((b + 1) * S - tail0, c),
                                                    jnp.float32)

    zero_pads(h0_ref, L)
    zero_pads(h1_ref, L + 2)
    zero_pads(h2_ref, L + 4)

    # init 1x1 conv + ReLU: one MXU pass over BOTH batch rows (x is (B*L, 130))
    y0 = jnp.dot(x_ref[...], wi_ref[...],
                 preferred_element_type=jnp.float32) + bi_ref[...]
    y0 = jnp.maximum(y0, 0.0)
    for b in range(B):
        h0_ref[b * S + OFF:b * S + OFF + L, :] = y0[b * L:(b + 1) * L, :]

    def ds_block(src_ref, lin, wd_ref, bd_ref, wp_ref, bp_ref):
        # Depthwise k=3, pad=2: three shifted reads of the padded slab (taps at
        # rows 6/7/8 of each segment), MACs on the VPU in f32; then pointwise
        # 1x1 on the MXU + bias + ReLU.  Both batch rows are processed in one
        # pass; rows between segments are garbage but never stored.
        lout = lin + 2
        t = (B - 1) * S + lout
        x0 = src_ref[OFF - 2:OFF - 2 + t, :]
        x1 = src_ref[OFF - 1:OFF - 1 + t, :]
        x2 = src_ref[OFF:OFF + t, :]
        d = (x0 * wd_ref[0:1, :] + x1 * wd_ref[1:2, :] + x2 * wd_ref[2:3, :]
             + bd_ref[...])
        y = jnp.dot(d, wp_ref[...],
                    preferred_element_type=jnp.float32) + bp_ref[...]
        return jnp.maximum(y, 0.0), lout

    y1, l1 = ds_block(h0_ref, L, w1d_ref, b1d_ref, w1p_ref, b1p_ref)
    for b in range(B):
        h1_ref[b * S + OFF:b * S + OFF + l1, :] = y1[b * S:b * S + l1, :]

    y2, l2 = ds_block(h1_ref, l1, w2d_ref, b2d_ref, w2p_ref, b2p_ref)
    for b in range(B):
        h2_ref[b * S + OFF:b * S + OFF + l2, :] = y2[b * S:b * S + l2, :]

    y3, l3 = ds_block(h2_ref, l2, w3d_ref, b3d_ref, w3p_ref, b3p_ref)
    # Single full-block store per batch (bf16 only at the MXU-feeding boundary).
    for b in range(B):
        y3_ref[b, :, :] = y3[b * S:b * S + l3, :].astype(y3_ref.dtype)


# ----------------------------------------------------------------------------
# Kernel 2: fc head — K-chunked matmul, bf16 weight streamed via BlockSpecs
# ----------------------------------------------------------------------------
def _fc_kernel(x_ref, w_ref, b_ref, o_ref, acc_ref):
    k = pl.program_id(0)

    @pl.when(k == 0)
    def _():
        acc_ref[...] = jnp.zeros_like(acc_ref)

    acc_ref[...] += jnp.dot(x_ref[...], w_ref[...],
                            preferred_element_type=jnp.float32)

    @pl.when(k == pl.num_programs(0) - 1)
    def _():
        o_ref[...] = acc_ref[...] + b_ref[...]


def _fc_forward(flat_bf16, w_bf16, bias_f32, tk):
    B, K = flat_bf16.shape
    latent = w_bf16.shape[1]
    nk = K // tk
    return pl.pallas_call(
        _fc_kernel,
        out_shape=jax.ShapeDtypeStruct((B, latent), jnp.float32),
        grid_spec=pltpu.PrefetchScalarGridSpec(
            num_scalar_prefetch=0,
            grid=(nk,),
            in_specs=[
                pl.BlockSpec((B, tk), lambda k: (0, k)),          # activations
                pl.BlockSpec((tk, latent), lambda k: (k, 0)),     # bf16 weight
                pl.BlockSpec((1, latent), lambda k: (0, 0)),      # bias
            ],
            out_specs=pl.BlockSpec((B, latent), lambda k: (0, 0)),
            scratch_shapes=[pltpu.VMEM((B, latent), jnp.float32)],
        ),
        compiler_params=pltpu.CompilerParams(
            dimension_semantics=("arbitrary",)),
    )(flat_bf16, w_bf16, bias_f32)


# ----------------------------------------------------------------------------
# Forward pass
# ----------------------------------------------------------------------------
@jax.jit
def encoder_forward(kp, x):
    """x: (B, L, 130) — same input as the PyTorch module (pre-transpose)."""
    B, L, f_in = x.shape
    lp = L + 6
    c1 = kp["init_w"].shape[1]
    c2 = kp["c1_pw_w"].shape[1]
    c3 = kp["c2_pw_w"].shape[1]
    c_last = kp["c3_pw_w"].shape[1]
    S = _round_up(L + 14, 8)          # per-batch padded segment length

    vmem = pl.BlockSpec(memory_space=pltpu.MemorySpace.VMEM)

    y3 = pl.pallas_call(
        _conv_stack_kernel,
        out_shape=jax.ShapeDtypeStruct((B, lp, c_last), jnp.bfloat16),
        in_specs=[vmem] * 15,
        out_specs=vmem,
        scratch_shapes=[
            pltpu.VMEM((B * S, c1), jnp.float32),   # padded slab, layer-1 input
            pltpu.VMEM((B * S, c2), jnp.float32),   # padded slab, layer-2 input
            pltpu.VMEM((B * S, c3), jnp.float32),   # padded slab, layer-3 input
        ],
    )(x.reshape(B * L, f_in),
      kp["init_w"], kp["init_b"],
      kp["c1_dw_w"], kp["c1_dw_b"], kp["c1_pw_w"], kp["c1_pw_b"],
      kp["c2_dw_w"], kp["c2_dw_b"], kp["c2_pw_w"], kp["c2_pw_b"],
      kp["c3_dw_w"], kp["c3_dw_b"], kp["c3_pw_w"], kp["c3_pw_b"])

    # (B, L', C) is already row-major flat in HBM -> the flatten is free; the
    # fc weight was permuted once at init to match this (l*C + c) order.
    flat = y3.reshape(B, lp * c_last)
    rc = math.gcd(lp, 16)                           # rows of y3 per K-chunk
    return _fc_forward(flat, kp["fc_w_perm_bf16"], kp["fc_b"], rc * c_last)


# ----------------------------------------------------------------------------
# Parameters (deterministic, synthetic) + one-time weight preparation
# ----------------------------------------------------------------------------
def init_params(key, flatten_dim, latent_dim=64, scale=0.1):
    ks = jax.random.split(key, 16)
    def w(k, shape):
        return scale * jax.random.normal(k, shape, dtype=jnp.float32)
    return {
        # init Conv1d(130, 16, k=1): stored as (Cin, Cout)
        "init_w": w(ks[0], (130, 16)), "init_b": w(ks[1], (1, 16)),
        # block 1: depthwise (K, C), pointwise (Cin, Cout)
        "c1_dw_w": w(ks[2], (3, 16)), "c1_dw_b": w(ks[3], (1, 16)),
        "c1_pw_w": w(ks[4], (16, 32)), "c1_pw_b": w(ks[5], (1, 32)),
        # block 2
        "c2_dw_w": w(ks[6], (3, 32)), "c2_dw_b": w(ks[7], (1, 32)),
        "c2_pw_w": w(ks[8], (32, 64)), "c2_pw_b": w(ks[9], (1, 64)),
        # block 3
        "c3_dw_w": w(ks[10], (3, 64)), "c3_dw_b": w(ks[11], (1, 64)),
        "c3_pw_w": w(ks[12], (64, 128)), "c3_pw_b": w(ks[13], (1, 128)),
        # fc (rows in the PyTorch channel-major flatten order: c*L' + l)
        "fc_w": w(ks[14], (flatten_dim, latent_dim)),
        "fc_b": w(ks[15], (1, latent_dim)),
    }


def prepare_params(params, final_len):
    """One-time weight massaging: permute fc_w rows from PyTorch's
    channel-major flatten order (c*L'+l) to the kernel's channels-last order
    (l*C+c) and cast to bf16 for streaming (f32 accumulation in-kernel)."""
    kp = {k: v for k, v in params.items() if k != "fc_w"}
    fc_w = params["fc_w"]
    latent = fc_w.shape[1]
    c_last = fc_w.shape[0] // final_len
    w_perm = jnp.reshape(
        jnp.transpose(jnp.reshape(fc_w, (c_last, final_len, latent)), (1, 0, 2)),
        (final_len * c_last, latent))
    kp["fc_w_perm_bf16"] = w_perm.astype(jnp.bfloat16)
    return kp


# ----------------------------------------------------------------------------
# Pure-JAX reference replicating the PyTorch NCL conv semantics (for checking)
# ----------------------------------------------------------------------------
def torch_reference(params, x):
    def conv1d(h, w_oik, bias, padding, groups=1):
        dn = lax.conv_dimension_numbers(h.shape, w_oik.shape, ("NCH", "OIH", "NCH"))
        y = lax.conv_general_dilated(h, w_oik, (1,), [(padding, padding)],
                                     dimension_numbers=dn,
                                     feature_group_count=groups)
        return y + bias[None, :, None]

    xt = jnp.transpose(x, (0, 2, 1))            # (B, 130, L) — x.transpose(1, 2)
    h = jax.nn.relu(conv1d(xt, params["init_w"].T[:, :, None],
                           params["init_b"][0], 0))

    def block(h, dw_w, dw_b, pw_w, pw_b):
        C = h.shape[1]
        h = conv1d(h, dw_w.T[:, None, :], dw_b[0], 2, groups=C)   # depthwise
        h = conv1d(h, pw_w.T[:, :, None], pw_b[0], 0)             # pointwise
        return jax.nn.relu(h)

    h = block(h, params["c1_dw_w"], params["c1_dw_b"],
              params["c1_pw_w"], params["c1_pw_b"])
    h = block(h, params["c2_dw_w"], params["c2_dw_b"],
              params["c2_pw_w"], params["c2_pw_b"])
    h = block(h, params["c3_dw_w"], params["c3_dw_b"],
              params["c3_pw_w"], params["c3_pw_b"])
    flat = h.reshape(h.shape[0], -1)            # (B, C, L') -> (B, C*L')
    return flat @ params["fc_w"] + params["fc_b"][0]


if __name__ == "__main__":
    B, L, F_IN = 2, 122, 130          # L+6 = 128 -> flatten_dim = 128*128 = 16384
    LP = L + 6
    flatten_dim = 128 * LP            # module hardcodes 149760; small stand-in

    key = jax.random.PRNGKey(0)
    k_x, k_p = jax.random.split(key)
    x = jax.random.normal(k_x, (B, L, F_IN), dtype=jnp.float32)
    params = init_params(k_p, flatten_dim)
    kparams = prepare_params(params, LP)   # one-time fc-weight permutation + bf16

    out = jax.block_until_ready(encoder_forward(kparams, x))
    assert out.shape == (B, 64), out.shape

    ref = jax.block_until_ready(torch_reference(params, x))
    out_np, ref_np = np.asarray(out), np.asarray(ref)
    # bf16 fc weight/activation -> compare with a normalized-error tolerance
    err = float(np.max(np.abs(out_np - ref_np)) / (np.max(np.abs(ref_np)) + 1e-12))
    assert err < 2e-2, f"normalized max error too large: {err}"

    print("KERNEL_OK")
</pallas_src>

<mosaic_0001>
module attributes {stable_mosaic.version = 11 : i64} {
  func.func @_conv_stack_kernel(%arg0: memref<244x130xf32, #tpu.memory_space<vmem>>, %arg1: memref<130x16xf32, #tpu.memory_space<vmem>>, %arg2: memref<1x16xf32, #tpu.memory_space<vmem>>, %arg3: memref<3x16xf32, #tpu.memory_space<vmem>>, %arg4: memref<1x16xf32, #tpu.memory_space<vmem>>, %arg5: memref<16x32xf32, #tpu.memory_space<vmem>>, %arg6: memref<1x32xf32, #tpu.memory_space<vmem>>, %arg7: memref<3x32xf32, #tpu.memory_space<vmem>>, %arg8: memref<1x32xf32, #tpu.memory_space<vmem>>, %arg9: memref<32x64xf32, #tpu.memory_space<vmem>>, %arg10: memref<1x64xf32, #tpu.memory_space<vmem>>, %arg11: memref<3x64xf32, #tpu.memory_space<vmem>>, %arg12: memref<1x64xf32, #tpu.memory_space<vmem>>, %arg13: memref<64x128xf32, #tpu.memory_space<vmem>>, %arg14: memref<1x128xf32, #tpu.memory_space<vmem>>, %arg15: memref<2x128x128xbf16, #tpu.memory_space<vmem>>, %arg16: memref<272x16xf32, #tpu.memory_space<vmem>>, %arg17: memref<272x32xf32, #tpu.memory_space<vmem>>, %arg18: memref<272x64xf32, #tpu.memory_space<vmem>>) attributes {dimension_semantics = [], scalar_prefetch = 0 : i64, scratch_operands = 3 : i64, tpu.core_type = #tpu.core_type<tc>} {
    %cst = arith.constant 0.000000e+00 : f32
    %0 = vector.broadcast %cst : f32 to vector<8x16xf32>
    %c0 = arith.constant 0 : index
    %c0_0 = arith.constant 0 : index
    %1 = vector.load %arg16[%c0, %c0_0] : memref<272x16xf32, #tpu.memory_space<vmem>>, vector<8x16xf32>
    tpu.vector_store %arg16[%c0, %c0_0], %0 {strides = array<i32>} : memref<272x16xf32, #tpu.memory_space<vmem>>, vector<8x16xf32>,
    %cst_1 = arith.constant 0.000000e+00 : f32
    %2 = vector.broadcast %cst_1 : f32 to vector<6x16xf32>
    %c130 = arith.constant 130 : index
    %c0_2 = arith.constant 0 : index
    %3 = vector.load %arg16[%c130, %c0_2] : memref<272x16xf32, #tpu.memory_space<vmem>>, vector<6x16xf32>
    tpu.vector_store %arg16[%c130, %c0_2], %2 {strides = array<i32>} : memref<272x16xf32, #tpu.memory_space<vmem>>, vector<6x16xf32>,
    %cst_3 = arith.constant 0.000000e+00 : f32
    %4 = vector.broadcast %cst_3 : f32 to vector<8x16xf32>
    %c136 = arith.constant 136 : index
    %c0_4 = arith.constant 0 : index
    %5 = vector.load %arg16[%c136, %c0_4] : memref<272x16xf32, #tpu.memory_space<vmem>>, vector<8x16xf32>
    tpu.vector_store %arg16[%c136, %c0_4], %4 {strides = array<i32>} : memref<272x16xf32, #tpu.memory_space<vmem>>, vector<8x16xf32>,
    %cst_5 = arith.constant 0.000000e+00 : f32
    %6 = vector.broadcast %cst_5 : f32 to vector<6x16xf32>
    %c266 = arith.constant 266 : index
    %c0_6 = arith.constant 0 : index
    %7 = vector.load %arg16[%c266, %c0_6] : memref<272x16xf32, #tpu.memory_space<vmem>>, vector<6x16xf32>
    tpu.vector_store %arg16[%c266, %c0_6], %6 {strides = array<i32>} : memref<272x16xf32, #tpu.memory_space<vmem>>, vector<6x16xf32>,
    %cst_7 = arith.constant 0.000000e+00 : f32
    %8 = vector.broadcast %cst_7 : f32 to vector<8x32xf32>
    %c0_8 = arith.constant 0 : index
    %c0_9 = arith.constant 0 : index
    %9 = vector.load %arg17[%c0_8, %c0_9] : memref<272x32xf32, #tpu.memory_space<vmem>>, vector<8x32xf32>
    tpu.vector_store %arg17[%c0_8, %c0_9], %8 {strides = array<i32>} : memref<272x32xf32, #tpu.memory_space<vmem>>, vector<8x32xf32>,
    %cst_10 = arith.constant 0.000000e+00 : f32
    %10 = vector.broadcast %cst_10 : f32 to vector<4x32xf32>
    %c132 = arith.constant 132 : index
    %c0_11 = arith.constant 0 : index
    %11 = vector.load %arg17[%c132, %c0_11] : memref<272x32xf32, #tpu.memory_space<vmem>>, vector<4x32xf32>
    tpu.vector_store %arg17[%c132, %c0_11], %10 {strides = array<i32>} : memref<272x32xf32, #tpu.memory_space<vmem>>, vector<4x32xf32>,
    %cst_12 = arith.constant 0.000000e+00 : f32
    %12 = vector.broadcast %cst_12 : f32 to vector<8x32xf32>
    %c136_13 = arith.constant 136 : index
    %c0_14 = arith.constant 0 : index
    %13 = vector.load %arg17[%c136_13, %c0_14] : memref<272x32xf32, #tpu.memory_space<vmem>>, vector<8x32xf32>
    tpu.vector_store %arg17[%c136_13, %c0_14], %12 {strides = array<i32>} : memref<272x32xf32, #tpu.memory_space<vmem>>, vector<8x32xf32>,
    %cst_15 = arith.constant 0.000000e+00 : f32
    %14 = vector.broadcast %cst_15 : f32 to vector<4x32xf32>
    %c268 = arith.constant 268 : index
    %c0_16 = arith.constant 0 : index
    %15 = vector.load %arg17[%c268, %c0_16] : memref<272x32xf32, #tpu.memory_space<vmem>>, vector<4x32xf32>
    tpu.vector_store %arg17[%c268, %c0_16], %14 {strides = array<i32>} : memref<272x32xf32, #tpu.memory_space<vmem>>, vector<4x32xf32>,
    %cst_17 = arith.constant 0.000000e+00 : f32
    %16 = vector.broadcast %cst_17 : f32 to vector<8x64xf32>
    %c0_18 = arith.constant 0 : index
    %c0_19 = arith.constant 0 : index
    %17 = vector.load %arg18[%c0_18, %c0_19] : memref<272x64xf32, #tpu.memory_space<vmem>>, vector<8x64xf32>
    tpu.vector_store %arg18[%c0_18, %c0_19], %16 {strides = array<i32>} : memref<272x64xf32, #tpu.memory_space<vmem>>, vector<8x64xf32>,
    %cst_20 = arith.constant 0.000000e+00 : f32
    %18 = vector.broadcast %cst_20 : f32 to vector<2x64xf32>
    %c134 = arith.constant 134 : index
    %c0_21 = arith.constant 0 : index
    %19 = vector.load %arg18[%c134, %c0_21] : memref<272x64xf32, #tpu.memory_space<vmem>>, vector<2x64xf32>
    tpu.vector_store %arg18[%c134, %c0_21], %18 {strides = array<i32>} : memref<272x64xf32, #tpu.memory_space<vmem>>, vector<2x64xf32>,
    %cst_22 = arith.constant 0.000000e+00 : f32
    %20 = vector.broadcast %cst_22 : f32 to vector<8x64xf32>
    %c136_23 = arith.constant 136 : index
    %c0_24 = arith.constant 0 : index
    %21 = vector.load %arg18[%c136_23, %c0_24] : memref<272x64xf32, #tpu.memory_space<vmem>>, vector<8x64xf32>
    tpu.vector_store %arg18[%c136_23, %c0_24], %20 {strides = array<i32>} : memref<272x64xf32, #tpu.memory_space<vmem>>, vector<8x64xf32>,
    %cst_25 = arith.constant 0.000000e+00 : f32
    %22 = vector.broadcast %cst_25 : f32 to vector<2x64xf32>
    %c270 = arith.constant 270 : index
    %c0_26 = arith.constant 0 : index
    %23 = vector.load %arg18[%c270, %c0_26] : memref<272x64xf32, #tpu.memory_space<vmem>>, vector<2x64xf32>
    tpu.vector_store %arg18[%c270, %c0_26], %22 {strides = array<i32>} : memref<272x64xf32, #tpu.memory_space<vmem>>, vector<2x64xf32>,
    %c0_27 = arith.constant 0 : index
    %c0_28 = arith.constant 0 : index
    %24 = vector.load %arg0[%c0_27, %c0_28] : memref<244x130xf32, #tpu.memory_space<vmem>>, vector<244x130xf32>
    %c0_29 = arith.constant 0 : index
    %c0_30 = arith.constant 0 : index
    %25 = vector.load %arg1[%c0_29, %c0_30] : memref<130x16xf32, #tpu.memory_space<vmem>>, vector<130x16xf32>
    %cst_31 = arith.constant dense<0.000000e+00> : vector<244x16xf32>
    %26 = tpu.matmul %24, %25, %cst_31 {dimension_numbers = #tpu.dot_dimension_numbers<[1], [0], [0], [1], [0, 0, 1, 1], [], []>} : vector<244x130xf32>, vector<130x16xf32>, vector<244x16xf32> -> vector<244x16xf32>
    %c0_32 = arith.constant 0 : index
    %c0_33 = arith.constant 0 : index
    %27 = vector.load %arg2[%c0_32, %c0_33] : memref<1x16xf32, #tpu.memory_space<vmem>>, vector<1x16xf32>
    %28 = vector.broadcast %27 : vector<1x16xf32> to vector<244x16xf32>
    %29 = arith.addf %26, %28 : vector<244x16xf32>
    %cst_34 = arith.constant 0.000000e+00 : f32
    %30 = vector.broadcast %cst_34 : f32 to vector<244x16xf32>
    %31 = arith.maximumf %29, %30 : vector<244x16xf32>
    %32 = vector.extract_strided_slice %31 {offsets = [0, 0], sizes = [122, 16], strides = [1, 1]} : vector<244x16xf32> to vector<122x16xf32>
    %c8 = arith.constant 8 : index
    %c0_35 = arith.constant 0 : index
    %33 = vector.load %arg16[%c8, %c0_35] : memref<272x16xf32, #tpu.memory_space<vmem>>, vector<122x16xf32>
    tpu.vector_store %arg16[%c8, %c0_35], %32 {strides = array<i32>} : memref<272x16xf32, #tpu.memory_space<vmem>>, vector<122x16xf32>,
    %34 = vector.extract_strided_slice %31 {offsets = [122, 0], sizes = [122, 16], strides = [1, 1]} : vector<244x16xf32> to vector<122x16xf32>
    %c144 = arith.constant 144 : index
    %c0_36 = arith.constant 0 : index
    %35 = vector.load %arg16[%c144, %c0_36] : memref<272x16xf32, #tpu.memory_space<vmem>>, vector<122x16xf32>
    tpu.vector_store %arg16[%c144, %c0_36], %34 {strides = array<i32>} : memref<272x16xf32, #tpu.memory_space<vmem>>, vector<122x16xf32>,
    %c6 = arith.constant 6 : index
    %c0_37 = arith.constant 0 : index
    %36 = vector.load %arg16[%c6, %c0_37] : memref<272x16xf32, #tpu.memory_space<vmem>>, vector<260x16xf32>
    %c7 = arith.constant 7 : index
    %c0_38 = arith.constant 0 : index
    %37 = vector.load %arg16[%c7, %c0_38] : memref<272x16xf32, #tpu.memory_space<vmem>>, vector<260x16xf32>
    %c8_39 = arith.constant 8 : index
    %c0_40 = arith.constant 0 : index
    %38 = vector.load %arg16[%c8_39, %c0_40] : memref<272x16xf32, #tpu.memory_space<vmem>>, vector<260x16xf32>
    %c0_41 = arith.constant 0 : index
    %c0_42 = arith.constant 0 : index
    %39 = vector.load %arg3[%c0_41, %c0_42] : memref<3x16xf32, #tpu.memory_space<vmem>>, vector<1x16xf32>
    %40 = vector.broadcast %39 : vector<1x16xf32> to vector<260x16xf32>
    %41 = arith.mulf %36, %40 : vector<260x16xf32>
    %c1 = arith.constant 1 : index
    %c0_43 = arith.constant 0 : index
    %42 = vector.load %arg3[%c1, %c0_43] : memref<3x16xf32, #tpu.memory_space<vmem>>, vector<1x16xf32>
    %43 = vector.broadcast %42 : vector<1x16xf32> to vector<260x16xf32>
    %44 = arith.mulf %37, %43 : vector<260x16xf32>
    %45 = arith.addf %41, %44 : vector<260x16xf32>
    %c2 = arith.constant 2 : index
    %c0_44 = arith.constant 0 : index
    %46 = vector.load %arg3[%c2, %c0_44] : memref<3x16xf32, #tpu.memory_space<vmem>>, vector<1x16xf32>
    %47 = vector.broadcast %46 : vector<1x16xf32> to vector<260x16xf32>
    %48 = arith.mulf %38, %47 : vector<260x16xf32>
    %49 = arith.addf %45, %48 : vector<260x16xf32>
    %c0_45 = arith.constant 0 : index
    %c0_46 = arith.constant 0 : index
    %50 = vector.load %arg4[%c0_45, %c0_46] : memref<1x16xf32, #tpu.memory_space<vmem>>, vector<1x16xf32>
    %51 = vector.broadcast %50 : vector<1x16xf32> to vector<260x16xf32>
    %52 = arith.addf %49, %51 : vector<260x16xf32>
    %c0_47 = arith.constant 0 : index
    %c0_48 = arith.constant 0 : index
    %53 = vector.load %arg5[%c0_47, %c0_48] : memref<16x32xf32, #tpu.memory_space<vmem>>, vector<16x32xf32>
    %cst_49 = arith.constant dense<0.000000e+00> : vector<260x32xf32>
    %54 = tpu.matmul %52, %53, %cst_49 {dimension_numbers = #tpu.dot_dimension_numbers<[1], [0], [0], [1], [0, 0, 1, 1], [], []>} : vector<260x16xf32>, vector<16x32xf32>, vector<260x32xf32> -> vector<260x32xf32>
    %c0_50 = arith.constant 0 : index
    %c0_51 = arith.constant 0 : index
    %55 = vector.load %arg6[%c0_50, %c0_51] : memref<1x32xf32, #tpu.memory_space<vmem>>, vector<1x32xf32>
    %56 = vector.broadcast %55 : vector<1x32xf32> to vector<260x32xf32>
    %57 = arith.addf %54, %56 : vector<260x32xf32>
    %cst_52 = arith.constant 0.000000e+00 : f32
    %58 = vector.broadcast %cst_52 : f32 to vector<260x32xf32>
    %59 = arith.maximumf %57, %58 : vector<260x32xf32>
    %60 = vector.extract_strided_slice %59 {offsets = [0, 0], sizes = [124, 32], strides = [1, 1]} : vector<260x32xf32> to vector<124x32xf32>
    %c8_53 = arith.constant 8 : index
    %c0_54 = arith.constant 0 : index
    %61 = vector.load %arg17[%c8_53, %c0_54] : memref<272x32xf32, #tpu.memory_space<vmem>>, vector<124x32xf32>
    tpu.vector_store %arg17[%c8_53, %c0_54], %60 {strides = array<i32>} : memref<272x32xf32, #tpu.memory_space<vmem>>, vector<124x32xf32>,
    %62 = vector.extract_strided_slice %59 {offsets = [136, 0], sizes = [124, 32], strides = [1, 1]} : vector<260x32xf32> to vector<124x32xf32>
    %c144_55 = arith.constant 144 : index
    %c0_56 = arith.constant 0 : index
    %63 = vector.load %arg17[%c144_55, %c0_56] : memref<272x32xf32, #tpu.memory_space<vmem>>, vector<124x32xf32>
    tpu.vector_store %arg17[%c144_55, %c0_56], %62 {strides = array<i32>} : memref<272x32xf32, #tpu.memory_space<vmem>>, vector<124x32xf32>,
    %c6_57 = arith.constant 6 : index
    %c0_58 = arith.constant 0 : index
    %64 = vector.load %arg17[%c6_57, %c0_58] : memref<272x32xf32, #tpu.memory_space<vmem>>, vector<262x32xf32>
    %c7_59 = arith.constant 7 : index
    %c0_60 = arith.constant 0 : index
    %65 = vector.load %arg17[%c7_59, %c0_60] : memref<272x32xf32, #tpu.memory_space<vmem>>, vector<262x32xf32>
    %c8_61 = arith.constant 8 : index
    %c0_62 = arith.constant 0 : index
    %66 = vector.load %arg17[%c8_61, %c0_62] : memref<272x32xf32, #tpu.memory_space<vmem>>, vector<262x32xf32>
    %c0_63 = arith.constant 0 : index
    %c0_64 = arith.constant 0 : index
    %67 = vector.load %arg7[%c0_63, %c0_64] : memref<3x32xf32, #tpu.memory_space<vmem>>, vector<1x32xf32>
    %68 = vector.broadcast %67 : vector<1x32xf32> to vector<262x32xf32>
    %69 = arith.mulf %64, %68 : vector<262x32xf32>
    %c1_65 = arith.constant 1 : index
    %c0_66 = arith.constant 0 : index
    %70 = vector.load %arg7[%c1_65, %c0_66] : memref<3x32xf32, #tpu.memory_space<vmem>>, vector<1x32xf32>
    %71 = vector.broadcast %70 : vector<1x32xf32> to vector<262x32xf32>
    %72 = arith.mulf %65, %71 : vector<262x32xf32>
    %73 = arith.addf %69, %72 : vector<262x32xf32>
    %c2_67 = arith.constant 2 : index
    %c0_68 = arith.constant 0 : index
    %74 = vector.load %arg7[%c2_67, %c0_68] : memref<3x32xf32, #tpu.memory_space<vmem>>, vector<1x32xf32>
    %75 = vector.broadcast %74 : vector<1x32xf32> to vector<262x32xf32>
    %76 = arith.mulf %66, %75 : vector<262x32xf32>
    %77 = arith.addf %73, %76 : vector<262x32xf32>
    %c0_69 = arith.constant 0 : index
    %c0_70 = arith.constant 0 : index
    %78 = vector.load %arg8[%c0_69, %c0_70] : memref<1x32xf32, #tpu.memory_space<vmem>>, vector<1x32xf32>
    %79 = vector.broadcast %78 : vector<1x32xf32> to vector<262x32xf32>
    %80 = arith.addf %77, %79 : vector<262x32xf32>
    %c0_71 = arith.constant 0 : index
    %c0_72 = arith.constant 0 : index
    %81 = vector.load %arg9[%c0_71, %c0_72] : memref<32x64xf32, #tpu.memory_space<vmem>>, vector<32x64xf32>
    %cst_73 = arith.constant dense<0.000000e+00> : vector<262x64xf32>
    %82 = tpu.matmul %80, %81, %cst_73 {dimension_numbers = #tpu.dot_dimension_numbers<[1], [0], [0], [1], [0, 0, 1, 1], [], []>} : vector<262x32xf32>, vector<32x64xf32>, vector<262x64xf32> -> vector<262x64xf32>
    %c0_74 = arith.constant 0 : index
    %c0_75 = arith.constant 0 : index
    %83 = vector.load %arg10[%c0_74, %c0_75] : memref<1x64xf32, #tpu.memory_space<vmem>>, vector<1x64xf32>
    %84 = vector.broadcast %83 : vector<1x64xf32> to vector<262x64xf32>
    %85 = arith.addf %82, %84 : vector<262x64xf32>
    %cst_76 = arith.constant 0.000000e+00 : f32
    %86 = vector.broadcast %cst_76 : f32 to vector<262x64xf32>
    %87 = arith.maximumf %85, %86 : vector<262x64xf32>
    %88 = vector.extract_strided_slice %87 {offsets = [0, 0], sizes = [126, 64], strides = [1, 1]} : vector<262x64xf32> to vector<126x64xf32>
    %c8_77 = arith.constant 8 : index
    %c0_78 = arith.constant 0 : index
    %89 = vector.load %arg18[%c8_77, %c0_78] : memref<272x64xf32, #tpu.memory_space<vmem>>, vector<126x64xf32>
    tpu.vector_store %arg18[%c8_77, %c0_78], %88 {strides = array<i32>} : memref<272x64xf32, #tpu.memory_space<vmem>>, vector<126x64xf32>,
    %90 = vector.extract_strided_slice %87 {offsets = [136, 0], sizes = [126, 64], strides = [1, 1]} : vector<262x64xf32> to vector<126x64xf32>
    %c144_79 = arith.constant 144 : index
    %c0_80 = arith.constant 0 : index
    %91 = vector.load %arg18[%c144_79, %c0_80] : memref<272x64xf32, #tpu.memory_space<vmem>>, vector<126x64xf32>
    tpu.vector_store %arg18[%c144_79, %c0_80], %90 {strides = array<i32>} : memref<272x64xf32, #tpu.memory_space<vmem>>, vector<126x64xf32>,
    %c6_81 = arith.constant 6 : index
    %c0_82 = arith.constant 0 : index
    %92 = vector.load %arg18[%c6_81, %c0_82] : memref<272x64xf32, #tpu.memory_space<vmem>>, vector<264x64xf32>
    %c7_83 = arith.constant 7 : index
    %c0_84 = arith.constant 0 : index
    %93 = vector.load %arg18[%c7_83, %c0_84] : memref<272x64xf32, #tpu.memory_space<vmem>>, vector<264x64xf32>
    %c8_85 = arith.constant 8 : index
    %c0_86 = arith.constant 0 : index
    %94 = vector.load %arg18[%c8_85, %c0_86] : memref<272x64xf32, #tpu.memory_space<vmem>>, vector<264x64xf32>
    %c0_87 = arith.constant 0 : index
    %c0_88 = arith.constant 0 : index
    %95 = vector.load %arg11[%c0_87, %c0_88] : memref<3x64xf32, #tpu.memory_space<vmem>>, vector<1x64xf32>
    %96 = vector.broadcast %95 : vector<1x64xf32> to vector<264x64xf32>
    %97 = arith.mulf %92, %96 : vector<264x64xf32>
    %c1_89 = arith.constant 1 : index
    %c0_90 = arith.constant 0 : index
    %98 = vector.load %arg11[%c1_89, %c0_90] : memref<3x64xf32, #tpu.memory_space<vmem>>, vector<1x64xf32>
    %99 = vector.broadcast %98 : vector<1x64xf32> to vector<264x64xf32>
    %100 = arith.mulf %93, %99 : vector<264x64xf32>
    %101 = arith.addf %97, %100 : vector<264x64xf32>
    %c2_91 = arith.constant 2 : index
    %c0_92 = arith.constant 0 : index
    %102 = vector.load %arg11[%c2_91, %c0_92] : memref<3x64xf32, #tpu.memory_space<vmem>>, vector<1x64xf32>
    %103 = vector.broadcast %102 : vector<1x64xf32> to vector<264x64xf32>
    %104 = arith.mulf %94, %103 : vector<264x64xf32>
    %105 = arith.addf %101, %104 : vector<264x64xf32>
    %c0_93 = arith.constant 0 : index
    %c0_94 = arith.constant 0 : index
    %106 = vector.load %arg12[%c0_93, %c0_94] : memref<1x64xf32, #tpu.memory_space<vmem>>, vector<1x64xf32>
    %107 = vector.broadcast %106 : vector<1x64xf32> to vector<264x64xf32>
    %108 = arith.addf %105, %107 : vector<264x64xf32>
    %c0_95 = arith.constant 0 : index
    %c0_96 = arith.constant 0 : index
    %109 = vector.load %arg13[%c0_95, %c0_96] : memref<64x128xf32, #tpu.memory_space<vmem>>, vector<64x128xf32>
    %cst_97 = arith.constant dense<0.000000e+00> : vector<264x128xf32>
    %110 = tpu.matmul %108, %109, %cst_97 {dimension_numbers = #tpu.dot_dimension_numbers<[1], [0], [0], [1], [0, 0, 1, 1], [], []>} : vector<264x64xf32>, vector<64x128xf32>, vector<264x128xf32> -> vector<264x128xf32>
    %c0_98 = arith.constant 0 : index
    %c0_99 = arith.constant 0 : index
    %111 = vector.load %arg14[%c0_98, %c0_99] : memref<1x128xf32, #tpu.memory_space<vmem>>, vector<1x128xf32>
    %112 = vector.broadcast %111 : vector<1x128xf32> to vector<264x128xf32>
    %113 = arith.addf %110, %112 : vector<264x128xf32>
    %cst_100 = arith.constant 0.000000e+00 : f32
    %114 = vector.broadcast %cst_100 : f32 to vector<264x128xf32>
    %115 = arith.maximumf %113, %114 : vector<264x128xf32>
    %116 = vector.extract_strided_slice %115 {offsets = [0, 0], sizes = [128, 128], strides = [1, 1]} : vector<264x128xf32> to vector<128x128xf32>
    %117 = arith.truncf %116 : vector<128x128xf32> to vector<128x128xbf16>
    %c0_101 = arith.constant 0 : index
    %c0_102 = arith.constant 0 : index
    %c0_103 = arith.constant 0 : index
    %118 = vector.load %arg15[%c0_101, %c0_102, %c0_103] : memref<2x128x128xbf16, #tpu.memory_space<vmem>>, vector<1x128x128xbf16>
    %119 = vector.shape_cast %118 : vector<1x128x128xbf16> to vector<128x128xbf16>
    %120 = vector.shape_cast %117 : vector<128x128xbf16> to vector<1x128x128xbf16>
    tpu.vector_store %arg15[%c0_101, %c0_102, %c0_103], %120 {strides = array<i32>} : memref<2x128x128xbf16, #tpu.memory_space<vmem>>, vector<1x128x128xbf16>,
    %121 = vector.extract_strided_slice %115 {offsets = [136, 0], sizes = [128, 128], strides = [1, 1]} : vector<264x128xf32> to vector<128x128xf32>
    %122 = arith.truncf %121 : vector<128x128xf32> to vector<128x128xbf16>
    %c1_104 = arith.constant 1 : index
    %c0_105 = arith.constant 0 : index
    %c0_106 = arith.constant 0 : index
    %123 = vector.load %arg15[%c1_104, %c0_105, %c0_106] : memref<2x128x128xbf16, #tpu.memory_space<vmem>>, vector<1x128x128xbf16>
    %124 = vector.shape_cast %123 : vector<1x128x128xbf16> to vector<128x128xbf16>
    %125 = vector.shape_cast %122 : vector<128x128xbf16> to vector<1x128x128xbf16>
    tpu.vector_store %arg15[%c1_104, %c0_105, %c0_106], %125 {strides = array<i32>} : memref<2x128x128xbf16, #tpu.memory_space<vmem>>, vector<1x128x128xbf16>,
    return
  }
}

module attributes {stable_mosaic.version = 11 : i64} {
  func.func @_fc_kernel(%arg0: i32, %arg1: memref<2x2048xbf16, #tpu.memory_space<vmem>>, %arg2: memref<2048x64xbf16, #tpu.memory_space<vmem>>, %arg3: memref<1x64xf32, #tpu.memory_space<vmem>>, %arg4: memref<2x64xf32, #tpu.memory_space<vmem>>, %arg5: memref<2x64xf32, #tpu.memory_space<vmem>>) attributes {dimension_semantics = [#tpu.dimension_semantics<arbitrary>], iteration_bounds = array<i64: 8>, scalar_prefetch = 0 : i64, scratch_operands = 1 : i64, tpu.core_type = #tpu.core_type<tc>, window_params = [{transform_indices = @transform_0, window_bounds = array<i64: 2, 2048>}, {transform_indices = @transform_1, window_bounds = array<i64: 2048, 64>}, {pipeline_mode = #tpu.pipeline_mode<synchronous>, transform_indices = @transform_2, window_bounds = array<i64: 1, 64>}, {pipeline_mode = #tpu.pipeline_mode<synchronous>, transform_indices = @transform_3, window_bounds = array<i64: 2, 64>}]} {
    %c0_i32 = arith.constant 0 : i32
    %0 = arith.cmpi eq, %arg0, %c0_i32 : i32
    %1 = arith.extui %0 : i1 to i32
    %c0_i32_0 = arith.constant 0 : i32
    %2 = arith.cmpi ne, %1, %c0_i32_0 : i32
    scf.if %2 {
      %cst_9 = arith.constant 0.000000e+00 : f32
      %12 = vector.broadcast %cst_9 : f32 to vector<2x64xf32>
      %c0_10 = arith.constant 0 : index
      %c0_11 = arith.constant 0 : index
      %13 = vector.load %arg5[%c0_10, %c0_11] : memref<2x64xf32, #tpu.memory_space<vmem>>, vector<2x64xf32>
      tpu.vector_store %arg5[%c0_10, %c0_11], %12 {strides = array<i32>} : memref<2x64xf32, #tpu.memory_space<vmem>>, vector<2x64xf32>,
    } else {
    }
    %c0 = arith.constant 0 : index
    %c0_1 = arith.constant 0 : index
    %3 = vector.load %arg5[%c0, %c0_1] : memref<2x64xf32, #tpu.memory_space<vmem>>, vector<2x64xf32>
    %c0_2 = arith.constant 0 : index
    %c0_3 = arith.constant 0 : index
    %4 = vector.load %arg1[%c0_2, %c0_3] : memref<2x2048xbf16, #tpu.memory_space<vmem>>, vector<2x2048xbf16>
    %c0_4 = arith.constant 0 : index
    %c0_5 = arith.constant 0 : index
    %5 = vector.load %arg2[%c0_4, %c0_5] : memref<2048x64xbf16, #tpu.memory_space<vmem>>, vector<2048x64xbf16>
    %cst = arith.constant dense<0.000000e+00> : vector<2x64xf32>
    %6 = tpu.matmul %4, %5, %cst {dimension_numbers = #tpu.dot_dimension_numbers<[1], [0], [0], [1], [0, 0, 1, 1], [], []>} : vector<2x2048xbf16>, vector<2048x64xbf16>, vector<2x64xf32> -> vector<2x64xf32>
    %7 = arith.addf %3, %6 : vector<2x64xf32>
    %c0_6 = arith.constant 0 : index
    %c0_7 = arith.constant 0 : index
    %8 = vector.load %arg5[%c0_6, %c0_7] : memref<2x64xf32, #tpu.memory_space<vmem>>, vector<2x64xf32>
    tpu.vector_store %arg5[%c0_6, %c0_7], %7 {strides = array<i32>} : memref<2x64xf32, #tpu.memory_space<vmem>>, vector<2x64xf32>,
    %c7_i32 = arith.constant 7 : i32
    %9 = arith.cmpi eq, %arg0, %c7_i32 : i32
    %10 = arith.extui %9 : i1 to i32
    %c0_i32_8 = arith.constant 0 : i32
    %11 = arith.cmpi ne, %10, %c0_i32_8 : i32
    scf.if %11 {
      %c0_9 = arith.constant 0 : index
      %c0_10 = arith.constant 0 : index
      %12 = vector.load %arg5[%c0_9, %c0_10] : memref<2x64xf32, #tpu.memory_space<vmem>>, vector<2x64xf32>
      %c0_11 = arith.constant 0 : index
      %c0_12 = arith.constant 0 : index
      %13 = vector.load %arg3[%c0_11, %c0_12] : memref<1x64xf32, #tpu.memory_space<vmem>>, vector<1x64xf32>
      %14 = vector.broadcast %13 : vector<1x64xf32> to vector<2x64xf32>
      %15 = arith.addf %12, %14 : vector<2x64xf32>
      %c0_13 = arith.constant 0 : index
      %c0_14 = arith.constant 0 : index
      %16 = vector.load %arg4[%c0_13, %c0_14] : memref<2x64xf32, #tpu.memory_space<vmem>>, vector<2x64xf32>
      tpu.vector_store %arg4[%c0_13, %c0_14], %15 {strides = array<i32>} : memref<2x64xf32, #tpu.memory_space<vmem>>, vector<2x64xf32>,
    } else {
    }
    return
  }
  func.func @transform_0(%arg0: i32) -> (i32, i32) {
    %c0_i32 = arith.constant 0 : i32
    %c0_i32_0 = arith.constant 0 : i32
    return %c0_i32, %arg0 : i32, i32
  }
  func.func @transform_1(%arg0: i32) -> (i32, i32) {
    %c0_i32 = arith.constant 0 : i32
    %c0_i32_0 = arith.constant 0 : i32
    return %arg0, %c0_i32 : i32, i32
  }
  func.func @transform_2(%arg0: i32) -> (i32, i32) {
    %c0_i32 = arith.constant 0 : i32
    %c0_i32_0 = arith.constant 0 : i32
    %c0_i32_1 = arith.constant 0 : i32
    return %c0_i32, %c0_i32_0 : i32, i32
  }
  func.func @transform_3(%arg0: i32) -> (i32, i32) {
    %c0_i32 = arith.constant 0 : i32
    %c0_i32_0 = arith.constant 0 : i32
    %c0_i32_1 = arith.constant 0 : i32
    return %c0_i32, %c0_i32_0 : i32, i32
  }
}

</mosaic_0001>

<bundles_post_ra>
// kernel: encoder_forward.3
= control target key start
LH: loop header
LB: loop body
LE: loop exit
PB: predicated region body
PF: predicated region fallthrough
CT: control target
= control target key end

     0   :  { %8 = vsyncpa [#allocation4], 0  ;;  %s2244_s12 = smov 0   ;;  %s2440_s0 = inlined_call_operand.vmem [shape: bf16[2,16384], index: 0, kind: input, shape index: {}]   ;;  %s2441_s1 = inlined_call_operand.vmem [shape: bf16[16384,64], index: 1, kind: input, shape index: {}]   ;;  %s2442_s2 = inlined_call_operand.vmem [shape: f32[1,64], index: 2, kind: input, shape index: {}]   ;;  %s2443_s3 = inlined_call_operand.hbm [shape: f32[2,64], index: 3, kind: output, shape index: {}]  }
   0x1 LB: > { %s2250_s13 = sadd.s32 4294967295, %s2219_s12   ;;  %p1723_p0 = scmp.ge.s32.totalorder %s2219_s12, 1  ;;  %s2219_s12 = sphi %s2244_s12, %s14_s12  }
   0x2   : > { %p144_p1 = scmp.lt.s32.totalorder %s2219_s12, 9 }
   0x4   : > { %p145_p2 = pnand %p1723_p0, %p144_p1 }
   0x5   : > { %s1724_s14 = sshll.u32 (!%p145_p2), %s2250_s13, 4  ;;  %s1725_s15 = sshll.u32 (!%p145_p2), %s2250_s13, 8 }
   0x6   : > { %148 = sbr.rel (%p145_p2) target bundleno = 379 (0x17b), region = 32  ;;  %p168_p3 = scmp.lt.s32.totalorder (!%p145_p2), %s1724_s14, 127 }
   0x7   : > { %p173_p4 = scmp.lt.s32.totalorder (!%p145_p2), %s1725_s15, 2047  ;;  %p1727_p5 = scmp.ne.s32.totalorder (!%p145_p2), %s2250_s13, 0 }
   0xb   : > { %s2445_s14 = smov (!%p168_p3, %s1724_s14), 127  ;;  %s2447_s15 = smov (!%p173_p4, %s1725_s15), 2047 }
   0xc   : > { %s2259_s18 = scalar_lea.vmem %s2440_s0, %s2445_s14  ;;  %s1726_s19 = sshll.u32 %s2447_s15, 2 }
   0xd   : > { %s2264_s22 = scalar_lea.vmem %s2441_s1, %s1726_s19  ;;  %182 = sbr.rel (%p1727_p5) target bundleno = 20 (0x14), region = 36 }
  0x12   : > { %vm183_vm0 = vcmask 517120   ;;  %v2221_v0 = vmov 0.0  }
  0x13   : > { %184 = vst.msk [vmem:[#allocation2] sm:$0x3] %vm183_vm0, %v2221_v0 }
  0x14 PF: > { %v2055_v1 = vld [vmem:[%s2264_s22 + $0x78] sm:$0xff]   ;;  %v2059_v5 = vld [vmem:[%s2264_s22 + $0x70] sm:$0xff]   ;;  %v2063_v9 = vld [vmem:[%s2264_s22 + $0x68] sm:$0xff]   ;;  %v450_v29 = vlaneseq  ;;  %v2222_v37 = vmov 1966171168   ;;  %vm1649_vm1 = vcmask 517120  }
  0x15   : > { %v2056_v2 = vld [vmem:[%s2264_s22 + $0xf8] sm:$0xff]   ;;  %1862 = vmatprep.subr.bf16.mxu0 %v2055_v1  ;;  %v2060_v6 = vld [vmem:[%s2264_s22 + $0xf0] sm:$0xff]   ;;  %v2064_v10 = vld [vmem:[%s2264_s22 + $0xe8] sm:$0xff]   ;;  %v448_v38 = vunpack.c.l.s4 %v2222_v37  ;;  %p1856_p6 = scmp.ne.s32.totalorder %s2250_s13, 7 }
  0x16   : > { %v2057_v3 = vld [vmem:[%s2264_s22 + $0x38] sm:$0xff]   ;;  %1884 = vmatprep.subr.bf16.mxu1 %v2056_v2  ;;  %v2061_v7 = vld [vmem:[%s2264_s22 + $0x30] sm:$0xff]   ;;  %v2065_v11 = vld [vmem:[%s2264_s22 + $0x28] sm:$0xff]   ;;  %v451_v34 = vshrl.u32 %v450_v29, 7 }
  0x17   : > { %v2058_v4 = vld [vmem:[%s2264_s22 + $0xb8] sm:$0xff]   ;;  %1863 = vmatpush3.bf16.msra.mxu0 %v2057_v3  ;;  %v2062_v8 = vld [vmem:[%s2264_s22 + $0xb0] sm:$0xff]   ;;  %v2066_v12 = vld [vmem:[%s2264_s22 + $0xa8] sm:$0xff]   ;;  %v449_v41 = vunpack.c.0.s8 %v448_v38 }
  0x18   : > { %1885 = vmatpush3.bf16.msra.mxu1 %v2058_v4  ;;  %1864 = vmatprep.subr.bf16.mxu0 %v2059_v5  ;;  %v2067_v13 = vld [vmem:[%s2264_s22 + $0x60] sm:$0xff]   ;;  %v2071_v17 = vld [vmem:[%s2264_s22 + $0x58] sm:$0xff]   ;;  %v2075_v21 = vld [vmem:[%s2264_s22 + $0x50] sm:$0xff]  }
  0x19   : > { %1886 = vmatprep.subr.bf16.mxu1 %v2060_v6  ;;  %v2068_v14 = vld [vmem:[%s2264_s22 + $0xe0] sm:$0xff]   ;;  %v2072_v18 = vld [vmem:[%s2264_s22 + $0xd8] sm:$0xff]   ;;  %v2076_v22 = vld [vmem:[%s2264_s22 + $0xd0] sm:$0xff]   ;;  %v2302_v42 = vsub.s32 %v449_v41, %v451_v34 }
  0x1a   : > { %v2069_v15 = vld [vmem:[%s2264_s22 + $0x20] sm:$0xff]   ;;  %v2073_v19 = vld [vmem:[%s2264_s22 + $0x18] sm:$0xff]   ;;  %v2077_v23 = vld [vmem:[%s2264_s22 + $0x10] sm:$0xff]  }
  0x1b   : > { %1865 = vmatpush3.bf16.msra.mxu0 %v2061_v7  ;;  %v2070_v16 = vld [vmem:[%s2264_s22 + $0xa0] sm:$0xff]   ;;  %v2074_v20 = vld [vmem:[%s2264_s22 + $0x98] sm:$0xff]   ;;  %v2078_v24 = vld [vmem:[%s2264_s22 + $0x90] sm:$0xff]  }
  0x1c   : > { %1887 = vmatpush3.bf16.msra.mxu1 %v2062_v8  ;;  %1866 = vmatprep.subr.bf16.mxu0 %v2063_v9  ;;  %v2079_v25 = vld [vmem:[%s2264_s22 + $0x48] sm:$0xff]   ;;  %v2083_v30 = vld [vmem:[%s2264_s22 + $0x40] sm:$0xff]   ;;  %v2088_v36 = vld [vmem:[%s2264_s22 + $0x178] sm:$0xff]  }
  0x1d   : > { %1888 = vmatprep.subr.bf16.mxu1 %v2064_v10  ;;  %v2080_v26 = vld [vmem:[%s2264_s22 + $0xc8] sm:$0xff]   ;;  %v2084_v31 = vld [vmem:[%s2264_s22 + $0xc0] sm:$0xff]   ;;  %v2089_v39 = vld [vmem:[%s2264_s22 + $0x1f8] sm:$0xff]  }
  0x1e   : > { %v2081_v27 = vld [vmem:[%s2264_s22 + $0x8] sm:$0xff]   ;;  %v2085_v32 = vld [vmem:[%s2264_s22] sm:$0xff]   ;;  %v2090_v49 = vld [vmem:[%s2264_s22 + $0x138] sm:$0xff]  }
  0x1f   : > { %1867 = vmatpush3.bf16.msra.mxu0 %v2065_v11  ;;  %v2082_v28 = vld [vmem:[%s2264_s22 + $0x88] sm:$0xff]   ;;  %v2086_v33 = vld [vmem:[%s2264_s22 + $0x80] sm:$0xff]   ;;  %v2092_v52 = vld [vmem:[%s2264_s22 + $0x170] sm:$0xff]  }
  0x20   : > { %1889 = vmatpush3.bf16.msra.mxu1 %v2066_v12  ;;  %1868 = vmatprep.subr.bf16.mxu0 %v2067_v13  ;;  %v186_v35 = vld [vmem:[%s2259_s18] sm:$0xff]  ;;  %v2091_v54 = vld [vmem:[%s2264_s22 + $0x1b8] sm:$0xff]   ;;  %v2093_v55 = vld [vmem:[%s2264_s22 + $0x1f0] sm:$0xff]  }
  0x21   : > { %1890 = vmatprep.subr.bf16.mxu1 %v2068_v14  ;;  %v446_v40 = vcombine.high %v186_v35, %v186_v35  ;;  %v453_v43 = vrot.slane %v186_v35, %v2302_v42  ;;  %v2094_v57 = vld [vmem:[%s2264_s22 + $0x130] sm:$0xff]   ;;  %v2096_v58 = vld [vmem:[%s2264_s22 + $0x168] sm:$0xff]   ;;  %v2100_v62 = vld [vmem:[%s2264_s22 + $0x160] sm:$0xff]  }
  0x22   : > { %v2095_v59 = vld [vmem:[%s2264_s22 + $0x1b0] sm:$0xff]   ;;  %v2097_v60 = vld [vmem:[%s2264_s22 + $0x1e8] sm:$0xff]   ;;  %v2101_v0 = vld [vmem:[%s2264_s22 + $0x1e0] sm:$0xff]  }
  0x23   : > { %1869 = vmatpush3.bf16.msra.mxu0 %v2069_v15  ;;  %v2306_v44 = vrot.slane %v446_v40, %v2302_v42  ;;  %v461_v45 = vcombine.high %v453_v43, %v453_v43  ;;  %v469_v46 = vrot.slane %v453_v43, %v2302_v42  ;;  %v2098_v61 = vld [vmem:[%s2264_s22 + $0x128] sm:$0xff]   ;;  %v2102_v1 = vld [vmem:[%s2264_s22 + $0x120] sm:$0xff]   ;;  %v2104_v2 = vld [vmem:[%s2264_s22 + $0x158] sm:$0xff]  }
  0x24   : > { %1891 = vmatpush3.bf16.msra.mxu1 %v2070_v16  ;;  %1870 = vmatprep.subr.bf16.mxu0 %v2071_v17  ;;  %v2099_v63 = vld [vmem:[%s2264_s22 + $0x1a8] sm:$0xff]   ;;  %v2103_v3 = vld [vmem:[%s2264_s22 + $0x1a0] sm:$0xff]   ;;  %v2105_v4 = vld [vmem:[%s2264_s22 + $0x1d8] sm:$0xff]  }
  0x25   : > { %1892 = vmatprep.subr.bf16.mxu1 %v2072_v18  ;;  %v462_v47 = vcombine.high %v2306_v44, %v2306_v44  ;;  %v483_v48 = vrot.slane %v461_v45, %v2302_v42  ;;  %v491_v51 = vcombine.high %v469_v46, %v469_v46  ;;  %v2106_v5 = vld [vmem:[%s2264_s22 + $0x118] sm:$0xff]   ;;  %v2108_v6 = vld [vmem:[%s2264_s22 + $0x150] sm:$0xff]   ;;  %v2112_v10 = vld [vmem:[%s2264_s22 + $0x148] sm:$0xff]   ;;  %v476_v18 = vrot.slane %v2306_v44, %v2302_v42 }
  0x26   : > { %v2107_v7 = vld [vmem:[%s2264_s22 + $0x198] sm:$0xff]   ;;  %v2109_v8 = vld [vmem:[%s2264_s22 + $0x1d0] sm:$0xff]   ;;  %v2113_v12 = vld [vmem:[%s2264_s22 + $0x1c8] sm:$0xff]  }
  0x27   : > { %1871 = vmatpush3.bf16.msra.mxu0 %v2073_v19  ;;  %v490_v50 = vrot.slane %v462_v47, %v2302_v42  ;;  %1360 = vmatprep.mubr.bf16.mxu0 %v483_v48  ;;  %v493_v53 = vcombine.high %v483_v48, %v483_v48  ;;  %v2110_v9 = vld [vmem:[%s2264_s22 + $0x110] sm:$0xff]   ;;  %v2114_v13 = vld [vmem:[%s2264_s22 + $0x108] sm:$0xff]   ;;  %v2116_v14 = vld [vmem:[%s2264_s22 + $0x140] sm:$0xff]  }
  0x28   : > { %1893 = vmatpush3.bf16.msra.mxu1 %v2074_v20  ;;  %1872 = vmatprep.subr.bf16.mxu0 %v2075_v21  ;;  %v2111_v11 = vld [vmem:[%s2264_s22 + $0x190] sm:$0xff]   ;;  %v2115_v15 = vld [vmem:[%s2264_s22 + $0x188] sm:$0xff]   ;;  %v2117_v16 = vld [vmem:[%s2264_s22 + $0x1c0] sm:$0xff]  }
  0x29   : > { %1894 = vmatprep.subr.bf16.mxu1 %v2076_v22  ;;  %v494_v56 = vcombine.high %v490_v50, %v490_v50  ;;  %1400 = vmatprep.mubr.bf16.mxu1 %v493_v53  ;;  %v2118_v17 = vld [vmem:[%s2264_s22 + $0x100] sm:$0xff]   ;;  %v2120_v19 = vld [vmem:[%s2264_s22 + $0x278] sm:$0xff]   ;;  %v2127_v29 = vld [vmem:[%s2264_s22 + $0x2b0] sm:$0xff]  }
  0x2a   : > { %v2119_v20 = vld [vmem:[%s2264_s22 + $0x180] sm:$0xff]   ;;  %v2121_v21 = vld [vmem:[%s2264_s22 + $0x2f8] sm:$0xff]   ;;  %v2140_v40 = vld [vmem:[%s2264_s22 + $0x250] sm:$0xff]  }
  0x2b   : > { %1873 = vmatpush3.bf16.msra.mxu0 %v2077_v23  ;;  %v2122_v22 = vld [vmem:[%s2264_s22 + $0x238] sm:$0xff]   ;;  %v492_v23 = vcombine.high %v476_v18, %v476_v18  ;;  %v2133_v34 = vld [vmem:[%s2264_s22 + $0x2e0] sm:$0xff]   ;;  %v2141_v43 = vld [vmem:[%s2264_s22 + $0x2d0] sm:$0xff]  }
  0x2c   : > { %1895 = vmatpush3.bf16.msra.mxu1 %v2078_v24  ;;  %1874 = vmatprep.subr.bf16.mxu0 %v2079_v25  ;;  %v2124_v24 = vld [vmem:[%s2264_s22 + $0x270] sm:$0xff]   ;;  %v2123_v25 = vld [vmem:[%s2264_s22 + $0x2b8] sm:$0xff]   ;;  %v2134_v35 = vld [vmem:[%s2264_s22 + $0x220] sm:$0xff]  }
  0x2d   : > { %1896 = vmatprep.subr.bf16.mxu1 %v2080_v26  ;;  %v2125_v26 = vld [vmem:[%s2264_s22 + $0x2f0] sm:$0xff]   ;;  %v2135_v37 = vld [vmem:[%s2264_s22 + $0x2a0] sm:$0xff]   ;;  %v2137_v38 = vld [vmem:[%s2264_s22 + $0x2d8] sm:$0xff]  }
  0x2e   : > { %v2139_v41 = vld [vmem:[%s2264_s22 + $0x298] sm:$0xff]   ;;  %v2142_v44 = vld [vmem:[%s2264_s22 + $0x210] sm:$0xff]   ;;  %v2144_v45 = vld [vmem:[%s2264_s22 + $0x248] sm:$0xff]  }
  0x2f   : > { %1875 = vmatpush3.bf16.msra.mxu0 %v2081_v27  ;;  %v2126_v27 = vld [vmem:[%s2264_s22 + $0x230] sm:$0xff]  }
  0x30   : > { %1897 = vmatpush3.bf16.msra.mxu1 %v2082_v28  ;;  %1876 = vmatprep.subr.bf16.mxu0 %v2083_v30  ;;  %v2128_v28 = vld [vmem:[%s2264_s22 + $0x268] sm:$0xff]   ;;  %v2143_v47 = vld [vmem:[%s2264_s22 + $0x290] sm:$0xff]  }
  0x31   : > { %1898 = vmatprep.subr.bf16.mxu1 %v2084_v31  ;;  %v2129_v30 = vld [vmem:[%s2264_s22 + $0x2e8] sm:$0xff]  }
  0x32   : > { %v2130_v31 = vld [vmem:[%s2264_s22 + $0x228] sm:$0xff]  }
  0x33   : > { %1877 = vmatpush3.bf16.msra.mxu0 %v2085_v32  ;;  %v2132_v32 = vld [vmem:[%s2264_s22 + $0x260] sm:$0xff]  }
  0x34   : > { %1899 = vmatpush3.bf16.msra.mxu1 %v2086_v33  ;;  %1906 = vmatprep.subr.bf16.mxu0 %v2088_v36  ;;  %v2131_v33 = vld [vmem:[%s2264_s22 + $0x2a8] sm:$0xff]   ;;  %v2136_v36 = vld [vmem:[%s2264_s22 + $0x258] sm:$0xff]  }
  0x35   : > { %1928 = vmatprep.subr.bf16.mxu1 %v2089_v39  ;;  %v2138_v39 = vld [vmem:[%s2264_s22 + $0x218] sm:$0xff]  }
  0x36   : > { %1361 = vmatmul.mubr.bf16.vlgmr.msra.gmra.mxu0 %v469_v46  ;;  %v187_v46 = vld [vmem:[%s2259_s18 + $0x8] sm:$0xff] }
  0x37   : > { %1907 = vmatpush3.bf16.msra.mxu0 %v2090_v49  ;;  %1401 = vmatmul.mubr.bf16.vlgmr.msra.gmra.mxu1 %v491_v51  ;;  %v502_v48 = vrot.slane %v187_v46, %v2302_v42  ;;  %v495_v49 = vcombine.high %v187_v46, %v187_v46  ;;  %v2146_v51 = vld [vmem:[%s2264_s22 + $0x208] sm:$0xff]  }
  0x38   : > { %1908 = vmatprep.subr.bf16.mxu0 %v2092_v52  ;;  %1929 = vmatpush3.bf16.msra.mxu1 %v2091_v54  ;;  %v2148_v54 = vld [vmem:[%s2264_s22 + $0x240] sm:$0xff]  }
  0x39   : > { %1440 = vmatprep.mubr.bf16.mxu0 %v490_v50  ;;  %1930 = vmatprep.subr.bf16.mxu1 %v2093_v55  ;;  %v2145_v50 = vld [vmem:[%s2264_s22 + $0x2c8] sm:$0xff]   ;;  %v510_v52 = vcombine.high %v502_v48, %v502_v48  ;;  %v2375_v53 = vrot.slane %v495_v49, %v2302_v42 }
  0x3a   : > { %1480 = vmatprep.mubr.bf16.mxu1 %v494_v56  ;;  %v2147_v55 = vld [vmem:[%s2264_s22 + $0x288] sm:$0xff]  }
  0x3b   : > { %1909 = vmatpush3.bf16.msra.mxu0 %v2094_v57  ;;  %v532_v56 = vrot.slane %v510_v52, %v2302_v42  ;;  %v511_v57 = vcombine.high %v2375_v53, %v2375_v53 }
  0x3c   : > { %1910 = vmatprep.subr.bf16.mxu0 %v2096_v58  ;;  %1931 = vmatpush3.bf16.msra.mxu1 %v2095_v59  ;;  %v2149_v58 = vld [vmem:[%s2264_s22 + $0x2c0] sm:$0xff]  }
  0x3d   : > { %1932 = vmatprep.subr.bf16.mxu1 %v2097_v60  ;;  %v2150_v59 = vld [vmem:[%s2264_s22 + $0x200] sm:$0xff]   ;;  %v542_v60 = vcombine.high %v532_v56, %v532_v56 }
  0x3f   : > { %1911 = vmatpush3.bf16.msra.mxu0 %v2098_v61  ;;  %v518_v61 = vrot.slane %v502_v48, %v2302_v42 }
  0x40   : > { %1912 = vmatprep.subr.bf16.mxu0 %v2100_v62  ;;  %1933 = vmatpush3.bf16.msra.mxu1 %v2099_v63  ;;  %v2152_v62 = vld [vmem:[%s2264_s22 + $0x378] sm:$0xff]   ;;  %v2151_v63 = vld [vmem:[%s2264_s22 + $0x280] sm:$0xff]  }
  0x41   : > { %1934 = vmatprep.subr.bf16.mxu1 %v2101_v0  ;;  %v539_v0 = vrot.slane %v511_v57, %v2302_v42 }
  0x43   : > { %1913 = vmatpush3.bf16.msra.mxu0 %v2102_v1  ;;  %v2153_v1 = vld [vmem:[%s2264_s22 + $0x3f8] sm:$0xff]  }
  0x44   : > { %1914 = vmatprep.subr.bf16.mxu0 %v2104_v2  ;;  %1935 = vmatpush3.bf16.msra.mxu1 %v2103_v3  ;;  %v2154_v2 = vld [vmem:[%s2264_s22 + $0x338] sm:$0xff]   ;;  %v540_v3 = vcombine.high %v518_v61, %v518_v61 }
  0x45   : > { %1936 = vmatprep.subr.bf16.mxu1 %v2105_v4  ;;  %v2156_v4 = vld [vmem:[%s2264_s22 + $0x370] sm:$0xff]  }
  0x47   : > { %1915 = vmatpush3.bf16.msra.mxu0 %v2106_v5  ;;  %v2155_v5 = vld [vmem:[%s2264_s22 + $0x3b8] sm:$0xff]  }
  0x48   : > { %1916 = vmatprep.subr.bf16.mxu0 %v2108_v6  ;;  %1937 = vmatpush3.bf16.msra.mxu1 %v2107_v7  ;;  %v543_v6 = vcombine.high %v539_v0, %v539_v0  ;;  %v2157_v7 = vld [vmem:[%s2264_s22 + $0x3f0] sm:$0xff]  }
  0x49   : > { %1938 = vmatprep.subr.bf16.mxu1 %v2109_v8  ;;  %v2158_v8 = vld [vmem:[%s2264_s22 + $0x330] sm:$0xff]  }
  0x4b   : > { %1917 = vmatpush3.bf16.msra.mxu0 %v2110_v9  ;;  %v2160_v9 = vld [vmem:[%s2264_s22 + $0x368] sm:$0xff]  }
  0x4c   : > { %1918 = vmatprep.subr.bf16.mxu0 %v2112_v10  ;;  %1939 = vmatpush3.bf16.msra.mxu1 %v2111_v11  ;;  %v2159_v10 = vld [vmem:[%s2264_s22 + $0x3b0] sm:$0xff]   ;;  %v2161_v11 = vld [vmem:[%s2264_s22 + $0x3e8] sm:$0xff]  }
  0x4d   : > { %1940 = vmatprep.subr.bf16.mxu1 %v2113_v12  ;;  %v2162_v12 = vld [vmem:[%s2264_s22 + $0x328] sm:$0xff]  }
  0x4f   : > { %1919 = vmatpush3.bf16.msra.mxu0 %v2114_v13  ;;  %v2164_v13 = vld [vmem:[%s2264_s22 + $0x360] sm:$0xff]  }
  0x50   : > { %1920 = vmatprep.subr.bf16.mxu0 %v2116_v14  ;;  %1941 = vmatpush3.bf16.msra.mxu1 %v2115_v15  ;;  %v2163_v14 = vld [vmem:[%s2264_s22 + $0x3a8] sm:$0xff]   ;;  %v2165_v15 = vld [vmem:[%s2264_s22 + $0x3e0] sm:$0xff]  }
  0x51   : > { %1942 = vmatprep.subr.bf16.mxu1 %v2117_v16  ;;  %v2166_v16 = vld [vmem:[%s2264_s22 + $0x320] sm:$0xff]  }
  0x53   : > { %1921 = vmatpush3.bf16.msra.mxu0 %v2118_v17  ;;  %v2168_v17 = vld [vmem:[%s2264_s22 + $0x358] sm:$0xff]  }
  0x54   : > { %1950 = vmatprep.subr.bf16.mxu0 %v2120_v19  ;;  %1943 = vmatpush3.bf16.msra.mxu1 %v2119_v20  ;;  %v2169_v19 = vld [vmem:[%s2264_s22 + $0x3d8] sm:$0xff]  }
  0x55   : > { %1972 = vmatprep.subr.bf16.mxu1 %v2121_v21  ;;  %v2170_v20 = vld [vmem:[%s2264_s22 + $0x318] sm:$0xff]   ;;  %v2172_v21 = vld [vmem:[%s2264_s22 + $0x350] sm:$0xff]  }
  0x56   : > { %1441 = vmatmul.mubr.bf16.vlgmr.msra.gmra.mxu0 %v476_v18  ;;  %v2167_v18 = vld [vmem:[%s2264_s22 + $0x3a0] sm:$0xff]  }
  0x57   : > { %1951 = vmatpush3.bf16.msra.mxu0 %v2122_v22  ;;  %1481 = vmatmul.mubr.bf16.vlgmr.msra.gmra.mxu1 %v492_v23  ;;  %v2171_v22 = vld [vmem:[%s2264_s22 + $0x398] sm:$0xff]   ;;  %v2173_v23 = vld [vmem:[%s2264_s22 + $0x3d0] sm:$0xff]  }
  0x58   : > { %1952 = vmatprep.subr.bf16.mxu0 %v2124_v24  ;;  %1973 = vmatpush3.bf16.msra.mxu1 %v2123_v25  ;;  %v2174_v24 = vld [vmem:[%s2264_s22 + $0x310] sm:$0xff]   ;;  %v2176_v25 = vld [vmem:[%s2264_s22 + $0x348] sm:$0xff]  }
  0x59   : > { %1974 = vmatprep.subr.bf16.mxu1 %v2125_v26  ;;  %1520 = vmatprep.mubr.bf16.mxu0 %v532_v56  ;;  %v2175_v26 = vld [vmem:[%s2264_s22 + $0x390] sm:$0xff]  }
  0x5a   : > { %1560 = vmatprep.mubr.bf16.mxu1 %v542_v60 }
  0x5b   : > { %1953 = vmatpush3.bf16.msra.mxu0 %v2126_v27  ;;  %v2177_v27 = vld [vmem:[%s2264_s22 + $0x3c8] sm:$0xff]  }
  0x5c   : > { %1954 = vmatprep.subr.bf16.mxu0 %v2128_v28  ;;  %1975 = vmatpush3.bf16.msra.mxu1 %v2127_v29  ;;  %v2178_v28 = vld [vmem:[%s2264_s22 + $0x308] sm:$0xff]   ;;  %v2180_v29 = vld [vmem:[%s2264_s22 + $0x340] sm:$0xff]  }
  0x5d   : > { %1976 = vmatprep.subr.bf16.mxu1 %v2129_v30  ;;  %v2179_v30 = vld [vmem:[%s2264_s22 + $0x388] sm:$0xff]  }
  0x5f   : > { %1955 = vmatpush3.bf16.msra.mxu0 %v2130_v31  ;;  %v2181_v31 = vld [vmem:[%s2264_s22 + $0x3c0] sm:$0xff]  }
  0x60   : > { %1956 = vmatprep.subr.bf16.mxu0 %v2132_v32  ;;  %1977 = vmatpush3.bf16.msra.mxu1 %v2131_v33  ;;  %v2182_v32 = vld [vmem:[%s2264_s22 + $0x300] sm:$0xff]   ;;  %v525_v33 = vrot.slane %v2375_v53, %v2302_v42 }
  0x61   : > { %1978 = vmatprep.subr.bf16.mxu1 %v2133_v34  ;;  %v2183_v34 = vld [vmem:[%s2264_s22 + $0x380] sm:$0xff]  }
  0x63   : > { %1957 = vmatpush3.bf16.msra.mxu0 %v2134_v35  ;;  %v541_v35 = vcombine.high %v525_v33, %v525_v33 }
  0x64   : > { %1958 = vmatprep.subr.bf16.mxu0 %v2136_v36  ;;  %1979 = vmatpush3.bf16.msra.mxu1 %v2135_v37 }
  0x65   : > { %1980 = vmatprep.subr.bf16.mxu1 %v2137_v38 }
  0x67   : > { %1959 = vmatpush3.bf16.msra.mxu0 %v2138_v39 }
  0x68   : > { %1960 = vmatprep.subr.bf16.mxu0 %v2140_v40  ;;  %1981 = vmatpush3.bf16.msra.mxu1 %v2139_v41 }
  0x69   : > { %1982 = vmatprep.subr.bf16.mxu1 %v2141_v43 }
  0x6b   : > { %1961 = vmatpush3.bf16.msra.mxu0 %v2142_v44 }
  0x6c   : > { %1962 = vmatprep.subr.bf16.mxu0 %v2144_v45  ;;  %1983 = vmatpush3.bf16.msra.mxu1 %v2143_v47 }
  0x6d   : > { %1984 = vmatprep.subr.bf16.mxu1 %v2145_v50 }
  0x6f   : > { %1963 = vmatpush3.bf16.msra.mxu0 %v2146_v51 }
  0x70   : > { %1964 = vmatprep.subr.bf16.mxu0 %v2148_v54  ;;  %1985 = vmatpush3.bf16.msra.mxu1 %v2147_v55 }
  0x71   : > { %1986 = vmatprep.subr.bf16.mxu1 %v2149_v58 }
  0x73   : > { %1965 = vmatpush3.bf16.msra.mxu0 %v2150_v59 }
  0x74   : > { %1994 = vmatprep.subr.bf16.mxu0 %v2152_v62  ;;  %1987 = vmatpush3.bf16.msra.mxu1 %v2151_v63 }
  0x75   : > { %2016 = vmatprep.subr.bf16.mxu1 %v2153_v1 }
  0x76   : > { %1521 = vmatmul.mubr.bf16.vlgmr.msra.gmra.mxu0 %v518_v61 }
  0x77   : > { %1995 = vmatpush3.bf16.msra.mxu0 %v2154_v2  ;;  %1600 = vmatprep.mubr.bf16.mxu0 %v539_v0 }
  0x78   : > { %1561 = vmatmul.mubr.bf16.vlgmr.msra.gmra.mxu1 %v540_v3  ;;  %1996 = vmatprep.subr.bf16.mxu0 %v2156_v4 }
  0x79   : > { %2017 = vmatpush3.bf16.msra.mxu1 %v2155_v5  ;;  %1640 = vmatprep.mubr.bf16.mxu1 %v543_v6 }
  0x7a   : > { %2018 = vmatprep.subr.bf16.mxu1 %v2157_v7 }
  0x7b   : > { %1997 = vmatpush3.bf16.msra.mxu0 %v2158_v8 }
  0x7c   : > { %1998 = vmatprep.subr.bf16.mxu0 %v2160_v9 }
  0x7d   : > { %2019 = vmatpush3.bf16.msra.mxu1 %v2159_v10 }
  0x7e   : > { %2020 = vmatprep.subr.bf16.mxu1 %v2161_v11 }
  0x7f   : > { %1999 = vmatpush3.bf16.msra.mxu0 %v2162_v12 }
  0x80   : > { %2000 = vmatprep.subr.bf16.mxu0 %v2164_v13 }
  0x81   : > { %2021 = vmatpush3.bf16.msra.mxu1 %v2163_v14 }
  0x82   : > { %2022 = vmatprep.subr.bf16.mxu1 %v2165_v15  ;;  %v185_v15 = vld [vmem:[#allocation2] sm:$0x3] }
  0x83   : > { %2001 = vmatpush3.bf16.msra.mxu0 %v2166_v16 }
  0x84   : > { %2002 = vmatprep.subr.bf16.mxu0 %v2168_v17 }
  0x85   : > { %2023 = vmatpush3.bf16.msra.mxu1 %v2167_v18 }
  0x86   : > { %2024 = vmatprep.subr.bf16.mxu1 %v2169_v19 }
  0x87   : > { %2003 = vmatpush3.bf16.msra.mxu0 %v2170_v20 }
  0x88   : > { %2004 = vmatprep.subr.bf16.mxu0 %v2172_v21 }
  0x89   : > { %2025 = vmatpush3.bf16.msra.mxu1 %v2171_v22 }
  0x8a   : > { %2026 = vmatprep.subr.bf16.mxu1 %v2173_v23 }
  0x8b   : > { %2005 = vmatpush3.bf16.msra.mxu0 %v2174_v24 }
  0x8c   : > { %2006 = vmatprep.subr.bf16.mxu0 %v2176_v25 }
  0x8d   : > { %2027 = vmatpush3.bf16.msra.mxu1 %v2175_v26 }
  0x8e   : > { %2028 = vmatprep.subr.bf16.mxu1 %v2177_v27 }
  0x8f   : > { %2007 = vmatpush3.bf16.msra.mxu0 %v2178_v28 }
  0x90   : > { %2008 = vmatprep.subr.bf16.mxu0 %v2180_v29 }
  0x91   : > { %2029 = vmatpush3.bf16.msra.mxu1 %v2179_v30 }
  0x92   : > { %2030 = vmatprep.subr.bf16.mxu1 %v2181_v31 }
  0x93   : > { %2009 = vmatpush3.bf16.msra.mxu0 %v2182_v32 }
  0x95   : > { %2031 = vmatpush3.bf16.msra.mxu1 %v2183_v34 }
  0x96   : > { %1601 = vmatmul.mubr.bf16.vlgmr.msra.gmra.mxu0 %v525_v33 }
  0x98   : > { %1641 = vmatmul.mubr.bf16.vlgmr.msra.gmra.mxu1 %v541_v35 }
  0xf6   : > { %v1878_v36 = vpop.f32.mrf.mxu0 }
  0xf7   : > { %v1900_v37 = vpop.f32.mrf.mxu1 }
  0xf8   : > { %v1879_v38 = vpop.f32.mrf.mxu0 }
  0xf9   : > { %v1880_v39 = vadd.f32 %v1879_v38, %v1878_v36  ;;  %v1901_v40 = vpop.f32.mrf.mxu1 }
  0xfa   : > { %v1881_v41 = vpop.f32.mrf.mxu0  ;;  %v1902_v43 = vadd.f32 %v1901_v40, %v1900_v37 }
  0xfb   : > { %v1903_v44 = vpop.f32.mrf.mxu1 }
  0xfc   : > { %v1882_v45 = vpop.f32.mrf.mxu0  ;;  %v1403_v46 = vadd.f32 %v1902_v43, %v1880_v39 }
  0xfd   : > { %v1904_v47 = vpop.f32.mrf.mxu1 }
 0x116   : > { %v1922_v42 = vpop.f32.mrf.mxu0 }
 0x117   : > { %v1944_v48 = vpop.f32.mrf.mxu1 }
 0x118   : > { %v1923_v49 = vpop.f32.mrf.mxu0 }
 0x119   : > { %v1945_v50 = vpop.f32.mrf.mxu1  ;;  %v1924_v63 = vadd.f32 %v1923_v49, %v1922_v42 }
 0x11a   : > { %v1925_v51 = vpop.f32.mrf.mxu0  ;;  %v1946_v1 = vadd.f32 %v1945_v50, %v1944_v48 }
 0x11b   : > { %v1947_v52 = vpop.f32.mrf.mxu1  ;;  %v1443_v0 = vadd.f32 %v1924_v63, %v1403_v46 }
 0x11c   : > { %v1926_v53 = vpop.f32.mrf.mxu0 }
 0x11d   : > { %v1948_v54 = vpop.f32.mrf.mxu1  ;;  %v1483_v3 = vadd.f32 %v1946_v1, %v1443_v0 }
 0x136   : > { %v1966_v55 = vpop.f32.mrf.mxu0 }
 0x138   : > { %v1988_v56 = vpop.f32.mrf.mxu1  ;;  %v1967_v57 = vpop.f32.mrf.mxu0 }
 0x139   : > { %v1968_v2 = vadd.f32 %v1967_v57, %v1966_v55 }
 0x13a   : > { %v1989_v58 = vpop.f32.mrf.mxu1  ;;  %v1969_v59 = vpop.f32.mrf.mxu0 }
 0x13b   : > { %v1523_v4 = vadd.f32 %v1968_v2, %v1483_v3  ;;  %v1990_v5 = vadd.f32 %v1989_v58, %v1988_v56 }
 0x13c   : > { %v1991_v60 = vpop.f32.mrf.mxu1  ;;  %v1970_v61 = vpop.f32.mrf.mxu0 }
 0x13d   : > { %v1563_v9 = vadd.f32 %v1990_v5, %v1523_v4 }
 0x13e   : > { %v1992_v62 = vpop.f32.mrf.mxu1 }
 0x156   : > { %v2010_v6 = vpop.f32.mrf.mxu0 }
 0x158   : > { %v2032_v7 = vpop.f32.mrf.mxu1  ;;  %v2011_v8 = vpop.f32.mrf.mxu0 }
 0x159   : > { %v2012_v10 = vadd.f32 %v2011_v8, %v2010_v6 }
 0x15a   : > { %v2033_v11 = vpop.f32.mrf.mxu1  ;;  %v2013_v12 = vpop.f32.mrf.mxu0 }
 0x15b   : > { %v1603_v13 = vadd.f32 %v2012_v10, %v1563_v9  ;;  %v2034_v14 = vadd.f32 %v2033_v11, %v2032_v7 }
 0x15c   : > { %v2035_v16 = vpop.f32.mrf.mxu1  ;;  %v2014_v17 = vpop.f32.mrf.mxu0 }
 0x15d   : > { %v1643_v18 = vadd.f32 %v2034_v14, %v1603_v13  ;;  %1654 = sbr.rel (%p1856_p6) target bundleno = 364 (0x16c), region = 40 }
 0x15e   : > { %v2036_v19 = vpop.f32.mrf.mxu1 }
 0x15f   : > { %v1648_v20 = vadd.f32 %v1643_v18, %v185_v15 }
 0x161   : > { %1650 = vst.msk [vmem:[#allocation2] sm:$0x3] %vm1649_vm1, %v1648_v20 }
 0x162   : > { %v1857_v22 = vld [vmem:[%s2442_s2] ss:$0 sm:$0xff] }
 0x168   : > { %v1655_v21 = vld [vmem:[#allocation2] sm:$0x3] }
 0x169   : > { %v1663_v23 = vadd.f32 %v1857_v22, %v1655_v21 }
 0x16b   : > { %1664 = vst.msk [vmem:[#allocation3] sm:$0x3] %vm1649_vm1, %v1663_v23 }
 0x16c PF: > { %p2042_p7 = scmp.eq.s32.totalorder %s2250_s13, 7  ;;  %s2223_s25 = smov [#allocation3]  }
 0x16d   : > { %s1672_s26 = sshll.u32 %s2223_s25, 4  ;;  %s1673_s26 = int_to_ptr.vmem [resolvable:$true] %s1672_s26 }
 0x16e   : > { %s2185_s27 = scalar_lea.vmem %s1673_s26, 32  ;;  %p2192_p11 = scmp.lt.s32.totalorder %s1673_s26, %s1673_s26 }
 0x16f   : > { %p2186_p8 = scmp.ne.s32.totalorder %s1673_s26, %s2185_s27  ;;  %p2193_p12 = scmp.lt.s32.totalorder %s2185_s27, %s2185_s27 }
 0x171   : > { %p2187_p9 = pnand %p2186_p8, %p2042_p7  ;;  %p2194_p13 = por %p2193_p12, %p2192_p11 }
 0x173   : > { %p2188_p10 = pneg %p2187_p9 }
 0x175   : > { %p2195_p0 = pnand %p2194_p13, %p2188_p10 }
 0x177   : > { %2198 = shalt.err (!%p2195_p0)
}
 0x178   : > { %2039 = dma.vmem_to_hbm [thread:$0]  (%p2042_p7), %s1673_s26, 32, %s2443_s3, [#allocation4]  }
 0x179   : > { %2214 = dma.done.wait (%p2042_p7), [#allocation4], 32  }
 0x17a   : > { %2216 = vsyncadd (%p2042_p7), [#allocation4], 4294967264 }
 0x17b PF: > { %s14_s12 = sadd.s32 1, %s2219_s12  }
 0x17c   : > { %p11_p1 = scmp.ge.s32.totalorder %s14_s12, 10  }
 0x17e   :  { %13 = sbr.rel (!%p11_p1) target bundleno = 1 (0x1), region = 70 }
 0x183   :  { %1685 = vsyncpa [#allocation4], 1 }
 0x184   :  { %1687 = vsyncpa [#allocation4 + $0x1], 1 }

// kernel: encoder_forward.2
= control target key start
LH: loop header
LB: loop body
LE: loop exit
PB: predicated region body
PF: predicated region fallthrough
CT: control target
= control target key end

     0   :  { %20 = vsyncpa [#allocation6], 0  ;;  %s5551_s0 = inlined_call_operand.vmem [shape: f32[244,130], index: 0, kind: input, shape index: {}]   ;;  %s5552_s1 = inlined_call_operand.vmem [shape: f32[130,16], index: 1, kind: input, shape index: {}]   ;;  %s5553_s2 = inlined_call_operand.hbm [shape: f32[1,16], index: 2, kind: input, shape index: {}]   ;;  %s5554_s3 = inlined_call_operand.hbm [shape: f32[3,16], index: 3, kind: input, shape index: {}]   ;;  %s5555_s4 = inlined_call_operand.hbm [shape: f32[1,16], index: 4, kind: input, shape index: {}]   ;;  %s5556_s5 = inlined_call_operand.hbm [shape: f32[16,32], index: 5, kind: input, shape index: {}]   ;;  %s5557_s6 = inlined_call_operand.hbm [shape: f32[1,32], index: 6, kind: input, shape index: {}]   ;;  %s5558_s7 = inlined_call_operand.hbm [shape: f32[3,32], index: 7, kind: input, shape index: {}]   ;;  %s5559_s8 = inlined_call_operand.hbm [shape: f32[1,32], index: 8, kind: input, shape index: {}]   ;;  %s5560_s9 = inlined_call_operand.hbm [shape: f32[32,64], index: 9, kind: input, shape index: {}]   ;;  %s5561_s10 = inlined_call_operand.hbm [shape: f32[1,64], index: 10, kind: input, shape index: {}]   ;;  %s5562_s11 = inlined_call_operand.hbm [shape: f32[3,64], index: 11, kind: input, shape index: {}]   ;;  %s5563_s12 = inlined_call_operand.hbm [shape: f32[1,64], index: 12, kind: input, shape index: {}]   ;;  %s5564_s13 = inlined_call_operand.hbm [shape: f32[64,128], index: 13, kind: input, shape index: {}]   ;;  %s5565_s14 = inlined_call_operand.hbm [shape: f32[1,128], index: 14, kind: input, shape index: {}]   ;;  %s5566_s15 = inlined_call_operand.vmem [shape: bf16[2,128,128], index: 15, kind: output, shape index: {}]  }
   0x1   :  { %21 = vsyncpa [#allocation8], 0 }
   0x2   :  { %22 = vsyncpa [#allocation11], 0 }
   0x3   :  { %23 = vsyncpa [#allocation14], 0 }
   0x4   :  { %24 = vsyncpa [#allocation17], 0 }
   0x5   :  { %25 = vsyncpa [#allocation20], 0 }
   0x6   :  { %26 = vsyncpa [#allocation23], 0  ;;  %s4076_s18 = smov [#allocation7]   ;;  %s4077_s20 = smov [#allocation10]  }
   0x7   :  { %s47_s19 = sshll.u32 %s4076_s18, 4  ;;  %s66_s21 = sshll.u32 %s4077_s20, 4  ;;  %s48_s19 = int_to_ptr.vmem [resolvable:$true] %s47_s19  ;;  %s67_s21 = int_to_ptr.vmem [resolvable:$true] %s66_s21 }
   0x8   :  { %s3810_s22 = scalar_lea.vmem %s48_s19, 64  ;;  %p3815_p1 = scmp.lt.s32.totalorder %s48_s19, %s48_s19 }
   0x9   :  { %p3811_p0 = scmp.ne.s32.totalorder %s48_s19, %s3810_s22  ;;  %p3816_p2 = scmp.lt.s32.totalorder %s3810_s22, %s3810_s22 }
   0xb   :  { %p3817_p3 = por %p3816_p2, %p3815_p1 }
   0xd   :  { %p3818_p4 = pnand %p3817_p3, %p3811_p0 }
   0xf   :  { %3821 = shalt.err (!%p3818_p4)
}
  0x10   :  { %50 = dma.hbm_to_vmem [thread:$0]  %s5554_s3, 64, %s48_s19, [#allocation8]  }
  0x11   :  { %s3830_s25 = scalar_lea.vmem %s67_s21, 256  ;;  %p3835_p6 = scmp.lt.s32.totalorder %s67_s21, %s67_s21 }
  0x12   :  { %p3831_p5 = scmp.ne.s32.totalorder %s67_s21, %s3830_s25  ;;  %p3836_p7 = scmp.lt.s32.totalorder %s3830_s25, %s3830_s25 }
  0x14   :  { %p3837_p8 = por %p3836_p7, %p3835_p6 }
  0x16   :  { %p3838_p9 = pnand %p3837_p8, %p3831_p5 }
  0x18   :  { %3841 = shalt.err (!%p3838_p9)
}
  0x19   :  { %s4078_s26 = smov 128   ;;  %s4079_s27 = smov 8  }
  0x1a   :  { %72 = dma.hbm_to_vmem [thread:$0]  %s5556_s5, 256, %s67_s21, [#allocation11], %s4078_s26, %s4078_s26, %s4079_s27  }
  0x1b   :  { %s4080_s30 = smov [#allocation13]   ;;  %s4081_s17 = smov [#allocation16]  }
  0x1c   :  { %s89_s16 = sshll.u32 %s4080_s30, 4  ;;  %s108_s3 = sshll.u32 %s4081_s17, 4  ;;  %s90_s16 = int_to_ptr.vmem [resolvable:$true] %s89_s16  ;;  %s109_s3 = int_to_ptr.vmem [resolvable:$true] %s108_s3 }
  0x1d   :  { %s3850_s18 = scalar_lea.vmem %s90_s16, 64  ;;  %p3855_p11 = scmp.lt.s32.totalorder %s90_s16, %s90_s16 }
  0x1e   :  { %p3851_p10 = scmp.ne.s32.totalorder %s90_s16, %s3850_s18  ;;  %p3856_p12 = scmp.lt.s32.totalorder %s3850_s18, %s3850_s18 }
  0x20   :  { %p3857_p13 = por %p3856_p12, %p3855_p11 }
  0x22   :  { %p3858_p0 = pnand %p3857_p13, %p3851_p10 }
  0x24   :  { %3861 = shalt.err (!%p3858_p0)
}
  0x25   :  { %92 = dma.hbm_to_vmem [thread:$0]  %s5558_s7, 64, %s90_s16, [#allocation14]  }
  0x26   :  { %s3870_s22 = scalar_lea.vmem %s109_s3, 512  ;;  %p3875_p2 = scmp.lt.s32.totalorder %s109_s3, %s109_s3 }
  0x27   :  { %p3871_p1 = scmp.ne.s32.totalorder %s109_s3, %s3870_s22  ;;  %p3876_p3 = scmp.lt.s32.totalorder %s3870_s22, %s3870_s22 }
  0x29   :  { %p3877_p4 = por %p3876_p3, %p3875_p2 }
  0x2b   :  { %p3878_p5 = pnand %p3877_p4, %p3871_p1 }
  0x2d   :  { %3881 = shalt.err (!%p3878_p5)
}
  0x2e   :  { %114 = dma.hbm_to_vmem [thread:$0]  %s5560_s9, 512, %s109_s3, [#allocation17], %s4078_s26, %s4078_s26, %s4079_s27  }
  0x2f   :  { %s4082_s23 = smov [#allocation19]   ;;  %s4083_s25 = smov [#allocation22]  }
  0x30   :  { %s131_s24 = sshll.u32 %s4082_s23, 4  ;;  %s150_s28 = sshll.u32 %s4083_s25, 4  ;;  %s132_s24 = int_to_ptr.vmem [resolvable:$true] %s131_s24  ;;  %s151_s28 = int_to_ptr.vmem [resolvable:$true] %s150_s28 }
  0x31   :  { %s3890_s7 = scalar_lea.vmem %s132_s24, 64  ;;  %p3895_p7 = scmp.lt.s32.totalorder %s132_s24, %s132_s24 }
  0x32   :  { %p3891_p6 = scmp.ne.s32.totalorder %s132_s24, %s3890_s7  ;;  %p3896_p8 = scmp.lt.s32.totalorder %s3890_s7, %s3890_s7 }
  0x34   :  { %p3897_p9 = por %p3896_p8, %p3895_p7 }
  0x36   :  { %p3898_p10 = pnand %p3897_p9, %p3891_p6 }
  0x38   :  { %3901 = shalt.err (!%p3898_p10)
}
  0x39   :  { %134 = dma.hbm_to_vmem [thread:$0]  %s5562_s11, 64, %s132_s24, [#allocation20]  }
  0x3a   :  { %s3910_s16 = scalar_lea.vmem %s151_s28, 1024  ;;  %p3915_p12 = scmp.lt.s32.totalorder %s151_s28, %s151_s28 }
  0x3b   :  { %p3911_p11 = scmp.ne.s32.totalorder %s151_s28, %s3910_s16  ;;  %p3916_p13 = scmp.lt.s32.totalorder %s3910_s16, %s3910_s16 }
  0x3d   :  { %p3917_p0 = por %p3916_p13, %p3915_p12 }
  0x3f   :  { %p3918_p1 = pnand %p3917_p0, %p3911_p11 }
  0x41   :  { %3921 = shalt.err (!%p3918_p1)
}
  0x42   :  { %156 = dma.hbm_to_vmem [thread:$0]  %s5564_s13, 1024, %s151_s28, [#allocation23], %s4078_s26, %s4078_s26, %s4079_s27  }
  0x43   :  { %s4084_s3 = smov [#allocation5]   ;;  %s4085_s19 = smov [#allocation9]  }
  0x44   :  { %s37_s18 = sshll.u32 %s4084_s3, 4  ;;  %s57_s20 = sshll.u32 %s4085_s19, 4  ;;  %s38_s18 = int_to_ptr.vmem [resolvable:$true] %s37_s18  ;;  %s58_s20 = int_to_ptr.vmem [resolvable:$true] %s57_s20 }
  0x45   :  { %s3930_s11 = scalar_lea.vmem %s38_s18, 16  ;;  %s3934_s22 = scalar_lea.vmem %s38_s18, 32 }
  0x46   :  { %p3931_p2 = scmp.ne.s32.totalorder %s38_s18, %s3930_s11  ;;  %p3935_p3 = scmp.lt.s32.totalorder %s38_s18, %s38_s18 }
  0x47   :  { %p3936_p4 = scmp.lt.s32.totalorder %s3934_s22, %s3930_s11 }
  0x49   :  { %p3937_p5 = por %p3936_p4, %p3935_p3 }
  0x4b   :  { %p3938_p6 = pnand %p3937_p5, %p3931_p2 }
  0x4d   :  { %3941 = shalt.err (!%p3938_p6)
}
  0x4e   :  { %40 = dma.hbm_to_vmem [thread:$0]  %s5553_s2, 16, %s38_s18, [#allocation6]  }
  0x4f   :  { %s3950_s23 = scalar_lea.vmem %s58_s20, 16  ;;  %s3954_s13 = scalar_lea.vmem %s58_s20, 32 }
  0x50   :  { %p3951_p7 = scmp.ne.s32.totalorder %s58_s20, %s3950_s23  ;;  %p3955_p8 = scmp.lt.s32.totalorder %s58_s20, %s58_s20 }
  0x51   :  { %p3956_p9 = scmp.lt.s32.totalorder %s3954_s13, %s3950_s23 }
  0x53   :  { %p3957_p10 = por %p3956_p9, %p3955_p8 }
  0x55   :  { %p3958_p11 = pnand %p3957_p10, %p3951_p7 }
  0x57   :  { %3961 = shalt.err (!%p3958_p11)
}
  0x58   :  { %60 = dma.hbm_to_vmem [thread:$0]  %s5555_s4, 16, %s58_s20, [#allocation8]  }
  0x59   :  { %s4086_s24 = smov [#allocation12]   ;;  %s4087_s28 = smov [#allocation15]  }
  0x5a   :  { %s79_s25 = sshll.u32 %s4086_s24, 4  ;;  %s99_s7 = sshll.u32 %s4087_s28, 4  ;;  %s80_s25 = int_to_ptr.vmem [resolvable:$true] %s79_s25  ;;  %s100_s7 = int_to_ptr.vmem [resolvable:$true] %s99_s7 }
  0x5b   :  { %s3970_s29 = scalar_lea.vmem %s80_s25, 16  ;;  %s3974_s2 = scalar_lea.vmem %s80_s25, 32 }
  0x5c   :  { %p3971_p12 = scmp.ne.s32.totalorder %s80_s25, %s3970_s29  ;;  %p3975_p13 = scmp.lt.s32.totalorder %s80_s25, %s80_s25 }
  0x5d   :  { %p3976_p0 = scmp.lt.s32.totalorder %s3974_s2, %s3970_s29 }
  0x5f   :  { %p3977_p1 = por %p3976_p0, %p3975_p13 }
  0x61   :  { %p3978_p2 = pnand %p3977_p1, %p3971_p12 }
  0x63   :  { %3981 = shalt.err (!%p3978_p2)
}
  0x64   :  { %82 = dma.hbm_to_vmem [thread:$0]  %s5557_s6, 16, %s80_s25, [#allocation11]  }
  0x65   :  { %s3990_s9 = scalar_lea.vmem %s100_s7, 16  ;;  %s3994_s4 = scalar_lea.vmem %s100_s7, 32 }
  0x66   :  { %p3991_p3 = scmp.ne.s32.totalorder %s100_s7, %s3990_s9  ;;  %p3995_p4 = scmp.lt.s32.totalorder %s100_s7, %s100_s7 }
  0x67   :  { %p3996_p5 = scmp.lt.s32.totalorder %s3994_s4, %s3990_s9 }
  0x69   :  { %p3997_p6 = por %p3996_p5, %p3995_p4 }
  0x6b   :  { %p3998_p7 = pnand %p3997_p6, %p3991_p3 }
  0x6d   :  { %4001 = shalt.err (!%p3998_p7)
}
  0x6e   :  { %102 = dma.hbm_to_vmem [thread:$0]  %s5559_s8, 16, %s100_s7, [#allocation14]  }
  0x6f   :  { %s4088_s18 = smov [#allocation18]   ;;  %s4089_s20 = smov [#allocation21]  }
  0x70   :  { %s121_s19 = sshll.u32 %s4088_s18, 4  ;;  %s141_s11 = sshll.u32 %s4089_s20, 4  ;;  %s122_s19 = int_to_ptr.vmem [resolvable:$true] %s121_s19  ;;  %s142_s11 = int_to_ptr.vmem [resolvable:$true] %s141_s11 }
  0x71   :  { %s4010_s22 = scalar_lea.vmem %s122_s19, 16  ;;  %s4014_s6 = scalar_lea.vmem %s122_s19, 32 }
  0x72   :  { %p4011_p8 = scmp.ne.s32.totalorder %s122_s19, %s4010_s22  ;;  %p4015_p9 = scmp.lt.s32.totalorder %s122_s19, %s122_s19 }
  0x73   :  { %p4016_p10 = scmp.lt.s32.totalorder %s4014_s6, %s4010_s22 }
  0x75   :  { %p4017_p11 = por %p4016_p10, %p4015_p9 }
  0x77   :  { %p4018_p12 = pnand %p4017_p11, %p4011_p8 }
  0x79   :  { %4021 = shalt.err (!%p4018_p12)
}
  0x7a   :  { %124 = dma.hbm_to_vmem [thread:$0]  %s5561_s10, 16, %s122_s19, [#allocation17]  }
  0x7b   :  { %s4030_s23 = scalar_lea.vmem %s142_s11, 16  ;;  %s4034_s8 = scalar_lea.vmem %s142_s11, 32 }
  0x7c   :  { %p4031_p13 = scmp.ne.s32.totalorder %s142_s11, %s4030_s23  ;;  %p4035_p0 = scmp.lt.s32.totalorder %s142_s11, %s142_s11 }
  0x7d   :  { %p4036_p1 = scmp.lt.s32.totalorder %s4034_s8, %s4030_s23 }
  0x7f   :  { %p4037_p2 = por %p4036_p1, %p4035_p0 }
  0x81   :  { %p4038_p3 = pnand %p4037_p2, %p4031_p13 }
  0x83   :  { %4041 = shalt.err (!%p4038_p3)
}
  0x84   :  { %144 = dma.hbm_to_vmem [thread:$0]  %s5563_s12, 16, %s142_s11, [#allocation20]  }
  0x85   :  { %s4090_s27 = smov [#allocation24]  }
  0x86   :  { %s163_s24 = sshll.u32 %s4090_s27, 4  ;;  %s164_s24 = int_to_ptr.vmem [resolvable:$true] %s163_s24 }
  0x87   :  { %s4050_s25 = scalar_lea.vmem %s164_s24, 16  ;;  %s4054_s28 = scalar_lea.vmem %s164_s24, 32 }
  0x88   :  { %p4051_p4 = scmp.ne.s32.totalorder %s164_s24, %s4050_s25  ;;  %p4055_p5 = scmp.lt.s32.totalorder %s164_s24, %s164_s24 }
  0x89   :  { %p4056_p6 = scmp.lt.s32.totalorder %s4054_s28, %s4050_s25 }
  0x8b   :  { %p4057_p7 = por %p4056_p6, %p4055_p5 }
  0x8d   :  { %p4058_p8 = pnand %p4057_p7, %p4051_p4 }
  0x8f   :  { %4061 = shalt.err (!%p4058_p8)
}
  0x90   :  { %166 = dma.hbm_to_vmem [thread:$0]  %s5565_s14, 16, %s164_s24, [#allocation23]  }
  0x91   :  { %4062 = dma.done.wait [#allocation6], 16  }
  0x92   :  { %4063 = vsyncadd [#allocation6], 4294967280 }
  0x93   :  { %4064 = dma.done.wait [#allocation8], 80  }
  0x94   :  { %4065 = vsyncadd [#allocation8], 4294967216 }
  0x95   :  { %4066 = dma.done.wait [#allocation11], 272  }
  0x96   :  { %4067 = vsyncadd [#allocation11], 4294967024 }
  0x97   :  { %4068 = dma.done.wait [#allocation14], 80  }
  0x98   :  { %4069 = vsyncadd [#allocation14], 4294967216 }
  0x99   :  { %4070 = dma.done.wait [#allocation17], 528  }
  0x9a   :  { %4071 = vsyncadd [#allocation17], 4294966768 }
  0x9b   :  { %4072 = dma.done.wait [#allocation20], 80  }
  0x9c   :  { %4073 = vsyncadd [#allocation20], 4294967216 }
  0x9d   :  { %4074 = dma.done.wait [#allocation23], 1040  }
  0x9e   :  { %4075 = vsyncadd [#allocation23], 4294966256  ;;  %v4091_v0 = vmov 0.0   ;;  %v301_v1 = vld [vmem:[%s5552_s1 + $0x78] sm:$0xff]  ;;  %v300_v2 = vld [vmem:[%s5552_s1 + $0x70] sm:$0xff]  ;;  %vm310_vm0 = vcmask 15360  }
  0x9f   :  { %408 = vmatprep.subr.mxu0 %v4091_v0  ;;  %3438 = vmatprep.subr.mxu1 %v4091_v0  ;;  %v299_v3 = vld [vmem:[%s5552_s1 + $0x68] sm:$0xff]  ;;  %v298_v4 = vld [vmem:[%s5552_s1 + $0x60] sm:$0xff]  ;;  %v297_v6 = vld [vmem:[%s5552_s1 + $0x58] sm:$0xff]  ;;  %vm206_vm1 = vcmask 130048   ;;  %vm404_vm2 = vcmask 1041408   ;;  %vm4092_vm3 = vmmov 0  }
  0xa0   :  { %409 = vmatpush1.msra.mxu0 %v301_v1  ;;  %v225_v5 = vld [vmem:[%s5551_s0 + $0x8] sm:$0xff]  ;;  %v296_v7 = vld [vmem:[%s5552_s1 + $0x50] sm:$0xff]  ;;  %v294_v9 = vld [vmem:[%s5552_s1 + $0x40] sm:$0xff]  ;;  %207 = vst.msk [vmem:[#allocation2] sm:$0xff] %vm206_vm1, %v4091_v0  ;;  %3442 = vmatprep.mubr.msk.f32.mxu1 %vm4092_vm3, %v4091_v0  ;;  %vm208_vm4 = vcmask 128000   ;;  %vm212_vm5 = vcmask 261120  }
  0xa1   :  { %410 = vmatprep.subr.mxu0 %v4091_v0  ;;  %3005 = vmatprep.mubr.msk.f32.mxu0 %vm310_vm0, %v225_v5  ;;  %v295_v8 = vld [vmem:[%s5552_s1 + $0x48] sm:$0xff]  ;;  %v293_v10 = vld [vmem:[%s5552_s1 + $0x38] sm:$0xff]  ;;  %v292_v11 = vld [vmem:[%s5552_s1 + $0x30] sm:$0xff]  ;;  %210 = vst.msk [vmem:[#allocation2 + $0x88] sm:$0xff] %vm206_vm1, %v4091_v0  ;;  %vm674_vm6 = vcmask 123904   ;;  %vm676_vm7 = vcmask 130050  }
  0xa2   :  { %411 = vmatpush1.msra.mxu0 %v300_v2  ;;  %v291_v12 = vld [vmem:[%s5552_s1 + $0x28] sm:$0xff]  ;;  %v290_v13 = vld [vmem:[%s5552_s1 + $0x20] sm:$0xff]  ;;  %v289_v14 = vld [vmem:[%s5552_s1 + $0x18] sm:$0xff]  ;;  %209 = vst.msk [vmem:[#allocation2 + $0x82] sm:$0x3f] %vm208_vm4, %v4091_v0  ;;  %vm692_vm8 = vcmask 125952  }
  0xa3   :  { %412 = vmatprep.subr.mxu0 %v4091_v0  ;;  %v288_v15 = vld [vmem:[%s5552_s1 + $0x10] sm:$0xff]  ;;  %v287_v16 = vld [vmem:[%s5552_s1 + $0x8] sm:$0xff]  ;;  %v286_v17 = vld [vmem:[%s5552_s1] sm:$0xff]  ;;  %211 = vst.msk [vmem:[#allocation2 + $0x10a] sm:$0x3f] %vm208_vm4, %v4091_v0  ;;  %vm214_vm9 = vcmask 257024  }
  0xa4   :  { %413 = vmatpush1.msra.mxu0 %v299_v3  ;;  %v302_v18 = vld [vmem:[%s5552_s1 + $0x80] sm:$0x3]  ;;  %v227_v20 = vld [vmem:[%s5551_s0 + $0x18] sm:$0xff]  ;;  %v226_v21 = vld [vmem:[%s5551_s0 + $0x10] sm:$0xff]  ;;  %213 = vst.msk [vmem:[#allocation3] sm:$0xff] %vm212_vm5, %v4091_v0  ;;  %vm218_vm10 = vcmask 523264  }
  0xa5   :  { %414 = vmatprep.subr.mxu0 %v4091_v0  ;;  %v224_v19 = vld [vmem:[%s5551_s0] sm:$0xff]  ;;  %v229_v22 = vld [vmem:[%s5551_s0 + $0x28] sm:$0xff]  ;;  %v231_v24 = vld [vmem:[%s5551_s0 + $0x38] sm:$0xff]  ;;  %216 = vst.msk [vmem:[#allocation3 + $0x88] sm:$0xff] %vm212_vm5, %v4091_v0  ;;  %vm220_vm11 = vcmask 517120   ;;  %vm2119_vm12 = vcmask 521216  }
  0xa6   :  { %415 = vmatpush1.msra.mxu0 %v298_v4  ;;  %v228_v23 = vld [vmem:[%s5551_s0 + $0x20] sm:$0xff]  ;;  %v230_v25 = vld [vmem:[%s5551_s0 + $0x30] sm:$0xff]  ;;  %v233_v26 = vld [vmem:[%s5551_s0 + $0x48] sm:$0xff]  ;;  %215 = vst.msk [vmem:[#allocation3 + $0x84] sm:$0xf] %vm214_vm9, %v4091_v0 }
  0xa7   :  { %416 = vmatprep.subr.mxu0 %v4091_v0  ;;  %v232_v27 = vld [vmem:[%s5551_s0 + $0x40] sm:$0xff]  ;;  %v235_v28 = vld [vmem:[%s5551_s0 + $0x58] sm:$0xff]  ;;  %v234_v29 = vld [vmem:[%s5551_s0 + $0x50] sm:$0xff]  ;;  %217 = vst.msk [vmem:[#allocation3 + $0x10c] sm:$0xf] %vm214_vm9, %v4091_v0 }
  0xa8   :  { %417 = vmatpush1.msra.mxu0 %v297_v6  ;;  %v237_v30 = vld [vmem:[%s5551_s0 + $0x68] sm:$0xff]  ;;  %v236_v31 = vld [vmem:[%s5551_s0 + $0x60] sm:$0xff]  ;;  %v239_v32 = vld [vmem:[%s5551_s0 + $0x78] sm:$0xff]  ;;  %219 = vst.msk [vmem:[#allocation4] sm:$0xff] %vm218_vm10, %v4091_v0 }
  0xa9   :  { %418 = vmatprep.subr.mxu0 %v4091_v0  ;;  %v238_v33 = vld [vmem:[%s5551_s0 + $0x70] sm:$0xff]  ;;  %v241_v34 = vld [vmem:[%s5551_s0 + $0x88] sm:$0xff]  ;;  %v240_v35 = vld [vmem:[%s5551_s0 + $0x80] sm:$0xff]  ;;  %222 = vst.msk [vmem:[#allocation4 + $0x88] sm:$0xff] %vm218_vm10, %v4091_v0 }
  0xaa   :  { %419 = vmatpush1.msra.mxu0 %v296_v7  ;;  %v243_v36 = vld [vmem:[%s5551_s0 + $0x98] sm:$0xff]  ;;  %v242_v37 = vld [vmem:[%s5551_s0 + $0x90] sm:$0xff]  ;;  %v245_v38 = vld [vmem:[%s5551_s0 + $0xa8] sm:$0xff]  ;;  %221 = vst.msk [vmem:[#allocation4 + $0x86] sm:$0x3] %vm220_vm11, %v4091_v0 }
  0xab   :  { %420 = vmatprep.subr.mxu0 %v4091_v0  ;;  %v244_v39 = vld [vmem:[%s5551_s0 + $0xa0] sm:$0xff]  ;;  %v247_v40 = vld [vmem:[%s5551_s0 + $0xb8] sm:$0xff]  ;;  %v246_v41 = vld [vmem:[%s5551_s0 + $0xb0] sm:$0xff]  ;;  %223 = vst.msk [vmem:[#allocation4 + $0x10e] sm:$0x3] %vm220_vm11, %v4091_v0 }
  0xac   :  { %421 = vmatpush1.msra.mxu0 %v295_v8  ;;  %v249_v42 = vld [vmem:[%s5551_s0 + $0xc8] sm:$0xff]  ;;  %v248_v43 = vld [vmem:[%s5551_s0 + $0xc0] sm:$0xff]  ;;  %v251_v44 = vld [vmem:[%s5551_s0 + $0xd8] sm:$0xff] }
  0xad   :  { %422 = vmatprep.subr.mxu0 %v4091_v0  ;;  %v250_v45 = vld [vmem:[%s5551_s0 + $0xd0] sm:$0xff]  ;;  %v253_v46 = vld [vmem:[%s5551_s0 + $0xe8] sm:$0xff]  ;;  %v252_v47 = vld [vmem:[%s5551_s0 + $0xe0] sm:$0xff] }
  0xae   :  { %423 = vmatpush1.msra.mxu0 %v294_v9  ;;  %v255_v48 = vld [vmem:[%s5551_s0 + $0xf8] sm:$0xff]  ;;  %v254_v49 = vld [vmem:[%s5551_s0 + $0xf0] sm:$0xff]  ;;  %v257_v50 = vld [vmem:[%s5551_s0 + $0x108] sm:$0xff] }
  0xaf   :  { %424 = vmatprep.subr.mxu0 %v4091_v0  ;;  %v256_v51 = vld [vmem:[%s5551_s0 + $0x100] sm:$0xff]  ;;  %v259_v52 = vld [vmem:[%s5551_s0 + $0x118] sm:$0xff]  ;;  %v258_v53 = vld [vmem:[%s5551_s0 + $0x110] sm:$0xff] }
  0xb0   :  { %425 = vmatpush1.msra.mxu0 %v293_v10  ;;  %v261_v54 = vld [vmem:[%s5551_s0 + $0x128] sm:$0xff]  ;;  %v260_v55 = vld [vmem:[%s5551_s0 + $0x120] sm:$0xff]  ;;  %v263_v56 = vld [vmem:[%s5551_s0 + $0x138] sm:$0xff] }
  0xb1   :  { %426 = vmatprep.subr.mxu0 %v4091_v0  ;;  %v262_v57 = vld [vmem:[%s5551_s0 + $0x130] sm:$0xff]  ;;  %v265_v58 = vld [vmem:[%s5551_s0 + $0x148] sm:$0xff]  ;;  %v264_v59 = vld [vmem:[%s5551_s0 + $0x140] sm:$0xff] }
  0xb2   :  { %427 = vmatpush1.msra.mxu0 %v292_v11  ;;  %v267_v60 = vld [vmem:[%s5551_s0 + $0x158] sm:$0xff]  ;;  %v266_v61 = vld [vmem:[%s5551_s0 + $0x150] sm:$0xff]  ;;  %v1014_v62 = vld [vmem:[#allocation10 + $0x8] sm:$0xff] }
  0xb3   :  { %428 = vmatprep.subr.mxu0 %v4091_v0  ;;  %v269_v63 = vld [vmem:[%s5551_s0 + $0x168] sm:$0xff]  ;;  %3439 = vmatpush3.msra.mxu1 %v1014_v62  ;;  %v1013_v1 = vld [vmem:[#allocation10] sm:$0xff]  ;;  %v268_v2 = vld [vmem:[%s5551_s0 + $0x160] sm:$0xff] }
  0xb4   :  { %429 = vmatpush1.msra.mxu0 %v291_v12  ;;  %3440 = vmatprep.subr.mxu1 %v4091_v0  ;;  %v271_v3 = vld [vmem:[%s5551_s0 + $0x178] sm:$0xff]  ;;  %v270_v4 = vld [vmem:[%s5551_s0 + $0x170] sm:$0xff]  ;;  %v273_v5 = vld [vmem:[%s5551_s0 + $0x188] sm:$0xff] }
  0xb5   :  { %430 = vmatprep.subr.mxu0 %v4091_v0  ;;  %3441 = vmatpush3.msra.mxu1 %v1013_v1  ;;  %v272_v6 = vld [vmem:[%s5551_s0 + $0x180] sm:$0xff]  ;;  %v275_v7 = vld [vmem:[%s5551_s0 + $0x198] sm:$0xff]  ;;  %v274_v8 = vld [vmem:[%s5551_s0 + $0x190] sm:$0xff] }
  0xb6   :  { %431 = vmatpush1.msra.mxu0 %v290_v13  ;;  %3541 = vmatprep.subr.mxu1 %v4091_v0  ;;  %v277_v9 = vld [vmem:[%s5551_s0 + $0x1a8] sm:$0xff]  ;;  %v276_v10 = vld [vmem:[%s5551_s0 + $0x1a0] sm:$0xff]  ;;  %v279_v11 = vld [vmem:[%s5551_s0 + $0x1b8] sm:$0xff] }
  0xb7   :  { %432 = vmatprep.subr.mxu0 %v4091_v0  ;;  %v278_v12 = vld [vmem:[%s5551_s0 + $0x1b0] sm:$0xff]  ;;  %v281_v13 = vld [vmem:[%s5551_s0 + $0x1c8] sm:$0xff] }
  0xb8   :  { %433 = vmatpush1.msra.mxu0 %v289_v14  ;;  %v280_v14 = vld [vmem:[%s5551_s0 + $0x1c0] sm:$0xff] }
  0xb9   :  { %434 = vmatprep.subr.mxu0 %v4091_v0 }
  0xba   :  { %435 = vmatpush1.msra.mxu0 %v288_v15  ;;  %v283_v15 = vld [vmem:[%s5551_s0 + $0x1d8] sm:$0xff] }
  0xbb   :  { %436 = vmatprep.subr.mxu0 %v4091_v0 }
  0xbc   :  { %437 = vmatpush1.msra.mxu0 %v287_v16  ;;  %v282_v16 = vld [vmem:[%s5551_s0 + $0x1d0] sm:$0xff] }
  0xbd   :  { %438 = vmatprep.subr.mxu0 %v4091_v0 }
  0xbe   :  { %439 = vmatpush1.msra.mxu0 %v286_v17  ;;  %v285_v17 = vld [vmem:[%s5551_s0 + $0x1e8] sm:$0xf] }
  0xbf   :  { %470 = vmatprep.subr.mxu0 %v4091_v0 }
  0xc0   :  { %3004 = vmatpush2.msk.msra.mxu0 %vm404_vm2, %v302_v18  ;;  %v284_v18 = vld [vmem:[%s5551_s0 + $0x1e0] sm:$0xf] }
  0xc1   :  { %473 = vmatmul.mubr.f32.vlgmr.msra.gmra.mxu0 %v224_v19  ;;  %3648 = vmatprep.subr.mxu0 %v4091_v0  ;;  %v4520_v19 = vld [vmem:[#allocation5] ss:$0 sm:$0xff] }
  0xc2   :  { %3006 = vmatprep.mubr.msk.f32.mxu0 %vm310_vm0, %v227_v20 }
  0xc5   :  { %478 = vmatmul.mubr.f32.gmra.mxu0 %v226_v21 }
  0xc6   :  { %3007 = vmatprep.mubr.msk.f32.mxu0 %vm310_vm0, %v229_v22 }
  0xc9   :  { %483 = vmatmul.mubr.f32.gmra.mxu0 %v228_v23 }
  0xca   :  { %3008 = vmatprep.mubr.msk.f32.mxu0 %vm310_vm0, %v231_v24 }
  0xcd   :  { %488 = vmatmul.mubr.f32.gmra.mxu0 %v230_v25 }
  0xce   :  { %3009 = vmatprep.mubr.msk.f32.mxu0 %vm310_vm0, %v233_v26 }
  0xd1   :  { %493 = vmatmul.mubr.f32.gmra.mxu0 %v232_v27 }
  0xd2   :  { %3010 = vmatprep.mubr.msk.f32.mxu0 %vm310_vm0, %v235_v28 }
  0xd5   :  { %498 = vmatmul.mubr.f32.gmra.mxu0 %v234_v29 }
  0xd6   :  { %3011 = vmatprep.mubr.msk.f32.mxu0 %vm310_vm0, %v237_v30 }
  0xd9   :  { %503 = vmatmul.mubr.f32.gmra.mxu0 %v236_v31  ;;  %v4527_v31 = vld [vmem:[#allocation7] ss:$0 sm:$0xff] }
  0xda   :  { %3012 = vmatprep.mubr.msk.f32.mxu0 %vm310_vm0, %v239_v32  ;;  %v4529_v32 = vld [vmem:[#allocation7 + $0x1] ss:$0 sm:$0xff] }
  0xdd   :  { %508 = vmatmul.mubr.f32.gmra.mxu0 %v238_v33 }
  0xde   :  { %3013 = vmatprep.mubr.msk.f32.mxu0 %vm310_vm0, %v241_v34  ;;  %v4531_v34 = vld [vmem:[#allocation7 + $0x2] ss:$0 sm:$0xff] }
  0xe1   :  { %513 = vmatmul.mubr.f32.gmra.mxu0 %v240_v35 }
  0xe2   :  { %3014 = vmatprep.mubr.msk.f32.mxu0 %vm310_vm0, %v243_v36 }
  0xe5   :  { %518 = vmatmul.mubr.f32.gmra.mxu0 %v242_v37 }
  0xe6   :  { %3015 = vmatprep.mubr.msk.f32.mxu0 %vm310_vm0, %v245_v38 }
  0xe9   :  { %523 = vmatmul.mubr.f32.gmra.mxu0 %v244_v39 }
  0xea   :  { %3016 = vmatprep.mubr.msk.f32.mxu0 %vm310_vm0, %v247_v40 }
  0xed   :  { %528 = vmatmul.mubr.f32.gmra.mxu0 %v246_v41 }
  0xee   :  { %3017 = vmatprep.mubr.msk.f32.mxu0 %vm310_vm0, %v249_v42 }
  0xf1   :  { %533 = vmatmul.mubr.f32.gmra.mxu0 %v248_v43 }
  0xf2   :  { %3018 = vmatprep.mubr.msk.f32.mxu0 %vm310_vm0, %v251_v44 }
  0xf5   :  { %538 = vmatmul.mubr.f32.gmra.mxu0 %v250_v45 }
  0xf6   :  { %3019 = vmatprep.mubr.msk.f32.mxu0 %vm310_vm0, %v253_v46  ;;  %v4538_v46 = vld [vmem:[#allocation9] ss:$0 sm:$0xff] }
  0xf9   :  { %543 = vmatmul.mubr.f32.gmra.mxu0 %v252_v47 }
  0xfa   :  { %3020 = vmatprep.mubr.msk.f32.mxu0 %vm310_vm0, %v255_v48 }
  0xfd   :  { %548 = vmatmul.mubr.f32.gmra.mxu0 %v254_v49 }
  0xfe   :  { %3021 = vmatprep.mubr.msk.f32.mxu0 %vm310_vm0, %v257_v50 }
 0x101   :  { %553 = vmatmul.mubr.f32.gmra.mxu0 %v256_v51 }
 0x102   :  { %3022 = vmatprep.mubr.msk.f32.mxu0 %vm310_vm0, %v259_v52 }
 0x105   :  { %558 = vmatmul.mubr.f32.gmra.mxu0 %v258_v53 }
 0x106   :  { %3023 = vmatprep.mubr.msk.f32.mxu0 %vm310_vm0, %v261_v54 }
 0x109   :  { %563 = vmatmul.mubr.f32.gmra.mxu0 %v260_v55 }
 0x10a   :  { %3024 = vmatprep.mubr.msk.f32.mxu0 %vm310_vm0, %v263_v56 }
 0x10d   :  { %568 = vmatmul.mubr.f32.gmra.mxu0 %v262_v57 }
 0x10e   :  { %3025 = vmatprep.mubr.msk.f32.mxu0 %vm310_vm0, %v265_v58 }
 0x111   :  { %573 = vmatmul.mubr.f32.gmra.mxu0 %v264_v59 }
 0x112   :  { %3026 = vmatprep.mubr.msk.f32.mxu0 %vm310_vm0, %v267_v60  ;;  %v1736_v60 = vld [vmem:[#allocation16 + $0x18] sm:$0xff] }
 0x115   :  { %578 = vmatmul.mubr.f32.gmra.mxu0 %v266_v61 }
 0x116   :  { %3027 = vmatprep.mubr.msk.f32.mxu0 %vm310_vm0, %v269_v63 }
 0x119   :  { %583 = vmatmul.mubr.f32.gmra.mxu0 %v268_v2 }
 0x11a   :  { %3028 = vmatprep.mubr.msk.f32.mxu0 %vm310_vm0, %v271_v3 }
 0x11d   :  { %588 = vmatmul.mubr.f32.gmra.mxu0 %v270_v4 }
 0x11e   :  { %3029 = vmatprep.mubr.msk.f32.mxu0 %vm310_vm0, %v273_v5 }
 0x121   :  { %593 = vmatmul.mubr.f32.gmra.mxu0 %v272_v6  ;;  %v1735_v6 = vld [vmem:[#allocation16 + $0x10] sm:$0xff] }
 0x122   :  { %3030 = vmatprep.mubr.msk.f32.mxu0 %vm310_vm0, %v275_v7 }
 0x125   :  { %598 = vmatmul.mubr.f32.gmra.mxu0 %v274_v8 }
 0x126   :  { %3031 = vmatprep.mubr.msk.f32.mxu0 %vm310_vm0, %v277_v9 }
 0x129   :  { %603 = vmatmul.mubr.f32.gmra.mxu0 %v276_v10 }
 0x12a   :  { %3032 = vmatprep.mubr.msk.f32.mxu0 %vm310_vm0, %v279_v11 }
 0x12d   :  { %608 = vmatmul.mubr.f32.gmra.mxu0 %v278_v12  ;;  %v1734_v12 = vld [vmem:[#allocation16 + $0x8] sm:$0xff] }
 0x12e   :  { %3033 = vmatprep.mubr.msk.f32.mxu0 %vm310_vm0, %v281_v13 }
 0x131   :  { %613 = vmatmul.mubr.f32.gmra.mxu0 %v280_v14 }
 0x132   :  { %3034 = vmatprep.mubr.msk.f32.mxu0 %vm310_vm0, %v283_v15 }
 0x135   :  { %618 = vmatmul.mubr.f32.gmra.mxu0 %v282_v16 }
 0x136   :  { %3035 = vmatprep.mubr.msk.f32.mxu0 %vm310_vm0, %v285_v17 }
 0x139   :  { %623 = vmatmul.mubr.f32.gmra.mxu0 %v284_v18 }
 0x13a   :  { %3664 = vmatprep.mubr.msk.f32.mxu0 %vm4092_vm3, %v4091_v0 }
 0x181   :  { %v474_v20 = vpop.f32.mrf.mxu0 }
 0x182   :  { %v475_v21 = vadd.f32 %v4520_v19, %v474_v20 }
 0x183   :  { %v476_v22 = vpop.f32.mrf.mxu0 }
 0x184   :  { %v628_v23 = vmax.f32 %v475_v21, 0.0 }
 0x185   :  { %v479_v24 = vpop.f32.mrf.mxu0 }
 0x186   :  { %659 = vst.msk [vmem:[#allocation2 + $0x8] sm:$0xff] %vm206_vm1, %v628_v23  ;;  %v480_v25 = vadd.f32 %v4520_v19, %v479_v24 }
 0x187   :  { %v481_v26 = vpop.f32.mrf.mxu0 }
 0x188   :  { %v629_v27 = vmax.f32 %v480_v25, 0.0 }
 0x189   :  { %v484_v28 = vpop.f32.mrf.mxu0 }
 0x18a   :  { %660 = vst.msk [vmem:[#allocation2 + $0x10] sm:$0xff] %vm206_vm1, %v629_v27  ;;  %v485_v29 = vadd.f32 %v4520_v19, %v484_v28  ;;  %v1733_v27 = vld [vmem:[#allocation16] sm:$0xff] }
 0x18b   :  { %v486_v30 = vpop.f32.mrf.mxu0 }
 0x18c   :  { %v630_v33 = vmax.f32 %v485_v29, 0.0 }
 0x18d   :  { %v489_v35 = vpop.f32.mrf.mxu0  ;;  %v694_v36 = vld [vmem:[#allocation2 + $0x6] sm:$0xff] }
 0x18e   :  { %v727_v37 = vld [vmem:[#allocation2 + $0x7] sm:$0xff]  ;;  %661 = vst.msk [vmem:[#allocation2 + $0x18] sm:$0xff] %vm206_vm1, %v630_v33  ;;  %v490_v39 = vadd.f32 %v4520_v19, %v489_v35  ;;  %v798_v40 = vmul.f32 %v4527_v31, %v694_v36 }
 0x18f   :  { %v760_v38 = vld [vmem:[#allocation2 + $0x8] sm:$0xff]  ;;  %v836_v41 = vmul.f32 %v4529_v32, %v727_v37  ;;  %v491_v42 = vpop.f32.mrf.mxu0 }
 0x190   :  { %v631_v43 = vmax.f32 %v490_v39, 0.0  ;;  %v907_v45 = vmul.f32 %v4531_v34, %v760_v38 }
 0x191   :  { %v869_v44 = vadd.f32 %v836_v41, %v798_v40  ;;  %v494_v47 = vpop.f32.mrf.mxu0  ;;  %v695_v48 = vld [vmem:[#allocation2 + $0xe] sm:$0xff] }
 0x192   :  { %v728_v49 = vld [vmem:[#allocation2 + $0xf] sm:$0xff]  ;;  %662 = vst.msk [vmem:[#allocation2 + $0x20] sm:$0xff] %vm206_vm1, %v631_v43  ;;  %v495_v51 = vadd.f32 %v4520_v19, %v494_v47  ;;  %v799_v53 = vmul.f32 %v4527_v31, %v695_v48 }
 0x193   :  { %v761_v50 = vld [vmem:[#allocation2 + $0x10] sm:$0xff]  ;;  %v940_v52 = vadd.f32 %v907_v45, %v869_v44  ;;  %v837_v54 = vmul.f32 %v4529_v32, %v728_v49  ;;  %v496_v55 = vpop.f32.mrf.mxu0 }
 0x194   :  { %v632_v56 = vmax.f32 %v495_v51, 0.0  ;;  %v908_v59 = vmul.f32 %v4531_v34, %v761_v50 }
 0x195   :  { %v980_v57 = vadd.f32 %v4538_v46, %v940_v52  ;;  %v870_v58 = vadd.f32 %v837_v54, %v799_v53  ;;  %v499_v61 = vpop.f32.mrf.mxu0  ;;  %v696_v62 = vld [vmem:[#allocation2 + $0x16] sm:$0xff] }
 0x196   :  { %v729_v63 = vld [vmem:[#allocation2 + $0x17] sm:$0xff]  ;;  %663 = vst.msk [vmem:[#allocation2 + $0x28] sm:$0xff] %vm206_vm1, %v632_v56  ;;  %v500_v2 = vadd.f32 %v4520_v19, %v499_v61  ;;  %v800_v4 = vmul.f32 %v4527_v31, %v696_v62 }
 0x197   :  { %v762_v1 = vld [vmem:[#allocation2 + $0x18] sm:$0xff]  ;;  %3443 = vmatmul.mubr.msk.f32.vlgmr.msra.gmra.mxu1 %vm206_vm1, %v980_v57  ;;  %v941_v3 = vadd.f32 %v908_v59, %v870_v58  ;;  %v838_v5 = vmul.f32 %v4529_v32, %v729_v63  ;;  %v501_v7 = vpop.f32.mrf.mxu0 }
 0x198   :  { %3445 = vmatprep.mubr.msk.f32.mxu1 %vm4092_vm3, %v4091_v0  ;;  %3542 = vmatpush3.msra.mxu1 %v1736_v60  ;;  %v633_v8 = vmax.f32 %v500_v2, 0.0  ;;  %v909_v11 = vmul.f32 %v4531_v34, %v762_v1 }
 0x199   :  { %v981_v9 = vadd.f32 %v4538_v46, %v941_v3  ;;  %v871_v10 = vadd.f32 %v838_v5, %v800_v4  ;;  %3543 = vmatprep.subr.mxu1 %v4091_v0  ;;  %v504_v13 = vpop.f32.mrf.mxu0  ;;  %v697_v14 = vld [vmem:[#allocation2 + $0x1e] sm:$0xff] }
 0x19a   :  { %v730_v15 = vld [vmem:[#allocation2 + $0x1f] sm:$0xff]  ;;  %3544 = vmatpush3.msra.mxu1 %v1735_v6  ;;  %664 = vst.msk [vmem:[#allocation2 + $0x30] sm:$0xff] %vm206_vm1, %v633_v8  ;;  %v505_v17 = vadd.f32 %v4520_v19, %v504_v13  ;;  %v801_v20 = vmul.f32 %v4527_v31, %v697_v14 }
 0x19b   :  { %v763_v16 = vld [vmem:[#allocation2 + $0x20] sm:$0xff]  ;;  %3446 = vmatmul.mubr.msk.f32.gmra.mxu1 %vm206_vm1, %v981_v9  ;;  %v942_v18 = vadd.f32 %v909_v11, %v871_v10  ;;  %v839_v21 = vmul.f32 %v4529_v32, %v730_v15  ;;  %v506_v22 = vpop.f32.mrf.mxu0  ;;  %3545 = vmatprep.subr.mxu1 %v4091_v0 }
 0x19c   :  { %3448 = vmatprep.mubr.msk.f32.mxu1 %vm4092_vm3, %v4091_v0  ;;  %v634_v23 = vmax.f32 %v505_v17, 0.0  ;;  %v910_v26 = vmul.f32 %v4531_v34, %v763_v16  ;;  %3546 = vmatpush3.msra.mxu1 %v1734_v12 }
 0x19d   :  { %v982_v24 = vadd.f32 %v4538_v46, %v942_v18  ;;  %v872_v25 = vadd.f32 %v839_v21, %v801_v20  ;;  %v509_v28 = vpop.f32.mrf.mxu0  ;;  %v698_v29 = vld [vmem:[#allocation2 + $0x26] sm:$0xff]  ;;  %3547 = vmatprep.subr.mxu1 %v4091_v0 }
 0x19e   :  { %v731_v30 = vld [vmem:[#allocation2 + $0x27] sm:$0xff]  ;;  %665 = vst.msk [vmem:[#allocation2 + $0x38] sm:$0xff] %vm206_vm1, %v634_v23  ;;  %v510_v35 = vadd.f32 %v4520_v19, %v509_v28  ;;  %v802_v37 = vmul.f32 %v4527_v31, %v698_v29  ;;  %3548 = vmatpush3.msra.mxu1 %v1733_v27 }
 0x19f   :  { %v764_v33 = vld [vmem:[#allocation2 + $0x28] sm:$0xff]  ;;  %3449 = vmatmul.mubr.msk.f32.gmra.mxu1 %vm206_vm1, %v982_v24  ;;  %v943_v36 = vadd.f32 %v910_v26, %v872_v25  ;;  %v840_v38 = vmul.f32 %v4529_v32, %v731_v30  ;;  %v511_v39 = vpop.f32.mrf.mxu0  ;;  %3763 = vmatprep.subr.mxu1 %v4091_v0 }
 0x1a0   :  { %3451 = vmatprep.mubr.msk.f32.mxu1 %vm4092_vm3, %v4091_v0  ;;  %v635_v40 = vmax.f32 %v510_v35, 0.0  ;;  %v911_v43 = vmul.f32 %v4531_v34, %v764_v33 }
 0x1a1   :  { %v983_v41 = vadd.f32 %v4538_v46, %v943_v36  ;;  %v873_v42 = vadd.f32 %v840_v38, %v802_v37  ;;  %v514_v44 = vpop.f32.mrf.mxu0  ;;  %v699_v45 = vld [vmem:[#allocation2 + $0x2e] sm:$0xff] }
 0x1a2   :  { %v732_v47 = vld [vmem:[#allocation2 + $0x2f] sm:$0xff]  ;;  %666 = vst.msk [vmem:[#allocation2 + $0x40] sm:$0xff] %vm206_vm1, %v635_v40  ;;  %v515_v49 = vadd.f32 %v4520_v19, %v514_v44  ;;  %v803_v51 = vmul.f32 %v4527_v31, %v699_v45 }
 0x1a3   :  { %v765_v48 = vld [vmem:[#allocation2 + $0x30] sm:$0xff]  ;;  %3452 = vmatmul.mubr.msk.f32.gmra.mxu1 %vm206_vm1, %v983_v41  ;;  %v944_v50 = vadd.f32 %v911_v43, %v873_v42  ;;  %v841_v52 = vmul.f32 %v4529_v32, %v732_v47  ;;  %v516_v53 = vpop.f32.mrf.mxu0 }
 0x1a4   :  { %3454 = vmatprep.mubr.msk.f32.mxu1 %vm4092_vm3, %v4091_v0  ;;  %v636_v54 = vmax.f32 %v515_v49, 0.0  ;;  %v912_v57 = vmul.f32 %v4531_v34, %v765_v48 }
 0x1a5   :  { %v984_v55 = vadd.f32 %v4538_v46, %v944_v50  ;;  %v874_v56 = vadd.f32 %v841_v52, %v803_v51  ;;  %v519_v58 = vpop.f32.mrf.mxu0  ;;  %v700_v59 = vld [vmem:[#allocation2 + $0x36] sm:$0xff] }
 0x1a6   :  { %v733_v60 = vld [vmem:[#allocation2 + $0x37] sm:$0xff]  ;;  %667 = vst.msk [vmem:[#allocation2 + $0x48] sm:$0xff] %vm206_vm1, %v636_v54  ;;  %v520_v62 = vadd.f32 %v4520_v19, %v519_v58  ;;  %v804_v1 = vmul.f32 %v4527_v31, %v700_v59 }
 0x1a7   :  { %v766_v61 = vld [vmem:[#allocation2 + $0x38] sm:$0xff]  ;;  %3455 = vmatmul.mubr.msk.f32.gmra.mxu1 %vm206_vm1, %v984_v55  ;;  %v945_v63 = vadd.f32 %v912_v57, %v874_v56  ;;  %v842_v2 = vmul.f32 %v4529_v32, %v733_v60  ;;  %v521_v3 = vpop.f32.mrf.mxu0 }
 0x1a8   :  { %3457 = vmatprep.mubr.msk.f32.mxu1 %vm4092_vm3, %v4091_v0  ;;  %v637_v4 = vmax.f32 %v520_v62, 0.0  ;;  %v913_v7 = vmul.f32 %v4531_v34, %v766_v61 }
 0x1a9   :  { %v985_v5 = vadd.f32 %v4538_v46, %v945_v63  ;;  %v875_v6 = vadd.f32 %v842_v2, %v804_v1  ;;  %v524_v8 = vpop.f32.mrf.mxu0  ;;  %v701_v9 = vld [vmem:[#allocation2 + $0x3e] sm:$0xff] }
 0x1aa   :  { %v734_v10 = vld [vmem:[#allocation2 + $0x3f] sm:$0xff]  ;;  %668 = vst.msk [vmem:[#allocation2 + $0x50] sm:$0xff] %vm206_vm1, %v637_v4  ;;  %v525_v12 = vadd.f32 %v4520_v19, %v524_v8  ;;  %v805_v14 = vmul.f32 %v4527_v31, %v701_v9 }
 0x1ab   :  { %v767_v11 = vld [vmem:[#allocation2 + $0x40] sm:$0xff]  ;;  %3458 = vmatmul.mubr.msk.f32.gmra.mxu1 %vm206_vm1, %v985_v5  ;;  %v946_v13 = vadd.f32 %v913_v7, %v875_v6  ;;  %v843_v15 = vmul.f32 %v4529_v32, %v734_v10  ;;  %v526_v16 = vpop.f32.mrf.mxu0 }
 0x1ac   :  { %3460 = vmatprep.mubr.msk.f32.mxu1 %vm4092_vm3, %v4091_v0  ;;  %v638_v17 = vmax.f32 %v525_v12, 0.0  ;;  %v914_v21 = vmul.f32 %v4531_v34, %v767_v11 }
 0x1ad   :  { %v986_v18 = vadd.f32 %v4538_v46, %v946_v13  ;;  %v876_v20 = vadd.f32 %v843_v15, %v805_v14  ;;  %v529_v22 = vpop.f32.mrf.mxu0  ;;  %v702_v23 = vld [vmem:[#allocation2 + $0x46] sm:$0xff] }
 0x1ae   :  { %v735_v24 = vld [vmem:[#allocation2 + $0x47] sm:$0xff]  ;;  %669 = vst.msk [vmem:[#allocation2 + $0x58] sm:$0xff] %vm206_vm1, %v638_v17  ;;  %v530_v26 = vadd.f32 %v4520_v19, %v529_v22  ;;  %v806_v28 = vmul.f32 %v4527_v31, %v702_v23 }
 0x1af   :  { %v768_v25 = vld [vmem:[#allocation2 + $0x48] sm:$0xff]  ;;  %3461 = vmatmul.mubr.msk.f32.gmra.mxu1 %vm206_vm1, %v986_v18  ;;  %v947_v27 = vadd.f32 %v914_v21, %v876_v20  ;;  %v844_v29 = vmul.f32 %v4529_v32, %v735_v24  ;;  %v531_v30 = vpop.f32.mrf.mxu0 }
 0x1b0   :  { %3463 = vmatprep.mubr.msk.f32.mxu1 %vm4092_vm3, %v4091_v0  ;;  %v639_v33 = vmax.f32 %v530_v26, 0.0  ;;  %v915_v37 = vmul.f32 %v4531_v34, %v768_v25 }
 0x1b1   :  { %v987_v35 = vadd.f32 %v4538_v46, %v947_v27  ;;  %v877_v36 = vadd.f32 %v844_v29, %v806_v28  ;;  %v534_v38 = vpop.f32.mrf.mxu0  ;;  %v703_v39 = vld [vmem:[#allocation2 + $0x4e] sm:$0xff] }
 0x1b2   :  { %v736_v40 = vld [vmem:[#allocation2 + $0x4f] sm:$0xff]  ;;  %670 = vst.msk [vmem:[#allocation2 + $0x60] sm:$0xff] %vm206_vm1, %v639_v33  ;;  %v535_v42 = vadd.f32 %v4520_v19, %v534_v38  ;;  %v807_v44 = vmul.f32 %v4527_v31, %v703_v39 }
 0x1b3   :  { %v769_v41 = vld [vmem:[#allocation2 + $0x50] sm:$0xff]  ;;  %3464 = vmatmul.mubr.msk.f32.gmra.mxu1 %vm206_vm1, %v987_v35  ;;  %v948_v43 = vadd.f32 %v915_v37, %v877_v36  ;;  %v845_v45 = vmul.f32 %v4529_v32, %v736_v40  ;;  %v536_v47 = vpop.f32.mrf.mxu0  ;;  %v710_v40 = vld [vmem:[#allocation2 + $0x86] sm:$0xff] }
 0x1b4   :  { %3466 = vmatprep.mubr.msk.f32.mxu1 %vm4092_vm3, %v4091_v0  ;;  %v640_v48 = vmax.f32 %v535_v42, 0.0  ;;  %v916_v51 = vmul.f32 %v4531_v34, %v769_v41  ;;  %v743_v41 = vld [vmem:[#allocation2 + $0x87] sm:$0xff] }
 0x1b5   :  { %v988_v49 = vadd.f32 %v4538_v46, %v948_v43  ;;  %v878_v50 = vadd.f32 %v845_v45, %v807_v44  ;;  %v539_v52 = vpop.f32.mrf.mxu0  ;;  %v704_v53 = vld [vmem:[#allocation2 + $0x56] sm:$0xff] }
 0x1b6   :  { %v737_v54 = vld [vmem:[#allocation2 + $0x57] sm:$0xff]  ;;  %671 = vst.msk [vmem:[#allocation2 + $0x68] sm:$0xff] %vm206_vm1, %v640_v48  ;;  %v540_v56 = vadd.f32 %v4520_v19, %v539_v52  ;;  %v808_v58 = vmul.f32 %v4527_v31, %v704_v53  ;;  %v814_v52 = vmul.f32 %v4527_v31, %v710_v40  ;;  %v852_v53 = vmul.f32 %v4529_v32, %v743_v41 }
 0x1b7   :  { %v770_v55 = vld [vmem:[#allocation2 + $0x58] sm:$0xff]  ;;  %3467 = vmatmul.mubr.msk.f32.gmra.mxu1 %vm206_vm1, %v988_v49  ;;  %v949_v57 = vadd.f32 %v916_v51, %v878_v50  ;;  %v846_v59 = vmul.f32 %v4529_v32, %v737_v54  ;;  %v541_v60 = vpop.f32.mrf.mxu0 }
 0x1b8   :  { %3469 = vmatprep.mubr.msk.f32.mxu1 %vm4092_vm3, %v4091_v0  ;;  %v641_v61 = vmax.f32 %v540_v56, 0.0  ;;  %v917_v1 = vmul.f32 %v4531_v34, %v770_v55 }
 0x1b9   :  { %v989_v62 = vadd.f32 %v4538_v46, %v949_v57  ;;  %v879_v63 = vadd.f32 %v846_v59, %v808_v58  ;;  %v544_v2 = vpop.f32.mrf.mxu0  ;;  %v705_v3 = vld [vmem:[#allocation2 + $0x5e] sm:$0xff]  ;;  %v776_v58 = vld [vmem:[#allocation2 + $0x88] sm:$0xff] }
 0x1ba   :  { %v738_v4 = vld [vmem:[#allocation2 + $0x5f] sm:$0xff]  ;;  %672 = vst.msk [vmem:[#allocation2 + $0x70] sm:$0xff] %vm206_vm1, %v641_v61  ;;  %v545_v6 = vadd.f32 %v4520_v19, %v544_v2  ;;  %v809_v8 = vmul.f32 %v4527_v31, %v705_v3 }
 0x1bb   :  { %v771_v5 = vld [vmem:[#allocation2 + $0x60] sm:$0xff]  ;;  %3470 = vmatmul.mubr.msk.f32.gmra.mxu1 %vm206_vm1, %v989_v62  ;;  %v950_v7 = vadd.f32 %v917_v1, %v879_v63  ;;  %v847_v9 = vmul.f32 %v4529_v32, %v738_v4  ;;  %v546_v10 = vpop.f32.mrf.mxu0 }
 0x1bc   :  { %3472 = vmatprep.mubr.msk.f32.mxu1 %vm4092_vm3, %v4091_v0  ;;  %v642_v11 = vmax.f32 %v545_v6, 0.0  ;;  %v918_v14 = vmul.f32 %v4531_v34, %v771_v5  ;;  %v885_v5 = vadd.f32 %v852_v53, %v814_v52  ;;  %v923_v6 = vmul.f32 %v4531_v34, %v776_v58 }
 0x1bd   :  { %v990_v12 = vadd.f32 %v4538_v46, %v950_v7  ;;  %v880_v13 = vadd.f32 %v847_v9, %v809_v8  ;;  %v549_v15 = vpop.f32.mrf.mxu0  ;;  %v706_v16 = vld [vmem:[#allocation2 + $0x66] sm:$0xff] }
 0x1be   :  { %v739_v17 = vld [vmem:[#allocation2 + $0x67] sm:$0xff]  ;;  %673 = vst.msk [vmem:[#allocation2 + $0x78] sm:$0xff] %vm206_vm1, %v642_v11  ;;  %v550_v20 = vadd.f32 %v4520_v19, %v549_v15  ;;  %v810_v22 = vmul.f32 %v4527_v31, %v706_v16 }
 0x1bf   :  { %v772_v18 = vld [vmem:[#allocation2 + $0x68] sm:$0xff]  ;;  %3473 = vmatmul.mubr.msk.f32.gmra.mxu1 %vm206_vm1, %v990_v12  ;;  %v951_v21 = vadd.f32 %v918_v14, %v880_v13  ;;  %v848_v23 = vmul.f32 %v4529_v32, %v739_v17  ;;  %v551_v24 = vpop.f32.mrf.mxu0 }
 0x1c0   :  { %3475 = vmatprep.mubr.msk.f32.mxu1 %vm4092_vm3, %v4091_v0  ;;  %v643_v25 = vmax.f32 %v550_v20, 0.0  ;;  %v919_v28 = vmul.f32 %v4531_v34, %v772_v18  ;;  %v956_v18 = vadd.f32 %v923_v6, %v885_v5 }
 0x1c1   :  { %v991_v26 = vadd.f32 %v4538_v46, %v951_v21  ;;  %v881_v27 = vadd.f32 %v848_v23, %v810_v22  ;;  %v554_v29 = vpop.f32.mrf.mxu0  ;;  %v707_v30 = vld [vmem:[#allocation2 + $0x6e] sm:$0xff] }
 0x1c2   :  { %v740_v33 = vld [vmem:[#allocation2 + $0x6f] sm:$0xff]  ;;  %675 = vst.msk [vmem:[#allocation2 + $0x80] sm:$0x3] %vm674_vm6, %v643_v25  ;;  %v555_v36 = vadd.f32 %v4520_v19, %v554_v29  ;;  %v811_v38 = vmul.f32 %v4527_v31, %v707_v30 }
 0x1c3   :  { %v773_v35 = vld [vmem:[#allocation2 + $0x70] sm:$0xff]  ;;  %677 = vst.msk [vmem:[#allocation2 + $0x8e] sm:$0xfc] %vm676_vm7, %v643_v25  ;;  %3476 = vmatmul.mubr.msk.f32.gmra.mxu1 %vm206_vm1, %v991_v26  ;;  %v952_v37 = vadd.f32 %v919_v28, %v881_v27  ;;  %v849_v39 = vmul.f32 %v4529_v32, %v740_v33  ;;  %v556_v42 = vpop.f32.mrf.mxu0 }
 0x1c4   :  { %3478 = vmatprep.mubr.msk.f32.mxu1 %vm4092_vm3, %v4091_v0  ;;  %v644_v43 = vmax.f32 %v555_v36, 0.0  ;;  %v920_v47 = vmul.f32 %v4531_v34, %v773_v35 }
 0x1c5   :  { %v992_v44 = vadd.f32 %v4538_v46, %v952_v37  ;;  %v882_v45 = vadd.f32 %v849_v39, %v811_v38  ;;  %v559_v48 = vpop.f32.mrf.mxu0  ;;  %v708_v49 = vld [vmem:[#allocation2 + $0x76] sm:$0xff]  ;;  %v996_v39 = vadd.f32 %v4538_v46, %v956_v18 }
 0x1c6   :  { %v741_v50 = vld [vmem:[#allocation2 + $0x77] sm:$0xff]  ;;  %678 = vst.msk [vmem:[#allocation2 + $0x96] sm:$0xff] %vm206_vm1, %v644_v43  ;;  %v560_v54 = vadd.f32 %v4520_v19, %v559_v48  ;;  %v812_v56 = vmul.f32 %v4527_v31, %v708_v49 }
 0x1c7   :  { %v774_v51 = vld [vmem:[#allocation2 + $0x78] sm:$0xff]  ;;  %3479 = vmatmul.mubr.msk.f32.gmra.mxu1 %vm206_vm1, %v992_v44  ;;  %v953_v55 = vadd.f32 %v920_v47, %v882_v45  ;;  %v850_v57 = vmul.f32 %v4529_v32, %v741_v50  ;;  %v561_v59 = vpop.f32.mrf.mxu0 }
 0x1c8   :  { %3481 = vmatprep.mubr.msk.f32.mxu1 %vm4092_vm3, %v4091_v0  ;;  %v645_v60 = vmax.f32 %v560_v54, 0.0  ;;  %v921_v63 = vmul.f32 %v4531_v34, %v774_v51 }
 0x1c9   :  { %v993_v61 = vadd.f32 %v4538_v46, %v953_v55  ;;  %v883_v62 = vadd.f32 %v850_v57, %v812_v56  ;;  %v564_v1 = vpop.f32.mrf.mxu0  ;;  %v709_v2 = vld [vmem:[#allocation2 + $0x7e] sm:$0xff] }
 0x1ca   :  { %v742_v3 = vld [vmem:[#allocation2 + $0x7f] sm:$0xff]  ;;  %679 = vst.msk [vmem:[#allocation2 + $0x9e] sm:$0xff] %vm206_vm1, %v645_v60  ;;  %v565_v7 = vadd.f32 %v4520_v19, %v564_v1  ;;  %v813_v9 = vmul.f32 %v4527_v31, %v709_v2  ;;  %v711_v12 = vld [vmem:[#allocation2 + $0x8e] sm:$0xff] }
 0x1cb   :  { %v775_v4 = vld [vmem:[#allocation2 + $0x80] sm:$0xff]  ;;  %3482 = vmatmul.mubr.msk.f32.gmra.mxu1 %vm206_vm1, %v993_v61  ;;  %v954_v8 = vadd.f32 %v921_v63, %v883_v62  ;;  %v851_v10 = vmul.f32 %v4529_v32, %v742_v3  ;;  %v566_v11 = vpop.f32.mrf.mxu0  ;;  %v815_v24 = vmul.f32 %v4527_v31, %v711_v12 }
 0x1cc   :  { %3484 = vmatprep.mubr.msk.f32.mxu1 %vm4092_vm3, %v4091_v0  ;;  %v646_v13 = vmax.f32 %v565_v7, 0.0  ;;  %v922_v16 = vmul.f32 %v4531_v34, %v775_v4 }
 0x1cd   :  { %v994_v14 = vadd.f32 %v4538_v46, %v954_v8  ;;  %v884_v15 = vadd.f32 %v851_v10, %v813_v9  ;;  %v569_v17 = vpop.f32.mrf.mxu0  ;;  %v744_v20 = vld [vmem:[#allocation2 + $0x8f] sm:$0xff] }
 0x1ce   :  { %v712_v21 = vld [vmem:[#allocation2 + $0x96] sm:$0xff]  ;;  %680 = vst.msk [vmem:[#allocation2 + $0xa6] sm:$0xff] %vm206_vm1, %v646_v13  ;;  %v570_v22 = vadd.f32 %v4520_v19, %v569_v17  ;;  %v853_v25 = vmul.f32 %v4529_v32, %v744_v20 }
 0x1cf   :  { %3485 = vmatmul.mubr.msk.f32.gmra.mxu1 %vm206_vm1, %v994_v14  ;;  %v955_v23 = vadd.f32 %v922_v16, %v884_v15  ;;  %v571_v26 = vpop.f32.mrf.mxu0  ;;  %v777_v27 = vld [vmem:[#allocation2 + $0x90] sm:$0xff]  ;;  %v816_v33 = vmul.f32 %v4527_v31, %v712_v21 }
 0x1d0   :  { %3487 = vmatprep.mubr.msk.f32.mxu1 %vm4092_vm3, %v4091_v0  ;;  %v647_v28 = vmax.f32 %v570_v22, 0.0  ;;  %v886_v30 = vadd.f32 %v853_v25, %v815_v24  ;;  %v924_v40 = vmul.f32 %v4531_v34, %v777_v27 }
 0x1d1   :  { %v995_v29 = vadd.f32 %v4538_v46, %v955_v23  ;;  %v574_v35 = vpop.f32.mrf.mxu0  ;;  %v745_v36 = vld [vmem:[#allocation2 + $0x97] sm:$0xff] }
 0x1d2   :  { %v713_v37 = vld [vmem:[#allocation2 + $0x9e] sm:$0xff]  ;;  %681 = vst.msk [vmem:[#allocation2 + $0xae] sm:$0xff] %vm206_vm1, %v647_v28  ;;  %v575_v38 = vadd.f32 %v4520_v19, %v574_v35  ;;  %v854_v42 = vmul.f32 %v4529_v32, %v745_v36  ;;  %v957_v45 = vadd.f32 %v924_v40, %v886_v30 }
 0x1d3   :  { %3488 = vmatmul.mubr.msk.f32.gmra.mxu1 %vm206_vm1, %v995_v29  ;;  %v778_v41 = vld [vmem:[#allocation2 + $0x98] sm:$0xff]  ;;  %v576_v43 = vpop.f32.mrf.mxu0  ;;  %v817_v48 = vmul.f32 %v4527_v31, %v713_v37 }
 0x1d4   :  { %3490 = vmatprep.mubr.msk.f32.mxu1 %vm4092_vm3, %v4091_v0  ;;  %v648_v44 = vmax.f32 %v575_v38, 0.0  ;;  %v887_v47 = vadd.f32 %v854_v42, %v816_v33  ;;  %v925_v50 = vmul.f32 %v4531_v34, %v778_v41  ;;  %v997_v59 = vadd.f32 %v4538_v46, %v957_v45 }
 0x1d5   :  { %v579_v49 = vpop.f32.mrf.mxu0  ;;  %v746_v51 = vld [vmem:[#allocation2 + $0x9f] sm:$0xff] }
 0x1d6   :  { %v714_v52 = vld [vmem:[#allocation2 + $0xa6] sm:$0xff]  ;;  %682 = vst.msk [vmem:[#allocation2 + $0xb6] sm:$0xff] %vm206_vm1, %v648_v44  ;;  %v580_v53 = vadd.f32 %v4520_v19, %v579_v49  ;;  %v855_v54 = vmul.f32 %v4529_v32, %v746_v51  ;;  %v958_v56 = vadd.f32 %v925_v50, %v887_v47 }
 0x1d7   :  { %3491 = vmatmul.mubr.msk.f32.gmra.mxu1 %vm206_vm1, %v996_v39  ;;  %v581_v55 = vpop.f32.mrf.mxu0  ;;  %v779_v57 = vld [vmem:[#allocation2 + $0xa0] sm:$0xff]  ;;  %v818_v61 = vmul.f32 %v4527_v31, %v714_v52 }
 0x1d8   :  { %3493 = vmatprep.mubr.msk.f32.mxu1 %vm4092_vm3, %v4091_v0  ;;  %v649_v58 = vmax.f32 %v580_v53, 0.0  ;;  %v888_v60 = vadd.f32 %v855_v54, %v817_v48  ;;  %v926_v3 = vmul.f32 %v4531_v34, %v779_v57  ;;  %v998_v7 = vadd.f32 %v4538_v46, %v958_v56 }
 0x1d9   :  { %v584_v62 = vpop.f32.mrf.mxu0  ;;  %v747_v63 = vld [vmem:[#allocation2 + $0xa7] sm:$0xff] }
 0x1da   :  { %v715_v1 = vld [vmem:[#allocation2 + $0xae] sm:$0xff]  ;;  %683 = vst.msk [vmem:[#allocation2 + $0xbe] sm:$0xff] %vm206_vm1, %v649_v58  ;;  %v585_v2 = vadd.f32 %v4520_v19, %v584_v62  ;;  %v856_v5 = vmul.f32 %v4529_v32, %v747_v63  ;;  %v959_v9 = vadd.f32 %v926_v3, %v888_v60 }
 0x1db   :  { %3494 = vmatmul.mubr.msk.f32.gmra.mxu1 %vm206_vm1, %v997_v59  ;;  %v780_v4 = vld [vmem:[#allocation2 + $0xa8] sm:$0xff]  ;;  %v586_v6 = vpop.f32.mrf.mxu0  ;;  %v819_v11 = vmul.f32 %v4527_v31, %v715_v1 }
 0x1dc   :  { %3496 = vmatprep.mubr.msk.f32.mxu1 %vm4092_vm3, %v4091_v0  ;;  %v650_v8 = vmax.f32 %v585_v2, 0.0  ;;  %v889_v10 = vadd.f32 %v856_v5, %v818_v61  ;;  %v927_v13 = vmul.f32 %v4531_v34, %v780_v4  ;;  %v999_v23 = vadd.f32 %v4538_v46, %v959_v9 }
 0x1dd   :  { %v589_v12 = vpop.f32.mrf.mxu0  ;;  %v748_v14 = vld [vmem:[#allocation2 + $0xaf] sm:$0xff] }
 0x1de   :  { %v716_v15 = vld [vmem:[#allocation2 + $0xb6] sm:$0xff]  ;;  %684 = vst.msk [vmem:[#allocation2 + $0xc6] sm:$0xff] %vm206_vm1, %v650_v8  ;;  %v590_v16 = vadd.f32 %v4520_v19, %v589_v12  ;;  %v857_v17 = vmul.f32 %v4529_v32, %v748_v14  ;;  %v960_v20 = vadd.f32 %v927_v13, %v889_v10 }
 0x1df   :  { %3497 = vmatmul.mubr.msk.f32.gmra.mxu1 %vm206_vm1, %v998_v7  ;;  %v591_v18 = vpop.f32.mrf.mxu0  ;;  %v781_v21 = vld [vmem:[#allocation2 + $0xb0] sm:$0xff]  ;;  %v820_v25 = vmul.f32 %v4527_v31, %v716_v15 }
 0x1e0   :  { %3499 = vmatprep.mubr.msk.f32.mxu1 %vm4092_vm3, %v4091_v0  ;;  %v651_v22 = vmax.f32 %v590_v16, 0.0  ;;  %v890_v24 = vadd.f32 %v857_v17, %v819_v11  ;;  %v928_v30 = vmul.f32 %v4531_v34, %v781_v21  ;;  %v1000_v37 = vadd.f32 %v4538_v46, %v960_v20 }
 0x1e1   :  { %v594_v26 = vpop.f32.mrf.mxu0  ;;  %v749_v27 = vld [vmem:[#allocation2 + $0xb7] sm:$0xff] }
 0x1e2   :  { %v717_v28 = vld [vmem:[#allocation2 + $0xbe] sm:$0xff]  ;;  %685 = vst.msk [vmem:[#allocation2 + $0xce] sm:$0xff] %vm206_vm1, %v651_v22  ;;  %v595_v29 = vadd.f32 %v4520_v19, %v594_v26  ;;  %v858_v35 = vmul.f32 %v4529_v32, %v749_v27  ;;  %v961_v39 = vadd.f32 %v928_v30, %v890_v24 }
 0x1e3   :  { %3500 = vmatmul.mubr.msk.f32.gmra.mxu1 %vm206_vm1, %v999_v23  ;;  %v782_v33 = vld [vmem:[#allocation2 + $0xb8] sm:$0xff]  ;;  %v596_v36 = vpop.f32.mrf.mxu0  ;;  %v821_v41 = vmul.f32 %v4527_v31, %v717_v28 }
 0x1e4   :  { %3502 = vmatprep.mubr.msk.f32.mxu1 %vm4092_vm3, %v4091_v0  ;;  %v652_v38 = vmax.f32 %v595_v29, 0.0  ;;  %v891_v40 = vadd.f32 %v858_v35, %v820_v25  ;;  %v929_v43 = vmul.f32 %v4531_v34, %v782_v33  ;;  %v1001_v53 = vadd.f32 %v4538_v46, %v961_v39 }
 0x1e5   :  { %v599_v42 = vpop.f32.mrf.mxu0  ;;  %v750_v44 = vld [vmem:[#allocation2 + $0xbf] sm:$0xff] }
 0x1e6   :  { %v718_v45 = vld [vmem:[#allocation2 + $0xc6] sm:$0xff]  ;;  %686 = vst.msk [vmem:[#allocation2 + $0xd6] sm:$0xff] %vm206_vm1, %v652_v38  ;;  %v600_v47 = vadd.f32 %v4520_v19, %v599_v42  ;;  %v859_v48 = vmul.f32 %v4529_v32, %v750_v44  ;;  %v962_v50 = vadd.f32 %v929_v43, %v891_v40 }
 0x1e7   :  { %3503 = vmatmul.mubr.msk.f32.gmra.mxu1 %vm206_vm1, %v1000_v37  ;;  %v601_v49 = vpop.f32.mrf.mxu0  ;;  %v783_v51 = vld [vmem:[#allocation2 + $0xc0] sm:$0xff]  ;;  %v822_v55 = vmul.f32 %v4527_v31, %v718_v45 }
 0x1e8   :  { %3505 = vmatprep.mubr.msk.f32.mxu1 %vm4092_vm3, %v4091_v0  ;;  %v653_v52 = vmax.f32 %v600_v47, 0.0  ;;  %v892_v54 = vadd.f32 %v859_v48, %v821_v41  ;;  %v930_v60 = vmul.f32 %v4531_v34, %v783_v51  ;;  %v1002_v1 = vadd.f32 %v4538_v46, %v962_v50 }
 0x1e9   :  { %v604_v56 = vpop.f32.mrf.mxu0  ;;  %v751_v57 = vld [vmem:[#allocation2 + $0xc7] sm:$0xff] }
 0x1ea   :  { %v719_v58 = vld [vmem:[#allocation2 + $0xce] sm:$0xff]  ;;  %687 = vst.msk [vmem:[#allocation2 + $0xde] sm:$0xff] %vm206_vm1, %v653_v52  ;;  %v605_v59 = vadd.f32 %v4520_v19, %v604_v56  ;;  %v860_v62 = vmul.f32 %v4529_v32, %v751_v57  ;;  %v963_v3 = vadd.f32 %v930_v60, %v892_v54 }
 0x1eb   :  { %3506 = vmatmul.mubr.msk.f32.gmra.mxu1 %vm206_vm1, %v1001_v53  ;;  %v784_v61 = vld [vmem:[#allocation2 + $0xc8] sm:$0xff]  ;;  %v606_v63 = vpop.f32.mrf.mxu0  ;;  %v823_v5 = vmul.f32 %v4527_v31, %v719_v58 }
 0x1ec   :  { %3508 = vmatprep.mubr.msk.f32.mxu1 %vm4092_vm3, %v4091_v0  ;;  %v654_v2 = vmax.f32 %v605_v59, 0.0  ;;  %v893_v4 = vadd.f32 %v860_v62, %v822_v55  ;;  %v931_v7 = vmul.f32 %v4531_v34, %v784_v61  ;;  %v1003_v16 = vadd.f32 %v4538_v46, %v963_v3 }
 0x1ed   :  { %v609_v6 = vpop.f32.mrf.mxu0  ;;  %v752_v8 = vld [vmem:[#allocation2 + $0xcf] sm:$0xff] }
 0x1ee   :  { %v720_v9 = vld [vmem:[#allocation2 + $0xd6] sm:$0xff]  ;;  %688 = vst.msk [vmem:[#allocation2 + $0xe6] sm:$0xff] %vm206_vm1, %v654_v2  ;;  %v610_v10 = vadd.f32 %v4520_v19, %v609_v6  ;;  %v861_v11 = vmul.f32 %v4529_v32, %v752_v8  ;;  %v964_v13 = vadd.f32 %v931_v7, %v893_v4 }
 0x1ef   :  { %3509 = vmatmul.mubr.msk.f32.gmra.mxu1 %vm206_vm1, %v1002_v1  ;;  %v611_v12 = vpop.f32.mrf.mxu0  ;;  %v785_v14 = vld [vmem:[#allocation2 + $0xd0] sm:$0xff]  ;;  %v824_v18 = vmul.f32 %v4527_v31, %v720_v9 }
 0x1f0   :  { %3511 = vmatprep.mubr.msk.f32.mxu1 %vm4092_vm3, %v4091_v0  ;;  %v655_v15 = vmax.f32 %v610_v10, 0.0  ;;  %v894_v17 = vadd.f32 %v861_v11, %v823_v5  ;;  %v932_v24 = vmul.f32 %v4531_v34, %v785_v14  ;;  %v1004_v28 = vadd.f32 %v4538_v46, %v964_v13 }
 0x1f1   :  { %v614_v20 = vpop.f32.mrf.mxu0  ;;  %v753_v21 = vld [vmem:[#allocation2 + $0xd7] sm:$0xff] }
 0x1f2   :  { %v721_v22 = vld [vmem:[#allocation2 + $0xde] sm:$0xff]  ;;  %689 = vst.msk [vmem:[#allocation2 + $0xee] sm:$0xff] %vm206_vm1, %v655_v15  ;;  %v615_v23 = vadd.f32 %v4520_v19, %v614_v20  ;;  %v862_v26 = vmul.f32 %v4529_v32, %v753_v21  ;;  %v965_v30 = vadd.f32 %v932_v24, %v894_v17 }
 0x1f3   :  { %3512 = vmatmul.mubr.msk.f32.gmra.mxu1 %vm206_vm1, %v1003_v16  ;;  %v786_v25 = vld [vmem:[#allocation2 + $0xd8] sm:$0xff]  ;;  %v616_v27 = vpop.f32.mrf.mxu0  ;;  %v825_v35 = vmul.f32 %v4527_v31, %v721_v22 }
 0x1f4   :  { %3514 = vmatprep.mubr.msk.f32.mxu1 %vm4092_vm3, %v4091_v0  ;;  %v656_v29 = vmax.f32 %v615_v23, 0.0  ;;  %v895_v33 = vadd.f32 %v862_v26, %v824_v18  ;;  %v933_v37 = vmul.f32 %v4531_v34, %v786_v25  ;;  %v1005_v47 = vadd.f32 %v4538_v46, %v965_v30 }
 0x1f5   :  { %v619_v36 = vpop.f32.mrf.mxu0  ;;  %v754_v38 = vld [vmem:[#allocation2 + $0xdf] sm:$0xff] }
 0x1f6   :  { %v722_v39 = vld [vmem:[#allocation2 + $0xe6] sm:$0xff]  ;;  %690 = vst.msk [vmem:[#allocation2 + $0xf6] sm:$0xff] %vm206_vm1, %v656_v29  ;;  %v620_v40 = vadd.f32 %v4520_v19, %v619_v36  ;;  %v863_v41 = vmul.f32 %v4529_v32, %v754_v38  ;;  %v966_v43 = vadd.f32 %v933_v37, %v895_v33  ;;  %v3796_v37 = vld [vmem:[#allocation7 + $0x2] ss:$0 sm:$0xff] }
 0x1f7   :  { %3515 = vmatmul.mubr.msk.f32.gmra.mxu1 %vm206_vm1, %v1004_v28  ;;  %v621_v42 = vpop.f32.mrf.mxu0  ;;  %v787_v44 = vld [vmem:[#allocation2 + $0xe0] sm:$0xff]  ;;  %v826_v49 = vmul.f32 %v4527_v31, %v722_v39  ;;  %v4832_v39 = vld [vmem:[#allocation22 + $0x38] sm:$0xff] }
 0x1f8   :  { %3517 = vmatprep.mubr.msk.f32.mxu1 %vm4092_vm3, %v4091_v0  ;;  %v657_v45 = vmax.f32 %v620_v40, 0.0  ;;  %v896_v48 = vadd.f32 %v863_v41, %v825_v35  ;;  %v934_v54 = vmul.f32 %v4531_v34, %v787_v44  ;;  %v1006_v57 = vadd.f32 %v4538_v46, %v966_v43  ;;  %3649 = vmatpush3.msra.mxu0 %v4832_v39  ;;  %v4836_v40 = vld [vmem:[#allocation12] ss:$0 sm:$0xff] }
 0x1f9   :  { %v624_v50 = vpop.f32.mrf.mxu0  ;;  %v755_v51 = vld [vmem:[#allocation2 + $0xe7] sm:$0xff]  ;;  %3650 = vmatprep.subr.mxu0 %v4091_v0 }
 0x1fa   :  { %v723_v52 = vld [vmem:[#allocation2 + $0xee] sm:$0xff]  ;;  %691 = vst.msk [vmem:[#allocation2 + $0xfe] sm:$0xff] %vm206_vm1, %v657_v45  ;;  %v625_v53 = vadd.f32 %v4520_v19, %v624_v50  ;;  %v864_v55 = vmul.f32 %v4529_v32, %v755_v51  ;;  %v967_v60 = vadd.f32 %v934_v54, %v896_v48  ;;  %v4849_v54 = vld [vmem:[#allocation13 + $0x1] ss:$0 sm:$0xff] }
 0x1fb   :  { %3518 = vmatmul.mubr.msk.f32.gmra.mxu1 %vm206_vm1, %v1005_v47  ;;  %v626_v56 = vpop.f32.mrf.mxu0  ;;  %v788_v58 = vld [vmem:[#allocation2 + $0xe8] sm:$0xff]  ;;  %v827_v62 = vmul.f32 %v4527_v31, %v723_v52 }
 0x1fc   :  { %3520 = vmatprep.mubr.msk.f32.mxu1 %vm4092_vm3, %v4091_v0  ;;  %v658_v59 = vmax.f32 %v625_v53, 0.0  ;;  %v897_v61 = vadd.f32 %v864_v55, %v826_v49  ;;  %v935_v1 = vmul.f32 %v4531_v34, %v788_v58  ;;  %v1007_v4 = vadd.f32 %v4538_v46, %v967_v60  ;;  %v4841_v47 = vld [vmem:[#allocation22 + $0x30] sm:$0xff] }
 0x1fd   :  { %v756_v19 = vld [vmem:[#allocation2 + $0xef] sm:$0xff]  ;;  %3651 = vmatpush3.msra.mxu0 %v4841_v47  ;;  %v4847_v53 = vld [vmem:[#allocation13] ss:$0 sm:$0xff]  ;;  %v4851_v56 = vld [vmem:[#allocation13 + $0x2] ss:$0 sm:$0xff] }
 0x1fe   :  { %v724_v63 = vld [vmem:[#allocation2 + $0xf6] sm:$0xff]  ;;  %693 = vst.msk [vmem:[#allocation2 + $0x106] sm:$0xf] %vm692_vm8, %v658_v59  ;;  %v865_v3 = vmul.f32 %v4529_v32, %v756_v19  ;;  %v968_v5 = vadd.f32 %v935_v1, %v897_v61  ;;  %3652 = vmatprep.subr.mxu0 %v4091_v0 }
 0x1ff   :  { %3521 = vmatmul.mubr.msk.f32.gmra.mxu1 %vm206_vm1, %v1006_v57  ;;  %v789_v2 = vld [vmem:[#allocation2 + $0xf0] sm:$0xff]  ;;  %v828_v7 = vmul.f32 %v4527_v31, %v724_v63 }
 0x200   :  { %3523 = vmatprep.mubr.msk.f32.mxu1 %vm4092_vm3, %v4091_v0  ;;  %v898_v6 = vadd.f32 %v865_v3, %v827_v62  ;;  %v936_v8 = vmul.f32 %v4531_v34, %v789_v2  ;;  %v1008_v14 = vadd.f32 %v4538_v46, %v968_v5 }
 0x201   :  { %v757_v9 = vld [vmem:[#allocation2 + $0xf7] sm:$0xff] }
 0x202   :  { %v725_v10 = vld [vmem:[#allocation2 + $0xfe] sm:$0xff]  ;;  %v866_v11 = vmul.f32 %v4529_v32, %v757_v9  ;;  %v969_v12 = vadd.f32 %v936_v8, %v898_v6 }
 0x203   :  { %3524 = vmatmul.mubr.msk.f32.gmra.mxu1 %vm206_vm1, %v1007_v4  ;;  %v790_v13 = vld [vmem:[#allocation2 + $0xf8] sm:$0xff]  ;;  %v829_v16 = vmul.f32 %v4527_v31, %v725_v10  ;;  %v4858_v4 = vld [vmem:[#allocation15] ss:$0 sm:$0xff] }
 0x204   :  { %3526 = vmatprep.mubr.msk.f32.mxu1 %vm4092_vm3, %v4091_v0  ;;  %v899_v15 = vadd.f32 %v866_v11, %v828_v7  ;;  %v937_v20 = vmul.f32 %v4531_v34, %v790_v13  ;;  %v1009_v23 = vadd.f32 %v4538_v46, %v969_v12 }
 0x205   :  { %v758_v17 = vld [vmem:[#allocation2 + $0xff] sm:$0xff]  ;;  %v759_v22 = vld [vmem:[#allocation2 + $0x107] sm:$0xf] }
 0x206   :  { %v726_v18 = vld [vmem:[#allocation2 + $0x106] sm:$0xf]  ;;  %v867_v21 = vmul.f32 %v4529_v32, %v758_v17  ;;  %v970_v25 = vadd.f32 %v937_v20, %v899_v15  ;;  %v868_v28 = vmul.f32 %v4529_v32, %v759_v22 }
 0x207   :  { %3527 = vmatmul.mubr.msk.f32.gmra.mxu1 %vm206_vm1, %v1008_v14  ;;  %v791_v24 = vld [vmem:[#allocation2 + $0x100] sm:$0xff]  ;;  %v830_v27 = vmul.f32 %v4527_v31, %v726_v18  ;;  %v792_v29 = vld [vmem:[#allocation2 + $0x108] sm:$0xf] }
 0x208   :  { %3529 = vmatprep.mubr.msk.f32.mxu1 %vm4092_vm3, %v4091_v0  ;;  %v900_v26 = vadd.f32 %v867_v21, %v829_v16  ;;  %v938_v30 = vmul.f32 %v4531_v34, %v791_v24  ;;  %v1010_v33 = vadd.f32 %v4538_v46, %v970_v25  ;;  %v939_v38 = vmul.f32 %v3796_v37, %v792_v29  ;;  %v4878_v37 = vld [vmem:[#allocation22 + $0x18] sm:$0xff] }
 0x209   :  { %v901_v36 = vadd.f32 %v868_v28, %v830_v27  ;;  %v2461_v27 = vld [vmem:[#allocation22 + $0x28] sm:$0xff]  ;;  %v4871_v28 = vld [vmem:[#allocation22 + $0x20] sm:$0xff] }
 0x20a   :  { %v971_v35 = vadd.f32 %v938_v30, %v900_v26  ;;  %3653 = vmatpush3.msra.mxu0 %v2461_v27 }
 0x20b   :  { %3530 = vmatmul.mubr.msk.f32.gmra.mxu1 %vm206_vm1, %v1009_v23  ;;  %v972_v32 = vadd.f32 %v939_v38, %v901_v36  ;;  %3654 = vmatprep.subr.mxu0 %v4091_v0 }
 0x20c   :  { %3532 = vmatprep.mubr.msk.f32.mxu1 %vm4092_vm3, %v4091_v0  ;;  %v1011_v31 = vadd.f32 %v4538_v46, %v971_v35  ;;  %3655 = vmatpush3.msra.mxu0 %v4871_v28 }
 0x20d   :  { %v1012_v34 = vadd.f32 %v4538_v46, %v972_v32  ;;  %3656 = vmatprep.subr.mxu0 %v4091_v0 }
 0x20e   :  { %3657 = vmatpush3.msra.mxu0 %v4878_v37 }
 0x20f   :  { %3533 = vmatmul.mubr.msk.f32.gmra.mxu1 %vm206_vm1, %v1010_v33  ;;  %3658 = vmatprep.subr.mxu0 %v4091_v0 }
 0x210   :  { %3535 = vmatprep.mubr.msk.f32.mxu1 %vm4092_vm3, %v4091_v0 }
 0x213   :  { %3536 = vmatmul.mubr.msk.f32.gmra.mxu1 %vm206_vm1, %v1011_v31 }
 0x214   :  { %3538 = vmatprep.mubr.msk.f32.mxu1 %vm4092_vm3, %v4091_v0 }
 0x217   :  { %3539 = vmatmul.mubr.msk.f32.gmra.mxu1 %vm206_vm1, %v1012_v34 }
 0x218   :  { %3549 = vmatprep.mubr.msk.f32.mxu1 %vm4092_vm3, %v4091_v0 }
 0x257   :  { %v1187_v46 = vpop.f32.mrf.mxu1 }
 0x258   :  { %v1188_v41 = vadd.f32 %v4836_v40, %v1187_v46 }
 0x259   :  { %v3444_v42 = vpop.f32.mrf.mxu1 }
 0x25a   :  { %v1350_v43 = vmax.f32 %v1188_v41, 0.0 }
 0x25b   :  { %v1192_v44 = vpop.f32.mrf.mxu1 }
 0x25c   :  { %1382 = vst.msk [vmem:[#allocation3 + $0x8] sm:$0xff] %vm212_vm5, %v1350_v43  ;;  %v1193_v45 = vadd.f32 %v4836_v40, %v1192_v44 }
 0x25d   :  { %v3447_v48 = vpop.f32.mrf.mxu1 }
 0x25e   :  { %v1351_v49 = vmax.f32 %v1193_v45, 0.0 }
 0x25f   :  { %v1197_v50 = vpop.f32.mrf.mxu1 }
 0x260   :  { %1383 = vst.msk [vmem:[#allocation3 + $0x10] sm:$0xff] %vm212_vm5, %v1351_v49  ;;  %v1198_v51 = vadd.f32 %v4836_v40, %v1197_v50  ;;  %v4898_v50 = vld [vmem:[#allocation22 + $0x10] sm:$0xff] }
 0x261   :  { %v3450_v52 = vpop.f32.mrf.mxu1  ;;  %3659 = vmatpush3.msra.mxu0 %v4898_v50 }
 0x262   :  { %v1352_v55 = vmax.f32 %v1198_v51, 0.0  ;;  %3660 = vmatprep.subr.mxu0 %v4091_v0 }
 0x263   :  { %v1202_v57 = vpop.f32.mrf.mxu1  ;;  %v1414_v58 = vld [vmem:[#allocation3 + $0x6] sm:$0xff] }
 0x264   :  { %v1447_v59 = vld [vmem:[#allocation3 + $0x7] sm:$0xff]  ;;  %1384 = vst.msk [vmem:[#allocation3 + $0x18] sm:$0xff] %vm212_vm5, %v1352_v55  ;;  %v1203_v61 = vadd.f32 %v4836_v40, %v1202_v57  ;;  %v1518_v62 = vmul.f32 %v4847_v53, %v1414_v58 }
 0x265   :  { %v1480_v60 = vld [vmem:[#allocation3 + $0x8] sm:$0xff]  ;;  %v1556_v19 = vmul.f32 %v4849_v54, %v1447_v59  ;;  %v3453_v63 = vpop.f32.mrf.mxu1 }
 0x266   :  { %v1353_v1 = vmax.f32 %v1203_v61, 0.0  ;;  %v1627_v3 = vmul.f32 %v4851_v56, %v1480_v60 }
 0x267   :  { %v1589_v2 = vadd.f32 %v1556_v19, %v1518_v62  ;;  %v1207_v5 = vpop.f32.mrf.mxu1  ;;  %v1415_v6 = vld [vmem:[#allocation3 + $0xe] sm:$0xff] }
 0x268   :  { %v1448_v7 = vld [vmem:[#allocation3 + $0xf] sm:$0xff]  ;;  %1385 = vst.msk [vmem:[#allocation3 + $0x20] sm:$0xff] %vm212_vm5, %v1353_v1  ;;  %v1208_v9 = vadd.f32 %v4836_v40, %v1207_v5  ;;  %v1519_v11 = vmul.f32 %v4847_v53, %v1415_v6 }
 0x269   :  { %v1481_v8 = vld [vmem:[#allocation3 + $0x10] sm:$0xff]  ;;  %v1660_v10 = vadd.f32 %v1627_v3, %v1589_v2  ;;  %v1557_v12 = vmul.f32 %v4849_v54, %v1448_v7  ;;  %v3456_v13 = vpop.f32.mrf.mxu1 }
 0x26a   :  { %v1354_v14 = vmax.f32 %v1208_v9, 0.0  ;;  %v1628_v17 = vmul.f32 %v4851_v56, %v1481_v8 }
 0x26b   :  { %v1700_v15 = vadd.f32 %v4858_v4, %v1660_v10  ;;  %v1590_v16 = vadd.f32 %v1557_v12, %v1519_v11  ;;  %v1212_v18 = vpop.f32.mrf.mxu1  ;;  %v1416_v20 = vld [vmem:[#allocation3 + $0x16] sm:$0xff] }
 0x26c   :  { %v1449_v21 = vld [vmem:[#allocation3 + $0x17] sm:$0xff]  ;;  %1386 = vst.msk [vmem:[#allocation3 + $0x28] sm:$0xff] %vm212_vm5, %v1354_v14  ;;  %v1213_v23 = vadd.f32 %v4836_v40, %v1212_v18  ;;  %v1520_v25 = vmul.f32 %v4847_v53, %v1416_v20 }
 0x26d   :  { %v1482_v22 = vld [vmem:[#allocation3 + $0x18] sm:$0xff]  ;;  %3550 = vmatmul.mubr.msk.f32.vlgmr.msra.gmra.mxu1 %vm212_vm5, %v1700_v15  ;;  %v1661_v24 = vadd.f32 %v1628_v17, %v1590_v16  ;;  %v1558_v26 = vmul.f32 %v4849_v54, %v1449_v21  ;;  %v3459_v29 = vpop.f32.mrf.mxu1 }
 0x26e   :  { %3552 = vmatprep.mubr.msk.f32.mxu1 %vm4092_vm3, %v4091_v0  ;;  %v1355_v30 = vmax.f32 %v1213_v23, 0.0  ;;  %v1629_v36 = vmul.f32 %v4851_v56, %v1482_v22  ;;  %3771 = vmatpush3.msra.mxu1 %v4832_v39 }
 0x26f   :  { %v1701_v33 = vadd.f32 %v4858_v4, %v1661_v24  ;;  %v1591_v35 = vadd.f32 %v1558_v26, %v1520_v25  ;;  %v1217_v38 = vpop.f32.mrf.mxu1  ;;  %v1417_v31 = vld [vmem:[#allocation3 + $0x1e] sm:$0xff]  ;;  %3764 = vmatprep.subr.mxu1 %v4091_v0 }
 0x270   :  { %v1450_v32 = vld [vmem:[#allocation3 + $0x1f] sm:$0xff]  ;;  %1387 = vst.msk [vmem:[#allocation3 + $0x30] sm:$0xff] %vm212_vm5, %v1355_v30  ;;  %v1218_v46 = vadd.f32 %v4836_v40, %v1217_v38  ;;  %v1521_v42 = vmul.f32 %v4847_v53, %v1417_v31  ;;  %3772 = vmatpush3.msra.mxu1 %v4841_v47  ;;  %v4908_v47 = vld [vmem:[#allocation22 + $0x8] sm:$0xff] }
 0x271   :  { %v1483_v34 = vld [vmem:[#allocation3 + $0x20] sm:$0xff]  ;;  %3553 = vmatmul.mubr.msk.f32.gmra.mxu1 %vm212_vm5, %v1701_v33  ;;  %v1662_v41 = vadd.f32 %v1629_v36, %v1591_v35  ;;  %v1559_v43 = vmul.f32 %v4849_v54, %v1450_v32  ;;  %v3462_v39 = vpop.f32.mrf.mxu1  ;;  %3765 = vmatprep.subr.mxu1 %v4091_v0 }
 0x272   :  { %3555 = vmatprep.mubr.msk.f32.mxu1 %vm4092_vm3, %v4091_v0  ;;  %v1356_v44 = vmax.f32 %v1218_v46, 0.0  ;;  %v1630_v49 = vmul.f32 %v4851_v56, %v1483_v34  ;;  %3773 = vmatpush3.msra.mxu1 %v2461_v27 }
 0x273   :  { %v1702_v45 = vadd.f32 %v4858_v4, %v1662_v41  ;;  %v1592_v48 = vadd.f32 %v1559_v43, %v1521_v42  ;;  %v1222_v51 = vpop.f32.mrf.mxu1  ;;  %v1418_v52 = vld [vmem:[#allocation3 + $0x26] sm:$0xff]  ;;  %3661 = vmatpush3.msra.mxu0 %v4908_v47  ;;  %3766 = vmatprep.subr.mxu1 %v4091_v0 }
 0x274   :  { %v1451_v55 = vld [vmem:[#allocation3 + $0x27] sm:$0xff]  ;;  %1388 = vst.msk [vmem:[#allocation3 + $0x38] sm:$0xff] %vm212_vm5, %v1356_v44  ;;  %v1223_v58 = vadd.f32 %v4836_v40, %v1222_v51  ;;  %v1522_v60 = vmul.f32 %v4847_v53, %v1418_v52  ;;  %3662 = vmatprep.subr.mxu0 %v4091_v0  ;;  %3774 = vmatpush3.msra.mxu1 %v4871_v28 }
 0x275   :  { %v1484_v57 = vld [vmem:[#allocation3 + $0x28] sm:$0xff]  ;;  %3556 = vmatmul.mubr.msk.f32.gmra.mxu1 %vm212_vm5, %v1702_v45  ;;  %v1663_v59 = vadd.f32 %v1630_v49, %v1592_v48  ;;  %v1560_v61 = vmul.f32 %v4849_v54, %v1451_v55  ;;  %v3465_v62 = vpop.f32.mrf.mxu1  ;;  %3767 = vmatprep.subr.mxu1 %v4091_v0 }
 0x276   :  { %3558 = vmatprep.mubr.msk.f32.mxu1 %vm4092_vm3, %v4091_v0  ;;  %v1357_v19 = vmax.f32 %v1223_v58, 0.0  ;;  %v1631_v2 = vmul.f32 %v4851_v56, %v1484_v57  ;;  %3775 = vmatpush3.msra.mxu1 %v4878_v37 }
 0x277   :  { %v1703_v63 = vadd.f32 %v4858_v4, %v1663_v59  ;;  %v1593_v1 = vadd.f32 %v1560_v61, %v1522_v60  ;;  %v1227_v3 = vpop.f32.mrf.mxu1  ;;  %v1419_v5 = vld [vmem:[#allocation3 + $0x2e] sm:$0xff]  ;;  %3768 = vmatprep.subr.mxu1 %v4091_v0 }
 0x278   :  { %v1452_v6 = vld [vmem:[#allocation3 + $0x2f] sm:$0xff]  ;;  %1389 = vst.msk [vmem:[#allocation3 + $0x40] sm:$0xff] %vm212_vm5, %v1357_v19  ;;  %v1228_v8 = vadd.f32 %v4836_v40, %v1227_v3  ;;  %v1523_v10 = vmul.f32 %v4847_v53, %v1419_v5  ;;  %3776 = vmatpush3.msra.mxu1 %v4898_v50 }
 0x279   :  { %v1485_v7 = vld [vmem:[#allocation3 + $0x30] sm:$0xff]  ;;  %3559 = vmatmul.mubr.msk.f32.gmra.mxu1 %vm212_vm5, %v1703_v63  ;;  %v1664_v9 = vadd.f32 %v1631_v2, %v1593_v1  ;;  %v1561_v11 = vmul.f32 %v4849_v54, %v1452_v6  ;;  %v3468_v12 = vpop.f32.mrf.mxu1  ;;  %3769 = vmatprep.subr.mxu1 %v4091_v0 }
 0x27a   :  { %3561 = vmatprep.mubr.msk.f32.mxu1 %vm4092_vm3, %v4091_v0  ;;  %v1358_v13 = vmax.f32 %v1228_v8, 0.0  ;;  %v1632_v16 = vmul.f32 %v4851_v56, %v1485_v7  ;;  %3777 = vmatpush3.msra.mxu1 %v4908_v47 }
 0x27b   :  { %v1704_v14 = vadd.f32 %v4858_v4, %v1664_v9  ;;  %v1594_v15 = vadd.f32 %v1561_v11, %v1523_v10  ;;  %v1232_v17 = vpop.f32.mrf.mxu1  ;;  %v1420_v18 = vld [vmem:[#allocation3 + $0x36] sm:$0xff]  ;;  %3770 = vmatprep.subr.mxu1 %v4091_v0 }
 0x27c   :  { %v1453_v20 = vld [vmem:[#allocation3 + $0x37] sm:$0xff]  ;;  %1390 = vst.msk [vmem:[#allocation3 + $0x48] sm:$0xff] %vm212_vm5, %v1358_v13  ;;  %v1233_v22 = vadd.f32 %v4836_v40, %v1232_v17  ;;  %v1524_v24 = vmul.f32 %v4847_v53, %v1420_v18 }
 0x27d   :  { %v1486_v21 = vld [vmem:[#allocation3 + $0x38] sm:$0xff]  ;;  %3562 = vmatmul.mubr.msk.f32.gmra.mxu1 %vm212_vm5, %v1704_v14  ;;  %v1665_v23 = vadd.f32 %v1632_v16, %v1594_v15  ;;  %v1562_v25 = vmul.f32 %v4849_v54, %v1453_v20  ;;  %v3471_v26 = vpop.f32.mrf.mxu1 }
 0x27e   :  { %3564 = vmatprep.mubr.msk.f32.mxu1 %vm4092_vm3, %v4091_v0  ;;  %v1359_v27 = vmax.f32 %v1233_v22, 0.0  ;;  %v1633_v30 = vmul.f32 %v4851_v56, %v1486_v21 }
 0x27f   :  { %v1705_v28 = vadd.f32 %v4858_v4, %v1665_v23  ;;  %v1595_v29 = vadd.f32 %v1562_v25, %v1524_v24  ;;  %v1237_v33 = vpop.f32.mrf.mxu1  ;;  %v1421_v35 = vld [vmem:[#allocation3 + $0x3e] sm:$0xff] }
 0x280   :  { %v1454_v36 = vld [vmem:[#allocation3 + $0x3f] sm:$0xff]  ;;  %1391 = vst.msk [vmem:[#allocation3 + $0x50] sm:$0xff] %vm212_vm5, %v1359_v27  ;;  %v1238_v31 = vadd.f32 %v4836_v40, %v1237_v33  ;;  %v1525_v32 = vmul.f32 %v4847_v53, %v1421_v35 }
 0x281   :  { %v1487_v38 = vld [vmem:[#allocation3 + $0x40] sm:$0xff]  ;;  %3565 = vmatmul.mubr.msk.f32.gmra.mxu1 %vm212_vm5, %v1705_v28  ;;  %v1666_v37 = vadd.f32 %v1633_v30, %v1595_v29  ;;  %v1563_v34 = vmul.f32 %v4849_v54, %v1454_v36  ;;  %v3474_v46 = vpop.f32.mrf.mxu1 }
 0x282   :  { %3567 = vmatprep.mubr.msk.f32.mxu1 %vm4092_vm3, %v4091_v0  ;;  %v1360_v41 = vmax.f32 %v1238_v31, 0.0  ;;  %v1634_v39 = vmul.f32 %v4851_v56, %v1487_v38 }
 0x283   :  { %v1706_v42 = vadd.f32 %v4858_v4, %v1666_v37  ;;  %v1596_v43 = vadd.f32 %v1563_v34, %v1525_v32  ;;  %v1242_v44 = vpop.f32.mrf.mxu1  ;;  %v1422_v45 = vld [vmem:[#allocation3 + $0x46] sm:$0xff] }
 0x284   :  { %v1455_v48 = vld [vmem:[#allocation3 + $0x47] sm:$0xff]  ;;  %1392 = vst.msk [vmem:[#allocation3 + $0x58] sm:$0xff] %vm212_vm5, %v1360_v41  ;;  %v1243_v50 = vadd.f32 %v4836_v40, %v1242_v44  ;;  %v1526_v52 = vmul.f32 %v4847_v53, %v1422_v45 }
 0x285   :  { %v1488_v49 = vld [vmem:[#allocation3 + $0x48] sm:$0xff]  ;;  %3568 = vmatmul.mubr.msk.f32.gmra.mxu1 %vm212_vm5, %v1706_v42  ;;  %v1667_v51 = vadd.f32 %v1634_v39, %v1596_v43  ;;  %v1564_v55 = vmul.f32 %v4849_v54, %v1455_v48  ;;  %v3477_v57 = vpop.f32.mrf.mxu1 }
 0x286   :  { %3570 = vmatprep.mubr.msk.f32.mxu1 %vm4092_vm3, %v4091_v0  ;;  %v1361_v58 = vmax.f32 %v1243_v50, 0.0  ;;  %v1635_v61 = vmul.f32 %v4851_v56, %v1488_v49 }
 0x287   :  { %v1707_v59 = vadd.f32 %v4858_v4, %v1667_v51  ;;  %v1597_v60 = vadd.f32 %v1564_v55, %v1526_v52  ;;  %v1247_v47 = vpop.f32.mrf.mxu1  ;;  %v1423_v62 = vld [vmem:[#allocation3 + $0x4e] sm:$0xff] }
 0x288   :  { %v1456_v19 = vld [vmem:[#allocation3 + $0x4f] sm:$0xff]  ;;  %1393 = vst.msk [vmem:[#allocation3 + $0x60] sm:$0xff] %vm212_vm5, %v1361_v58  ;;  %v1248_v1 = vadd.f32 %v4836_v40, %v1247_v47  ;;  %v1527_v3 = vmul.f32 %v4847_v53, %v1423_v62  ;;  %v1430_v62 = vld [vmem:[#allocation3 + $0x86] sm:$0xff] }
 0x289   :  { %v1489_v63 = vld [vmem:[#allocation3 + $0x50] sm:$0xff]  ;;  %3571 = vmatmul.mubr.msk.f32.gmra.mxu1 %vm212_vm5, %v1707_v59  ;;  %v1668_v2 = vadd.f32 %v1635_v61, %v1597_v60  ;;  %v1565_v5 = vmul.f32 %v4849_v54, %v1456_v19  ;;  %v3480_v6 = vpop.f32.mrf.mxu1  ;;  %v1463_v19 = vld [vmem:[#allocation3 + $0x87] sm:$0xff] }
 0x28a   :  { %3573 = vmatprep.mubr.msk.f32.mxu1 %vm4092_vm3, %v4091_v0  ;;  %v1362_v7 = vmax.f32 %v1248_v1, 0.0  ;;  %v1636_v10 = vmul.f32 %v4851_v56, %v1489_v63 }
 0x28b   :  { %v1708_v8 = vadd.f32 %v4858_v4, %v1668_v2  ;;  %v1598_v9 = vadd.f32 %v1565_v5, %v1527_v3  ;;  %v1252_v11 = vpop.f32.mrf.mxu1  ;;  %v1424_v12 = vld [vmem:[#allocation3 + $0x56] sm:$0xff] }
 0x28c   :  { %v1457_v13 = vld [vmem:[#allocation3 + $0x57] sm:$0xff]  ;;  %1394 = vst.msk [vmem:[#allocation3 + $0x68] sm:$0xff] %vm212_vm5, %v1362_v7  ;;  %v1253_v15 = vadd.f32 %v4836_v40, %v1252_v11  ;;  %v1528_v17 = vmul.f32 %v4847_v53, %v1424_v12 }
 0x28d   :  { %v1490_v14 = vld [vmem:[#allocation3 + $0x58] sm:$0xff]  ;;  %3574 = vmatmul.mubr.msk.f32.gmra.mxu1 %vm212_vm5, %v1708_v8  ;;  %v1669_v16 = vadd.f32 %v1636_v10, %v1598_v9  ;;  %v1566_v18 = vmul.f32 %v4849_v54, %v1457_v13  ;;  %v3483_v20 = vpop.f32.mrf.mxu1  ;;  %v1534_v9 = vmul.f32 %v4847_v53, %v1430_v62  ;;  %v1572_v10 = vmul.f32 %v4849_v54, %v1463_v19 }
 0x28e   :  { %3576 = vmatprep.mubr.msk.f32.mxu1 %vm4092_vm3, %v4091_v0  ;;  %v1363_v21 = vmax.f32 %v1253_v15, 0.0  ;;  %v1637_v24 = vmul.f32 %v4851_v56, %v1490_v14  ;;  %v1496_v15 = vld [vmem:[#allocation3 + $0x88] sm:$0xff] }
 0x28f   :  { %v1709_v22 = vadd.f32 %v4858_v4, %v1669_v16  ;;  %v1599_v23 = vadd.f32 %v1566_v18, %v1528_v17  ;;  %v1257_v25 = vpop.f32.mrf.mxu1  ;;  %v1425_v26 = vld [vmem:[#allocation3 + $0x5e] sm:$0xff] }
 0x290   :  { %v1458_v27 = vld [vmem:[#allocation3 + $0x5f] sm:$0xff]  ;;  %1395 = vst.msk [vmem:[#allocation3 + $0x70] sm:$0xff] %vm212_vm5, %v1363_v21  ;;  %v1258_v29 = vadd.f32 %v4836_v40, %v1257_v25  ;;  %v1529_v33 = vmul.f32 %v4847_v53, %v1425_v26  ;;  %v1605_v26 = vadd.f32 %v1572_v10, %v1534_v9 }
 0x291   :  { %v1491_v28 = vld [vmem:[#allocation3 + $0x60] sm:$0xff]  ;;  %3577 = vmatmul.mubr.msk.f32.gmra.mxu1 %vm212_vm5, %v1709_v22  ;;  %v1670_v30 = vadd.f32 %v1637_v24, %v1599_v23  ;;  %v1567_v35 = vmul.f32 %v4849_v54, %v1458_v27  ;;  %v3486_v36 = vpop.f32.mrf.mxu1  ;;  %v1643_v27 = vmul.f32 %v4851_v56, %v1496_v15 }
 0x292   :  { %3579 = vmatprep.mubr.msk.f32.mxu1 %vm4092_vm3, %v4091_v0  ;;  %v1364_v38 = vmax.f32 %v1258_v29, 0.0  ;;  %v1638_v32 = vmul.f32 %v4851_v56, %v1491_v28 }
 0x293   :  { %v1710_v31 = vadd.f32 %v4858_v4, %v1670_v30  ;;  %v1600_v37 = vadd.f32 %v1567_v35, %v1529_v33  ;;  %v1262_v34 = vpop.f32.mrf.mxu1  ;;  %v1426_v46 = vld [vmem:[#allocation3 + $0x66] sm:$0xff] }
 0x294   :  { %v1459_v41 = vld [vmem:[#allocation3 + $0x67] sm:$0xff]  ;;  %1396 = vst.msk [vmem:[#allocation3 + $0x78] sm:$0xff] %vm212_vm5, %v1364_v38  ;;  %v1263_v43 = vadd.f32 %v4836_v40, %v1262_v34  ;;  %v1530_v44 = vmul.f32 %v4847_v53, %v1426_v46 }
 0x295   :  { %v1492_v42 = vld [vmem:[#allocation3 + $0x68] sm:$0xff]  ;;  %3580 = vmatmul.mubr.msk.f32.gmra.mxu1 %vm212_vm5, %v1710_v31  ;;  %v1671_v39 = vadd.f32 %v1638_v32, %v1600_v37  ;;  %v1568_v45 = vmul.f32 %v4849_v54, %v1459_v41  ;;  %v3489_v48 = vpop.f32.mrf.mxu1  ;;  %v1676_v41 = vadd.f32 %v1643_v27, %v1605_v26 }
 0x296   :  { %3582 = vmatprep.mubr.msk.f32.mxu1 %vm4092_vm3, %v4091_v0  ;;  %v1365_v49 = vmax.f32 %v1263_v43, 0.0  ;;  %v1639_v52 = vmul.f32 %v4851_v56, %v1492_v42 }
 0x297   :  { %v1711_v50 = vadd.f32 %v4858_v4, %v1671_v39  ;;  %v1601_v51 = vadd.f32 %v1568_v45, %v1530_v44  ;;  %v1267_v55 = vpop.f32.mrf.mxu1  ;;  %v1427_v57 = vld [vmem:[#allocation3 + $0x6e] sm:$0xff] }
 0x298   :  { %v1460_v58 = vld [vmem:[#allocation3 + $0x6f] sm:$0xff]  ;;  %1397 = vst.msk [vmem:[#allocation3 + $0x80] sm:$0xf] %vm214_vm9, %v1365_v49  ;;  %v1531_v61 = vmul.f32 %v4847_v53, %v1427_v57 }
 0x299   :  { %v1493_v59 = vld [vmem:[#allocation3 + $0x70] sm:$0xff]  ;;  %3583 = vmatmul.mubr.msk.f32.gmra.mxu1 %vm212_vm5, %v1711_v50  ;;  %v1672_v60 = vadd.f32 %v1639_v52, %v1601_v51  ;;  %v1569_v47 = vmul.f32 %v4849_v54, %v1460_v58  ;;  %v3492_v63 = vpop.f32.mrf.mxu1  ;;  %v1716_v51 = vadd.f32 %v4858_v4, %v1676_v41 }
 0x29a   :  { %3585 = vmatprep.mubr.msk.f32.mxu1 %vm4092_vm3, %v4091_v0  ;;  %v1640_v3 = vmul.f32 %v4851_v56, %v1493_v59 }
 0x29b   :  { %v1712_v1 = vadd.f32 %v4858_v4, %v1672_v60  ;;  %v1602_v2 = vadd.f32 %v1569_v47, %v1531_v61  ;;  %v1271_v5 = vpop.f32.mrf.mxu1  ;;  %v1428_v6 = vld [vmem:[#allocation3 + $0x76] sm:$0xff] }
 0x29c   :  { %v1461_v7 = vld [vmem:[#allocation3 + $0x77] sm:$0xff]  ;;  %v1272_v11 = vadd.f32 %v4836_v40, %v1271_v5  ;;  %v1532_v13 = vmul.f32 %v4847_v53, %v1428_v6 }
 0x29d   :  { %v1494_v8 = vld [vmem:[#allocation3 + $0x78] sm:$0xff]  ;;  %3586 = vmatmul.mubr.msk.f32.gmra.mxu1 %vm212_vm5, %v1712_v1  ;;  %v1673_v12 = vadd.f32 %v1640_v3, %v1602_v2  ;;  %v1570_v14 = vmul.f32 %v4849_v54, %v1461_v7  ;;  %v3495_v16 = vpop.f32.mrf.mxu1 }
 0x29e   :  { %3588 = vmatprep.mubr.msk.f32.mxu1 %vm4092_vm3, %v4091_v0  ;;  %v1366_v17 = vmax.f32 %v1272_v11, 0.0  ;;  %v1641_v21 = vmul.f32 %v4851_v56, %v1494_v8 }
 0x29f   :  { %v1713_v18 = vadd.f32 %v4858_v4, %v1673_v12  ;;  %v1603_v20 = vadd.f32 %v1570_v14, %v1532_v13  ;;  %v1276_v22 = vpop.f32.mrf.mxu1  ;;  %v1429_v23 = vld [vmem:[#allocation3 + $0x7e] sm:$0xff] }
 0x2a0   :  { %v1462_v24 = vld [vmem:[#allocation3 + $0x7f] sm:$0xff]  ;;  %1398 = vst.msk [vmem:[#allocation3 + $0x90] sm:$0xff] %vm212_vm5, %v1366_v17  ;;  %v1277_v28 = vadd.f32 %v4836_v40, %v1276_v22  ;;  %v1533_v30 = vmul.f32 %v4847_v53, %v1429_v23 }
 0x2a1   :  { %v1495_v25 = vld [vmem:[#allocation3 + $0x80] sm:$0xff]  ;;  %3589 = vmatmul.mubr.msk.f32.gmra.mxu1 %vm212_vm5, %v1713_v18  ;;  %v1674_v29 = vadd.f32 %v1641_v21, %v1603_v20  ;;  %v1571_v33 = vmul.f32 %v4849_v54, %v1462_v24  ;;  %v3498_v35 = vpop.f32.mrf.mxu1 }
 0x2a2   :  { %3591 = vmatprep.mubr.msk.f32.mxu1 %vm4092_vm3, %v4091_v0  ;;  %v1367_v36 = vmax.f32 %v1277_v28, 0.0  ;;  %v1642_v37 = vmul.f32 %v4851_v56, %v1495_v25 }
 0x2a3   :  { %v1714_v38 = vadd.f32 %v4858_v4, %v1674_v29  ;;  %v1604_v31 = vadd.f32 %v1571_v33, %v1533_v30  ;;  %v1281_v32 = vpop.f32.mrf.mxu1 }
 0x2a4   :  { %1399 = vst.msk [vmem:[#allocation3 + $0x98] sm:$0xff] %vm212_vm5, %v1367_v36  ;;  %v1282_v34 = vadd.f32 %v4836_v40, %v1281_v32 }
 0x2a5   :  { %3592 = vmatmul.mubr.msk.f32.gmra.mxu1 %vm212_vm5, %v1714_v38  ;;  %v1675_v46 = vadd.f32 %v1642_v37, %v1604_v31  ;;  %v3501_v42 = vpop.f32.mrf.mxu1 }
 0x2a6   :  { %3594 = vmatprep.mubr.msk.f32.mxu1 %vm4092_vm3, %v4091_v0  ;;  %v1368_v43 = vmax.f32 %v1282_v34, 0.0 }
 0x2a7   :  { %v1715_v39 = vadd.f32 %v4858_v4, %v1675_v46  ;;  %v1286_v44 = vpop.f32.mrf.mxu1  ;;  %v1431_v45 = vld [vmem:[#allocation3 + $0x8e] sm:$0xff] }
 0x2a8   :  { %v1464_v48 = vld [vmem:[#allocation3 + $0x8f] sm:$0xff]  ;;  %1400 = vst.msk [vmem:[#allocation3 + $0xa0] sm:$0xff] %vm212_vm5, %v1368_v43  ;;  %v1287_v50 = vadd.f32 %v4836_v40, %v1286_v44  ;;  %v1535_v52 = vmul.f32 %v4847_v53, %v1431_v45 }
 0x2a9   :  { %v1497_v49 = vld [vmem:[#allocation3 + $0x90] sm:$0xff]  ;;  %3595 = vmatmul.mubr.msk.f32.gmra.mxu1 %vm212_vm5, %v1715_v39  ;;  %v1573_v55 = vmul.f32 %v4849_v54, %v1464_v48  ;;  %v3504_v57 = vpop.f32.mrf.mxu1 }
 0x2aa   :  { %3597 = vmatprep.mubr.msk.f32.mxu1 %vm4092_vm3, %v4091_v0  ;;  %v1369_v58 = vmax.f32 %v1287_v50, 0.0  ;;  %v1644_v60 = vmul.f32 %v4851_v56, %v1497_v49 }
 0x2ab   :  { %v1606_v59 = vadd.f32 %v1573_v55, %v1535_v52  ;;  %v1291_v61 = vpop.f32.mrf.mxu1  ;;  %v1432_v47 = vld [vmem:[#allocation3 + $0x96] sm:$0xff] }
 0x2ac   :  { %v1465_v62 = vld [vmem:[#allocation3 + $0x97] sm:$0xff]  ;;  %1401 = vst.msk [vmem:[#allocation3 + $0xa8] sm:$0xff] %vm212_vm5, %v1369_v58  ;;  %v1292_v63 = vadd.f32 %v4836_v40, %v1291_v61  ;;  %v1536_v2 = vmul.f32 %v4847_v53, %v1432_v47 }
 0x2ad   :  { %v1498_v19 = vld [vmem:[#allocation3 + $0x98] sm:$0xff]  ;;  %3598 = vmatmul.mubr.msk.f32.gmra.mxu1 %vm212_vm5, %v1716_v51  ;;  %v1677_v1 = vadd.f32 %v1644_v60, %v1606_v59  ;;  %v1574_v3 = vmul.f32 %v4849_v54, %v1465_v62  ;;  %v3507_v5 = vpop.f32.mrf.mxu1 }
 0x2ae   :  { %3600 = vmatprep.mubr.msk.f32.mxu1 %vm4092_vm3, %v4091_v0  ;;  %v1370_v6 = vmax.f32 %v1292_v63, 0.0  ;;  %v1645_v9 = vmul.f32 %v4851_v56, %v1498_v19  ;;  %v2456_v19 = vld [vmem:[#allocation22] sm:$0xff] }
 0x2af   :  { %v1717_v7 = vadd.f32 %v4858_v4, %v1677_v1  ;;  %v1607_v8 = vadd.f32 %v1574_v3, %v1536_v2  ;;  %v1296_v10 = vpop.f32.mrf.mxu1  ;;  %v1433_v11 = vld [vmem:[#allocation3 + $0x9e] sm:$0xff]  ;;  %3663 = vmatpush3.msra.mxu0 %v2456_v19  ;;  %3778 = vmatpush3.msra.mxu1 %v2456_v19 }
 0x2b0   :  { %v1466_v12 = vld [vmem:[#allocation3 + $0x9f] sm:$0xff]  ;;  %1402 = vst.msk [vmem:[#allocation3 + $0xb0] sm:$0xff] %vm212_vm5, %v1370_v6  ;;  %v1297_v14 = vadd.f32 %v4836_v40, %v1296_v10  ;;  %v1537_v16 = vmul.f32 %v4847_v53, %v1433_v11 }
 0x2b1   :  { %v1499_v13 = vld [vmem:[#allocation3 + $0xa0] sm:$0xff]  ;;  %3601 = vmatmul.mubr.msk.f32.gmra.mxu1 %vm212_vm5, %v1717_v7  ;;  %v1678_v15 = vadd.f32 %v1645_v9, %v1607_v8  ;;  %v1575_v17 = vmul.f32 %v4849_v54, %v1466_v12  ;;  %v3510_v18 = vpop.f32.mrf.mxu1 }
 0x2b2   :  { %3603 = vmatprep.mubr.msk.f32.mxu1 %vm4092_vm3, %v4091_v0  ;;  %v1371_v20 = vmax.f32 %v1297_v14, 0.0  ;;  %v1646_v23 = vmul.f32 %v4851_v56, %v1499_v13 }
 0x2b3   :  { %v1718_v21 = vadd.f32 %v4858_v4, %v1678_v15  ;;  %v1608_v22 = vadd.f32 %v1575_v17, %v1537_v16  ;;  %v1301_v24 = vpop.f32.mrf.mxu1  ;;  %v1434_v25 = vld [vmem:[#allocation3 + $0xa6] sm:$0xff] }
 0x2b4   :  { %v1467_v26 = vld [vmem:[#allocation3 + $0xa7] sm:$0xff]  ;;  %1403 = vst.msk [vmem:[#allocation3 + $0xb8] sm:$0xff] %vm212_vm5, %v1371_v20  ;;  %v1302_v28 = vadd.f32 %v4836_v40, %v1301_v24  ;;  %v1538_v30 = vmul.f32 %v4847_v53, %v1434_v25 }
 0x2b5   :  { %v1500_v27 = vld [vmem:[#allocation3 + $0xa8] sm:$0xff]  ;;  %3604 = vmatmul.mubr.msk.f32.gmra.mxu1 %vm212_vm5, %v1718_v21  ;;  %v1679_v29 = vadd.f32 %v1646_v23, %v1608_v22  ;;  %v1576_v33 = vmul.f32 %v4849_v54, %v1467_v26  ;;  %v3513_v35 = vpop.f32.mrf.mxu1 }
 0x2b6   :  { %3606 = vmatprep.mubr.msk.f32.mxu1 %vm4092_vm3, %v4091_v0  ;;  %v1372_v36 = vmax.f32 %v1302_v28, 0.0  ;;  %v1647_v37 = vmul.f32 %v4851_v56, %v1500_v27 }
 0x2b7   :  { %v1719_v38 = vadd.f32 %v4858_v4, %v1679_v29  ;;  %v1609_v31 = vadd.f32 %v1576_v33, %v1538_v30  ;;  %v1306_v32 = vpop.f32.mrf.mxu1  ;;  %v1435_v34 = vld [vmem:[#allocation3 + $0xae] sm:$0xff] }
 0x2b8   :  { %v1468_v46 = vld [vmem:[#allocation3 + $0xaf] sm:$0xff]  ;;  %1404 = vst.msk [vmem:[#allocation3 + $0xc0] sm:$0xff] %vm212_vm5, %v1372_v36  ;;  %v1307_v42 = vadd.f32 %v4836_v40, %v1306_v32  ;;  %v1539_v39 = vmul.f32 %v4847_v53, %v1435_v34 }
 0x2b9   :  { %v1501_v41 = vld [vmem:[#allocation3 + $0xb0] sm:$0xff]  ;;  %3607 = vmatmul.mubr.msk.f32.gmra.mxu1 %vm212_vm5, %v1719_v38  ;;  %v1680_v43 = vadd.f32 %v1647_v37, %v1609_v31  ;;  %v1577_v44 = vmul.f32 %v4849_v54, %v1468_v46  ;;  %v3516_v45 = vpop.f32.mrf.mxu1 }
 0x2ba   :  { %3609 = vmatprep.mubr.msk.f32.mxu1 %vm4092_vm3, %v4091_v0  ;;  %v1373_v48 = vmax.f32 %v1307_v42, 0.0  ;;  %v1648_v51 = vmul.f32 %v4851_v56, %v1501_v41 }
 0x2bb   :  { %v1720_v49 = vadd.f32 %v4858_v4, %v1680_v43  ;;  %v1610_v50 = vadd.f32 %v1577_v44, %v1539_v39  ;;  %v1311_v52 = vpop.f32.mrf.mxu1  ;;  %v1436_v55 = vld [vmem:[#allocation3 + $0xb6] sm:$0xff] }
 0x2bc   :  { %v1469_v57 = vld [vmem:[#allocation3 + $0xb7] sm:$0xff]  ;;  %1405 = vst.msk [vmem:[#allocation3 + $0xc8] sm:$0xff] %vm212_vm5, %v1373_v48  ;;  %v1312_v59 = vadd.f32 %v4836_v40, %v1311_v52  ;;  %v1540_v61 = vmul.f32 %v4847_v53, %v1436_v55 }
 0x2bd   :  { %v1502_v58 = vld [vmem:[#allocation3 + $0xb8] sm:$0xff]  ;;  %3610 = vmatmul.mubr.msk.f32.gmra.mxu1 %vm212_vm5, %v1720_v49  ;;  %v1681_v60 = vadd.f32 %v1648_v51, %v1610_v50  ;;  %v1578_v47 = vmul.f32 %v4849_v54, %v1469_v57  ;;  %v3519_v62 = vpop.f32.mrf.mxu1 }
 0x2be   :  { %3612 = vmatprep.mubr.msk.f32.mxu1 %vm4092_vm3, %v4091_v0  ;;  %v1374_v63 = vmax.f32 %v1312_v59, 0.0  ;;  %v1649_v3 = vmul.f32 %v4851_v56, %v1502_v58 }
 0x2bf   :  { %v1721_v1 = vadd.f32 %v4858_v4, %v1681_v60  ;;  %v1611_v2 = vadd.f32 %v1578_v47, %v1540_v61  ;;  %v1316_v5 = vpop.f32.mrf.mxu1  ;;  %v1437_v6 = vld [vmem:[#allocation3 + $0xbe] sm:$0xff] }
 0x2c0   :  { %v1470_v7 = vld [vmem:[#allocation3 + $0xbf] sm:$0xff]  ;;  %1406 = vst.msk [vmem:[#allocation3 + $0xd0] sm:$0xff] %vm212_vm5, %v1374_v63  ;;  %v1317_v9 = vadd.f32 %v4836_v40, %v1316_v5  ;;  %v1541_v11 = vmul.f32 %v4847_v53, %v1437_v6 }
 0x2c1   :  { %v1503_v8 = vld [vmem:[#allocation3 + $0xc0] sm:$0xff]  ;;  %3613 = vmatmul.mubr.msk.f32.gmra.mxu1 %vm212_vm5, %v1721_v1  ;;  %v1682_v10 = vadd.f32 %v1649_v3, %v1611_v2  ;;  %v1579_v12 = vmul.f32 %v4849_v54, %v1470_v7  ;;  %v3522_v13 = vpop.f32.mrf.mxu1 }
 0x2c2   :  { %3615 = vmatprep.mubr.msk.f32.mxu1 %vm4092_vm3, %v4091_v0  ;;  %v1375_v14 = vmax.f32 %v1317_v9, 0.0  ;;  %v1650_v17 = vmul.f32 %v4851_v56, %v1503_v8 }
 0x2c3   :  { %v1722_v15 = vadd.f32 %v4858_v4, %v1682_v10  ;;  %v1612_v16 = vadd.f32 %v1579_v12, %v1541_v11  ;;  %v1321_v18 = vpop.f32.mrf.mxu1  ;;  %v1438_v20 = vld [vmem:[#allocation3 + $0xc6] sm:$0xff] }
 0x2c4   :  { %v1471_v21 = vld [vmem:[#allocation3 + $0xc7] sm:$0xff]  ;;  %1407 = vst.msk [vmem:[#allocation3 + $0xd8] sm:$0xff] %vm212_vm5, %v1375_v14  ;;  %v1322_v23 = vadd.f32 %v4836_v40, %v1321_v18  ;;  %v1542_v25 = vmul.f32 %v4847_v53, %v1438_v20 }
 0x2c5   :  { %v1504_v22 = vld [vmem:[#allocation3 + $0xc8] sm:$0xff]  ;;  %3616 = vmatmul.mubr.msk.f32.gmra.mxu1 %vm212_vm5, %v1722_v15  ;;  %v1683_v24 = vadd.f32 %v1650_v17, %v1612_v16  ;;  %v1580_v26 = vmul.f32 %v4849_v54, %v1471_v21  ;;  %v3525_v27 = vpop.f32.mrf.mxu1 }
 0x2c6   :  { %3618 = vmatprep.mubr.msk.f32.mxu1 %vm4092_vm3, %v4091_v0  ;;  %v1376_v28 = vmax.f32 %v1322_v23, 0.0  ;;  %v1651_v33 = vmul.f32 %v4851_v56, %v1504_v22 }
 0x2c7   :  { %v1723_v29 = vadd.f32 %v4858_v4, %v1683_v24  ;;  %v1613_v30 = vadd.f32 %v1580_v26, %v1542_v25  ;;  %v1326_v35 = vpop.f32.mrf.mxu1  ;;  %v1439_v36 = vld [vmem:[#allocation3 + $0xce] sm:$0xff] }
 0x2c8   :  { %v1472_v38 = vld [vmem:[#allocation3 + $0xcf] sm:$0xff]  ;;  %1408 = vst.msk [vmem:[#allocation3 + $0xe0] sm:$0xff] %vm212_vm5, %v1376_v28  ;;  %v1327_v37 = vadd.f32 %v4836_v40, %v1326_v35  ;;  %v1543_v34 = vmul.f32 %v4847_v53, %v1439_v36 }
 0x2c9   :  { %v1505_v31 = vld [vmem:[#allocation3 + $0xd0] sm:$0xff]  ;;  %3619 = vmatmul.mubr.msk.f32.gmra.mxu1 %vm212_vm5, %v1723_v29  ;;  %v1684_v32 = vadd.f32 %v1651_v33, %v1613_v30  ;;  %v1581_v46 = vmul.f32 %v4849_v54, %v1472_v38  ;;  %v3528_v41 = vpop.f32.mrf.mxu1  ;;  %v3797_v29 = vld [vmem:[#allocation12] ss:$0 sm:$0xff] }
 0x2ca   :  { %3621 = vmatprep.mubr.msk.f32.mxu1 %vm4092_vm3, %v4091_v0  ;;  %v1377_v42 = vmax.f32 %v1327_v37, 0.0  ;;  %v1652_v44 = vmul.f32 %v4851_v56, %v1505_v31 }
 0x2cb   :  { %v1724_v43 = vadd.f32 %v4858_v4, %v1684_v32  ;;  %v1614_v39 = vadd.f32 %v1581_v46, %v1543_v34  ;;  %v1331_v45 = vpop.f32.mrf.mxu1  ;;  %v1440_v48 = vld [vmem:[#allocation3 + $0xd6] sm:$0xff] }
 0x2cc   :  { %v1473_v49 = vld [vmem:[#allocation3 + $0xd7] sm:$0xff]  ;;  %1409 = vst.msk [vmem:[#allocation3 + $0xe8] sm:$0xff] %vm212_vm5, %v1377_v42  ;;  %v1332_v51 = vadd.f32 %v4836_v40, %v1331_v45  ;;  %v1544_v55 = vmul.f32 %v4847_v53, %v1440_v48 }
 0x2cd   :  { %v1506_v50 = vld [vmem:[#allocation3 + $0xd8] sm:$0xff]  ;;  %3622 = vmatmul.mubr.msk.f32.gmra.mxu1 %vm212_vm5, %v1724_v43  ;;  %v1685_v52 = vadd.f32 %v1652_v44, %v1614_v39  ;;  %v1582_v57 = vmul.f32 %v4849_v54, %v1473_v49  ;;  %v3531_v58 = vpop.f32.mrf.mxu1 }
 0x2ce   :  { %3624 = vmatprep.mubr.msk.f32.mxu1 %vm4092_vm3, %v4091_v0  ;;  %v1378_v59 = vmax.f32 %v1332_v51, 0.0  ;;  %v1653_v47 = vmul.f32 %v4851_v56, %v1506_v50  ;;  %v3798_v43 = vld [vmem:[#allocation13] ss:$0 sm:$0xff]  ;;  %v3799_v39 = vld [vmem:[#allocation13 + $0x1] ss:$0 sm:$0xff] }
 0x2cf   :  { %v1725_v60 = vadd.f32 %v4858_v4, %v1685_v52  ;;  %v1615_v61 = vadd.f32 %v1582_v57, %v1544_v55  ;;  %v1336_v62 = vpop.f32.mrf.mxu1  ;;  %v1441_v19 = vld [vmem:[#allocation3 + $0xde] sm:$0xff]  ;;  %v3800_v49 = vld [vmem:[#allocation13 + $0x2] ss:$0 sm:$0xff] }
 0x2d0   :  { %v1474_v63 = vld [vmem:[#allocation3 + $0xdf] sm:$0xff]  ;;  %1410 = vst.msk [vmem:[#allocation3 + $0xf0] sm:$0xff] %vm212_vm5, %v1378_v59  ;;  %v1337_v2 = vadd.f32 %v4836_v40, %v1336_v62  ;;  %v1545_v5 = vmul.f32 %v4847_v53, %v1441_v19  ;;  %v3801_v59 = vld [vmem:[#allocation15] ss:$0 sm:$0xff] }
 0x2d1   :  { %v1507_v1 = vld [vmem:[#allocation3 + $0xe0] sm:$0xff]  ;;  %3625 = vmatmul.mubr.msk.f32.gmra.mxu1 %vm212_vm5, %v1725_v60  ;;  %v1686_v3 = vadd.f32 %v1653_v47, %v1615_v61  ;;  %v1583_v6 = vmul.f32 %v4849_v54, %v1474_v63  ;;  %v3534_v7 = vpop.f32.mrf.mxu1 }
 0x2d2   :  { %3627 = vmatprep.mubr.msk.f32.mxu1 %vm4092_vm3, %v4091_v0  ;;  %v1379_v8 = vmax.f32 %v1337_v2, 0.0  ;;  %v1654_v11 = vmul.f32 %v4851_v56, %v1507_v1 }
 0x2d3   :  { %v1726_v9 = vadd.f32 %v4858_v4, %v1686_v3  ;;  %v1616_v10 = vadd.f32 %v1583_v6, %v1545_v5  ;;  %v1341_v12 = vpop.f32.mrf.mxu1  ;;  %v1442_v13 = vld [vmem:[#allocation3 + $0xe6] sm:$0xff] }
 0x2d4   :  { %v1475_v14 = vld [vmem:[#allocation3 + $0xe7] sm:$0xff]  ;;  %1411 = vst.msk [vmem:[#allocation3 + $0xf8] sm:$0xff] %vm212_vm5, %v1379_v8  ;;  %v1342_v16 = vadd.f32 %v4836_v40, %v1341_v12  ;;  %v1546_v18 = vmul.f32 %v4847_v53, %v1442_v13 }
 0x2d5   :  { %v1508_v15 = vld [vmem:[#allocation3 + $0xe8] sm:$0xff]  ;;  %3628 = vmatmul.mubr.msk.f32.gmra.mxu1 %vm212_vm5, %v1726_v9  ;;  %v1687_v17 = vadd.f32 %v1654_v11, %v1616_v10  ;;  %v1584_v20 = vmul.f32 %v4849_v54, %v1475_v14  ;;  %v3537_v21 = vpop.f32.mrf.mxu1  ;;  %v5168_v9 = vld [vmem:[#allocation18] ss:$0 sm:$0xff] }
 0x2d6   :  { %3630 = vmatprep.mubr.msk.f32.mxu1 %vm4092_vm3, %v4091_v0  ;;  %v1380_v22 = vmax.f32 %v1342_v16, 0.0  ;;  %v1655_v25 = vmul.f32 %v4851_v56, %v1508_v15 }
 0x2d7   :  { %v1727_v23 = vadd.f32 %v4858_v4, %v1687_v17  ;;  %v1617_v24 = vadd.f32 %v1584_v20, %v1546_v18  ;;  %v1346_v26 = vpop.f32.mrf.mxu1  ;;  %v1443_v27 = vld [vmem:[#allocation3 + $0xee] sm:$0xff] }
 0x2d8   :  { %v1476_v40 = vld [vmem:[#allocation3 + $0xef] sm:$0xff]  ;;  %1412 = vst.msk [vmem:[#allocation3 + $0x100] sm:$0xff] %vm212_vm5, %v1380_v22  ;;  %v1347_v30 = vadd.f32 %v3797_v29, %v1346_v26  ;;  %v1547_v35 = vmul.f32 %v4847_v53, %v1443_v27  ;;  %v5175_v22 = vld [vmem:[#allocation19] ss:$0 sm:$0xff] }
 0x2d9   :  { %v1509_v28 = vld [vmem:[#allocation3 + $0xf0] sm:$0xff]  ;;  %3631 = vmatmul.mubr.msk.f32.gmra.mxu1 %vm212_vm5, %v1727_v23  ;;  %v1688_v33 = vadd.f32 %v1655_v25, %v1617_v24  ;;  %v1585_v36 = vmul.f32 %v4849_v54, %v1476_v40  ;;  %v3540_v38 = vpop.f32.mrf.mxu1  ;;  %v5177_v23 = vld [vmem:[#allocation19 + $0x1] ss:$0 sm:$0xff]  ;;  %v5179_v25 = vld [vmem:[#allocation19 + $0x2] ss:$0 sm:$0xff] }
 0x2da   :  { %3633 = vmatprep.mubr.msk.f32.mxu1 %vm4092_vm3, %v4091_v0  ;;  %v1381_v31 = vmax.f32 %v1347_v30, 0.0  ;;  %v1656_v34 = vmul.f32 %v4851_v56, %v1509_v28 }
 0x2db   :  { %v1728_v37 = vadd.f32 %v4858_v4, %v1688_v33  ;;  %v1618_v32 = vadd.f32 %v1585_v36, %v1547_v35  ;;  %v1444_v46 = vld [vmem:[#allocation3 + $0xf6] sm:$0xff] }
 0x2dc   :  { %v1477_v41 = vld [vmem:[#allocation3 + $0xf7] sm:$0xff]  ;;  %1413 = vst.msk [vmem:[#allocation3 + $0x108] sm:$0xf] %vm214_vm9, %v1381_v31  ;;  %v1548_v54 = vmul.f32 %v3798_v43, %v1444_v46 }
 0x2dd   :  { %v1510_v42 = vld [vmem:[#allocation3 + $0xf8] sm:$0xff]  ;;  %3634 = vmatmul.mubr.msk.f32.gmra.mxu1 %vm212_vm5, %v1728_v37  ;;  %v1689_v53 = vadd.f32 %v1656_v34, %v1618_v32  ;;  %v1586_v44 = vmul.f32 %v3799_v39, %v1477_v41  ;;  %v5186_v37 = vld [vmem:[#allocation21] ss:$0 sm:$0xff] }
 0x2de   :  { %3636 = vmatprep.mubr.msk.f32.mxu1 %vm4092_vm3, %v4091_v0  ;;  %v1657_v56 = vmul.f32 %v3800_v49, %v1510_v42 }
 0x2df   :  { %v1729_v45 = vadd.f32 %v4858_v4, %v1689_v53  ;;  %v1619_v48 = vadd.f32 %v1586_v44, %v1548_v54  ;;  %v1445_v50 = vld [vmem:[#allocation3 + $0xfe] sm:$0xff] }
 0x2e0   :  { %v1478_v51 = vld [vmem:[#allocation3 + $0xff] sm:$0xff]  ;;  %v1549_v57 = vmul.f32 %v3798_v43, %v1445_v50 }
 0x2e1   :  { %v1511_v52 = vld [vmem:[#allocation3 + $0x100] sm:$0xff]  ;;  %3637 = vmatmul.mubr.msk.f32.gmra.mxu1 %vm212_vm5, %v1729_v45  ;;  %v1690_v55 = vadd.f32 %v1657_v56, %v1619_v48  ;;  %v1587_v58 = vmul.f32 %v3799_v39, %v1478_v51 }
 0x2e2   :  { %3639 = vmatprep.mubr.msk.f32.mxu1 %vm4092_vm3, %v4091_v0  ;;  %v1658_v47 = vmul.f32 %v3800_v49, %v1511_v52 }
 0x2e3   :  { %v1730_v60 = vadd.f32 %v3801_v59, %v1690_v55  ;;  %v1620_v61 = vadd.f32 %v1587_v58, %v1549_v57  ;;  %v1446_v62 = vld [vmem:[#allocation3 + $0x106] sm:$0x3f] }
 0x2e4   :  { %v1479_v4 = vld [vmem:[#allocation3 + $0x107] sm:$0x3f]  ;;  %v1550_v1 = vmul.f32 %v3798_v43, %v1446_v62 }
 0x2e5   :  { %v1512_v19 = vld [vmem:[#allocation3 + $0x108] sm:$0x3f]  ;;  %3640 = vmatmul.mubr.msk.f32.gmra.mxu1 %vm212_vm5, %v1730_v60  ;;  %v1691_v63 = vadd.f32 %v1658_v47, %v1620_v61  ;;  %v1588_v2 = vmul.f32 %v3799_v39, %v1479_v4 }
 0x2e6   :  { %3642 = vmatprep.mubr.msk.f32.mxu1 %vm4092_vm3, %v4091_v0  ;;  %v1659_v6 = vmul.f32 %v3800_v49, %v1512_v19 }
 0x2e7   :  { %v1731_v3 = vadd.f32 %v3801_v59, %v1691_v63  ;;  %v1621_v5 = vadd.f32 %v1588_v2, %v1550_v1 }
 0x2e9   :  { %3643 = vmatmul.mubr.msk.f32.gmra.mxu1 %vm212_vm5, %v1731_v3  ;;  %v1692_v7 = vadd.f32 %v1659_v6, %v1621_v5 }
 0x2ea   :  { %3645 = vmatprep.mubr.msk.f32.mxu1 %vm4092_vm3, %v4091_v0 }
 0x2eb   :  { %v1732_v8 = vadd.f32 %v3801_v59, %v1692_v7 }
 0x2ed   :  { %3646 = vmatmul.mubr.msk.f32.gmra.mxu1 %vm212_vm5, %v1732_v8 }
 0x2ee   :  { %3757 = vmatprep.mubr.msk.f32.mxu1 %vm4092_vm3, %v4091_v0 }
 0x32d   :  { %v1909_v10 = vpop.f32.mrf.mxu1 }
 0x32e   :  { %v1910_v11 = vadd.f32 %v5168_v9, %v1909_v10 }
 0x32f   :  { %v3551_v12 = vpop.f32.mrf.mxu1 }
 0x330   :  { %v2072_v13 = vmax.f32 %v1910_v11, 0.0 }
 0x331   :  { %v1914_v14 = vpop.f32.mrf.mxu1 }
 0x332   :  { %2104 = vst.msk [vmem:[#allocation4 + $0x8] sm:$0xff] %vm218_vm10, %v2072_v13  ;;  %v1915_v15 = vadd.f32 %v5168_v9, %v1914_v14 }
 0x333   :  { %v3554_v16 = vpop.f32.mrf.mxu1 }
 0x334   :  { %v2073_v17 = vmax.f32 %v1915_v15, 0.0 }
 0x335   :  { %v1919_v18 = vpop.f32.mrf.mxu1 }
 0x336   :  { %2105 = vst.msk [vmem:[#allocation4 + $0x10] sm:$0xff] %vm218_vm10, %v2073_v17  ;;  %v1920_v20 = vadd.f32 %v5168_v9, %v1919_v18 }
 0x337   :  { %v3557_v21 = vpop.f32.mrf.mxu1 }
 0x338   :  { %v2074_v24 = vmax.f32 %v1920_v20, 0.0 }
 0x339   :  { %v1924_v26 = vpop.f32.mrf.mxu1  ;;  %v2137_v27 = vld [vmem:[#allocation4 + $0x6] sm:$0xff] }
 0x33a   :  { %v2170_v40 = vld [vmem:[#allocation4 + $0x7] sm:$0xff]  ;;  %2106 = vst.msk [vmem:[#allocation4 + $0x18] sm:$0xff] %vm218_vm10, %v2074_v24  ;;  %v1925_v29 = vadd.f32 %v5168_v9, %v1924_v26  ;;  %v2241_v30 = vmul.f32 %v5175_v22, %v2137_v27 }
 0x33b   :  { %v2203_v28 = vld [vmem:[#allocation4 + $0x8] sm:$0xff]  ;;  %v2279_v33 = vmul.f32 %v5177_v23, %v2170_v40  ;;  %v3560_v35 = vpop.f32.mrf.mxu1 }
 0x33c   :  { %v2075_v36 = vmax.f32 %v1925_v29, 0.0  ;;  %v2350_v31 = vmul.f32 %v5179_v25, %v2203_v28 }
 0x33d   :  { %v2312_v38 = vadd.f32 %v2279_v33, %v2241_v30  ;;  %v1929_v32 = vpop.f32.mrf.mxu1  ;;  %v2138_v34 = vld [vmem:[#allocation4 + $0xe] sm:$0xff] }
 0x33e   :  { %v2171_v46 = vld [vmem:[#allocation4 + $0xf] sm:$0xff]  ;;  %2107 = vst.msk [vmem:[#allocation4 + $0x20] sm:$0xff] %vm218_vm10, %v2075_v36  ;;  %v1930_v42 = vadd.f32 %v5168_v9, %v1929_v32  ;;  %v2242_v43 = vmul.f32 %v5175_v22, %v2138_v34 }
 0x33f   :  { %v2204_v41 = vld [vmem:[#allocation4 + $0x10] sm:$0xff]  ;;  %v2383_v53 = vadd.f32 %v2350_v31, %v2312_v38  ;;  %v2280_v54 = vmul.f32 %v5177_v23, %v2171_v46  ;;  %v3563_v39 = vpop.f32.mrf.mxu1 }
 0x340   :  { %v2076_v44 = vmax.f32 %v1930_v42, 0.0  ;;  %v2351_v49 = vmul.f32 %v5179_v25, %v2204_v41 }
 0x341   :  { %v2423_v45 = vadd.f32 %v5186_v37, %v2383_v53  ;;  %v2313_v48 = vadd.f32 %v2280_v54, %v2242_v43  ;;  %v1934_v56 = vpop.f32.mrf.mxu1  ;;  %v2139_v50 = vld [vmem:[#allocation4 + $0x16] sm:$0xff] }
 0x342   :  { %v2172_v51 = vld [vmem:[#allocation4 + $0x17] sm:$0xff]  ;;  %2108 = vst.msk [vmem:[#allocation4 + $0x28] sm:$0xff] %vm218_vm10, %v2076_v44  ;;  %v1935_v55 = vadd.f32 %v5168_v9, %v1934_v56  ;;  %v2243_v58 = vmul.f32 %v5175_v22, %v2139_v50 }
 0x343   :  { %v2205_v52 = vld [vmem:[#allocation4 + $0x18] sm:$0xff]  ;;  %3665 = vmatmul.mubr.msk.f32.vlgmr.msra.gmra.mxu0 %vm218_vm10, %v2423_v45  ;;  %v2384_v57 = vadd.f32 %v2351_v49, %v2313_v48  ;;  %v2281_v59 = vmul.f32 %v5177_v23, %v2172_v51  ;;  %v3566_v60 = vpop.f32.mrf.mxu1 }
 0x344   :  { %3667 = vmatprep.mubr.msk.f32.mxu0 %vm4092_vm3, %v4091_v0  ;;  %v2077_v61 = vmax.f32 %v1935_v55, 0.0  ;;  %v2352_v4 = vmul.f32 %v5179_v25, %v2205_v52 }
 0x345   :  { %v2424_v47 = vadd.f32 %v5186_v37, %v2384_v57  ;;  %v2314_v62 = vadd.f32 %v2281_v59, %v2243_v58  ;;  %v1939_v19 = vpop.f32.mrf.mxu1  ;;  %v2140_v63 = vld [vmem:[#allocation4 + $0x1e] sm:$0xff] }
 0x346   :  { %v2173_v1 = vld [vmem:[#allocation4 + $0x1f] sm:$0xff]  ;;  %2109 = vst.msk [vmem:[#allocation4 + $0x30] sm:$0xff] %vm218_vm10, %v2077_v61  ;;  %v1940_v3 = vadd.f32 %v5168_v9, %v1939_v19  ;;  %v2244_v6 = vmul.f32 %v5175_v22, %v2140_v63 }
 0x347   :  { %v2206_v2 = vld [vmem:[#allocation4 + $0x20] sm:$0xff]  ;;  %3668 = vmatmul.mubr.msk.f32.gmra.mxu0 %vm218_vm10, %v2424_v47  ;;  %v2385_v5 = vadd.f32 %v2352_v4, %v2314_v62  ;;  %v2282_v7 = vmul.f32 %v5177_v23, %v2173_v1  ;;  %v3569_v8 = vpop.f32.mrf.mxu1 }
 0x348   :  { %3670 = vmatprep.mubr.msk.f32.mxu0 %vm4092_vm3, %v4091_v0  ;;  %v2078_v10 = vmax.f32 %v1940_v3, 0.0  ;;  %v2353_v13 = vmul.f32 %v5179_v25, %v2206_v2 }
 0x349   :  { %v2425_v11 = vadd.f32 %v5186_v37, %v2385_v5  ;;  %v2315_v12 = vadd.f32 %v2282_v7, %v2244_v6  ;;  %v1944_v14 = vpop.f32.mrf.mxu1  ;;  %v2141_v15 = vld [vmem:[#allocation4 + $0x26] sm:$0xff] }
 0x34a   :  { %v2174_v16 = vld [vmem:[#allocation4 + $0x27] sm:$0xff]  ;;  %2110 = vst.msk [vmem:[#allocation4 + $0x38] sm:$0xff] %vm218_vm10, %v2078_v10  ;;  %v1945_v18 = vadd.f32 %v5168_v9, %v1944_v14  ;;  %v2245_v21 = vmul.f32 %v5175_v22, %v2141_v15 }
 0x34b   :  { %v2207_v17 = vld [vmem:[#allocation4 + $0x28] sm:$0xff]  ;;  %3671 = vmatmul.mubr.msk.f32.gmra.mxu0 %vm218_vm10, %v2425_v11  ;;  %v2386_v20 = vadd.f32 %v2353_v13, %v2315_v12  ;;  %v2283_v24 = vmul.f32 %v5177_v23, %v2174_v16  ;;  %v3572_v26 = vpop.f32.mrf.mxu1 }
 0x34c   :  { %3673 = vmatprep.mubr.msk.f32.mxu0 %vm4092_vm3, %v4091_v0  ;;  %v2079_v27 = vmax.f32 %v1945_v18, 0.0  ;;  %v2354_v29 = vmul.f32 %v5179_v25, %v2207_v17 }
 0x34d   :  { %v2426_v40 = vadd.f32 %v5186_v37, %v2386_v20  ;;  %v2316_v28 = vadd.f32 %v2283_v24, %v2245_v21  ;;  %v1949_v30 = vpop.f32.mrf.mxu1  ;;  %v2142_v33 = vld [vmem:[#allocation4 + $0x2e] sm:$0xff] }
 0x34e   :  { %v2175_v35 = vld [vmem:[#allocation4 + $0x2f] sm:$0xff]  ;;  %2111 = vst.msk [vmem:[#allocation4 + $0x40] sm:$0xff] %vm218_vm10, %v2079_v27  ;;  %v1950_v38 = vadd.f32 %v5168_v9, %v1949_v30  ;;  %v2246_v32 = vmul.f32 %v5175_v22, %v2142_v33 }
 0x34f   :  { %v2208_v36 = vld [vmem:[#allocation4 + $0x30] sm:$0xff]  ;;  %3674 = vmatmul.mubr.msk.f32.gmra.mxu0 %vm218_vm10, %v2426_v40  ;;  %v2387_v31 = vadd.f32 %v2354_v29, %v2316_v28  ;;  %v2284_v34 = vmul.f32 %v5177_v23, %v2175_v35  ;;  %v3575_v46 = vpop.f32.mrf.mxu1 }
 0x350   :  { %3676 = vmatprep.mubr.msk.f32.mxu0 %vm4092_vm3, %v4091_v0  ;;  %v2080_v41 = vmax.f32 %v1950_v38, 0.0  ;;  %v2355_v43 = vmul.f32 %v5179_v25, %v2208_v36 }
 0x351   :  { %v2427_v42 = vadd.f32 %v5186_v37, %v2387_v31  ;;  %v2317_v53 = vadd.f32 %v2284_v34, %v2246_v32  ;;  %v1954_v54 = vpop.f32.mrf.mxu1  ;;  %v2143_v39 = vld [vmem:[#allocation4 + $0x36] sm:$0xff] }
 0x352   :  { %v2176_v44 = vld [vmem:[#allocation4 + $0x37] sm:$0xff]  ;;  %2112 = vst.msk [vmem:[#allocation4 + $0x48] sm:$0xff] %vm218_vm10, %v2080_v41  ;;  %v1955_v48 = vadd.f32 %v5168_v9, %v1954_v54  ;;  %v2247_v56 = vmul.f32 %v5175_v22, %v2143_v39 }
 0x353   :  { %v2209_v45 = vld [vmem:[#allocation4 + $0x38] sm:$0xff]  ;;  %3677 = vmatmul.mubr.msk.f32.gmra.mxu0 %vm218_vm10, %v2427_v42  ;;  %v2388_v49 = vadd.f32 %v2355_v43, %v2317_v53  ;;  %v2285_v50 = vmul.f32 %v5177_v23, %v2176_v44  ;;  %v3578_v51 = vpop.f32.mrf.mxu1 }
 0x354   :  { %3679 = vmatprep.mubr.msk.f32.mxu0 %vm4092_vm3, %v4091_v0  ;;  %v2081_v52 = vmax.f32 %v1955_v48, 0.0  ;;  %v2356_v58 = vmul.f32 %v5179_v25, %v2209_v45 }
 0x355   :  { %v2428_v55 = vadd.f32 %v5186_v37, %v2388_v49  ;;  %v2318_v57 = vadd.f32 %v2285_v50, %v2247_v56  ;;  %v1959_v59 = vpop.f32.mrf.mxu1  ;;  %v2144_v60 = vld [vmem:[#allocation4 + $0x3e] sm:$0xff] }
 0x356   :  { %v2177_v61 = vld [vmem:[#allocation4 + $0x3f] sm:$0xff]  ;;  %2113 = vst.msk [vmem:[#allocation4 + $0x50] sm:$0xff] %vm218_vm10, %v2081_v52  ;;  %v1960_v62 = vadd.f32 %v5168_v9, %v1959_v59  ;;  %v2248_v19 = vmul.f32 %v5175_v22, %v2144_v60 }
 0x357   :  { %v2210_v47 = vld [vmem:[#allocation4 + $0x40] sm:$0xff]  ;;  %3680 = vmatmul.mubr.msk.f32.gmra.mxu0 %vm218_vm10, %v2428_v55  ;;  %v2389_v4 = vadd.f32 %v2356_v58, %v2318_v57  ;;  %v2286_v63 = vmul.f32 %v5177_v23, %v2177_v61  ;;  %v3581_v1 = vpop.f32.mrf.mxu1 }
 0x358   :  { %3682 = vmatprep.mubr.msk.f32.mxu0 %vm4092_vm3, %v4091_v0  ;;  %v2082_v2 = vmax.f32 %v1960_v62, 0.0  ;;  %v2357_v6 = vmul.f32 %v5179_v25, %v2210_v47 }
 0x359   :  { %v2429_v3 = vadd.f32 %v5186_v37, %v2389_v4  ;;  %v2319_v5 = vadd.f32 %v2286_v63, %v2248_v19  ;;  %v1964_v7 = vpop.f32.mrf.mxu1  ;;  %v2145_v8 = vld [vmem:[#allocation4 + $0x46] sm:$0xff] }
 0x35a   :  { %v2178_v10 = vld [vmem:[#allocation4 + $0x47] sm:$0xff]  ;;  %2114 = vst.msk [vmem:[#allocation4 + $0x58] sm:$0xff] %vm218_vm10, %v2082_v2  ;;  %v1965_v12 = vadd.f32 %v5168_v9, %v1964_v7  ;;  %v2249_v14 = vmul.f32 %v5175_v22, %v2145_v8 }
 0x35b   :  { %v2211_v11 = vld [vmem:[#allocation4 + $0x48] sm:$0xff]  ;;  %3683 = vmatmul.mubr.msk.f32.gmra.mxu0 %vm218_vm10, %v2429_v3  ;;  %v2390_v13 = vadd.f32 %v2357_v6, %v2319_v5  ;;  %v2287_v15 = vmul.f32 %v5177_v23, %v2178_v10  ;;  %v3584_v16 = vpop.f32.mrf.mxu1 }
 0x35c   :  { %3685 = vmatprep.mubr.msk.f32.mxu0 %vm4092_vm3, %v4091_v0  ;;  %v2083_v17 = vmax.f32 %v1965_v12, 0.0  ;;  %v2358_v21 = vmul.f32 %v5179_v25, %v2211_v11 }
 0x35d   :  { %v2430_v18 = vadd.f32 %v5186_v37, %v2390_v13  ;;  %v2320_v20 = vadd.f32 %v2287_v15, %v2249_v14  ;;  %v1969_v24 = vpop.f32.mrf.mxu1  ;;  %v2146_v26 = vld [vmem:[#allocation4 + $0x4e] sm:$0xff] }
 0x35e   :  { %v2179_v27 = vld [vmem:[#allocation4 + $0x4f] sm:$0xff]  ;;  %2115 = vst.msk [vmem:[#allocation4 + $0x60] sm:$0xff] %vm218_vm10, %v2083_v17  ;;  %v1970_v28 = vadd.f32 %v5168_v9, %v1969_v24  ;;  %v2250_v30 = vmul.f32 %v5175_v22, %v2146_v26  ;;  %v2153_v26 = vld [vmem:[#allocation4 + $0x86] sm:$0xff] }
 0x35f   :  { %v2212_v40 = vld [vmem:[#allocation4 + $0x50] sm:$0xff]  ;;  %3686 = vmatmul.mubr.msk.f32.gmra.mxu0 %vm218_vm10, %v2430_v18  ;;  %v2391_v29 = vadd.f32 %v2358_v21, %v2320_v20  ;;  %v2288_v33 = vmul.f32 %v5177_v23, %v2179_v27  ;;  %v3587_v35 = vpop.f32.mrf.mxu1  ;;  %v2186_v27 = vld [vmem:[#allocation4 + $0x87] sm:$0xff] }
 0x360   :  { %3688 = vmatprep.mubr.msk.f32.mxu0 %vm4092_vm3, %v4091_v0  ;;  %v2084_v36 = vmax.f32 %v1970_v28, 0.0  ;;  %v2359_v32 = vmul.f32 %v5179_v25, %v2212_v40 }
 0x361   :  { %v2431_v38 = vadd.f32 %v5186_v37, %v2391_v29  ;;  %v2321_v31 = vadd.f32 %v2288_v33, %v2250_v30  ;;  %v1974_v34 = vpop.f32.mrf.mxu1  ;;  %v2147_v46 = vld [vmem:[#allocation4 + $0x56] sm:$0xff] }
 0x362   :  { %v2180_v41 = vld [vmem:[#allocation4 + $0x57] sm:$0xff]  ;;  %2116 = vst.msk [vmem:[#allocation4 + $0x68] sm:$0xff] %vm218_vm10, %v2084_v36  ;;  %v1975_v53 = vadd.f32 %v5168_v9, %v1974_v34  ;;  %v2251_v54 = vmul.f32 %v5175_v22, %v2147_v46 }
 0x363   :  { %v2213_v42 = vld [vmem:[#allocation4 + $0x58] sm:$0xff]  ;;  %3689 = vmatmul.mubr.msk.f32.gmra.mxu0 %vm218_vm10, %v2431_v38  ;;  %v2392_v43 = vadd.f32 %v2359_v32, %v2321_v31  ;;  %v2289_v39 = vmul.f32 %v5177_v23, %v2180_v41  ;;  %v3590_v44 = vpop.f32.mrf.mxu1  ;;  %v2257_v31 = vmul.f32 %v5175_v22, %v2153_v26  ;;  %v2295_v32 = vmul.f32 %v5177_v23, %v2186_v27 }
 0x364   :  { %3691 = vmatprep.mubr.msk.f32.mxu0 %vm4092_vm3, %v4091_v0  ;;  %v2085_v45 = vmax.f32 %v1975_v53, 0.0  ;;  %v2360_v56 = vmul.f32 %v5179_v25, %v2213_v42  ;;  %v2219_v53 = vld [vmem:[#allocation4 + $0x88] sm:$0xff] }
 0x365   :  { %v2432_v48 = vadd.f32 %v5186_v37, %v2392_v43  ;;  %v2322_v49 = vadd.f32 %v2289_v39, %v2251_v54  ;;  %v1979_v50 = vpop.f32.mrf.mxu1  ;;  %v2148_v51 = vld [vmem:[#allocation4 + $0x5e] sm:$0xff] }
 0x366   :  { %v2181_v52 = vld [vmem:[#allocation4 + $0x5f] sm:$0xff]  ;;  %2117 = vst.msk [vmem:[#allocation4 + $0x70] sm:$0xff] %vm218_vm10, %v2085_v45  ;;  %v1980_v57 = vadd.f32 %v5168_v9, %v1979_v50  ;;  %v2252_v59 = vmul.f32 %v5175_v22, %v2148_v51  ;;  %v2328_v51 = vadd.f32 %v2295_v32, %v2257_v31 }
 0x367   :  { %v2214_v55 = vld [vmem:[#allocation4 + $0x60] sm:$0xff]  ;;  %3692 = vmatmul.mubr.msk.f32.gmra.mxu0 %vm218_vm10, %v2432_v48  ;;  %v2393_v58 = vadd.f32 %v2360_v56, %v2322_v49  ;;  %v2290_v60 = vmul.f32 %v5177_v23, %v2181_v52  ;;  %v3593_v61 = vpop.f32.mrf.mxu1  ;;  %v2366_v52 = vmul.f32 %v5179_v25, %v2219_v53 }
 0x368   :  { %3694 = vmatprep.mubr.msk.f32.mxu0 %vm4092_vm3, %v4091_v0  ;;  %v2086_v47 = vmax.f32 %v1980_v57, 0.0  ;;  %v2361_v19 = vmul.f32 %v5179_v25, %v2214_v55 }
 0x369   :  { %v2433_v62 = vadd.f32 %v5186_v37, %v2393_v58  ;;  %v2323_v4 = vadd.f32 %v2290_v60, %v2252_v59  ;;  %v1984_v63 = vpop.f32.mrf.mxu1  ;;  %v2149_v1 = vld [vmem:[#allocation4 + $0x66] sm:$0xff] }
 0x36a   :  { %v2182_v2 = vld [vmem:[#allocation4 + $0x67] sm:$0xff]  ;;  %2118 = vst.msk [vmem:[#allocation4 + $0x78] sm:$0xff] %vm218_vm10, %v2086_v47  ;;  %v1985_v5 = vadd.f32 %v5168_v9, %v1984_v63  ;;  %v2253_v7 = vmul.f32 %v5175_v22, %v2149_v1 }
 0x36b   :  { %v2215_v3 = vld [vmem:[#allocation4 + $0x68] sm:$0xff]  ;;  %3695 = vmatmul.mubr.msk.f32.gmra.mxu0 %vm218_vm10, %v2433_v62  ;;  %v2394_v6 = vadd.f32 %v2361_v19, %v2323_v4  ;;  %v2291_v8 = vmul.f32 %v5177_v23, %v2182_v2  ;;  %v3596_v10 = vpop.f32.mrf.mxu1  ;;  %v2399_v2 = vadd.f32 %v2366_v52, %v2328_v51 }
 0x36c   :  { %3697 = vmatprep.mubr.msk.f32.mxu0 %vm4092_vm3, %v4091_v0  ;;  %v2087_v11 = vmax.f32 %v1985_v5, 0.0  ;;  %v2362_v14 = vmul.f32 %v5179_v25, %v2215_v3 }
 0x36d   :  { %v2434_v12 = vadd.f32 %v5186_v37, %v2394_v6  ;;  %v2324_v13 = vadd.f32 %v2291_v8, %v2253_v7  ;;  %v1989_v15 = vpop.f32.mrf.mxu1  ;;  %v2150_v16 = vld [vmem:[#allocation4 + $0x6e] sm:$0xff] }
 0x36e   :  { %v2183_v17 = vld [vmem:[#allocation4 + $0x6f] sm:$0xff]  ;;  %2120 = vst.msk [vmem:[#allocation4 + $0x80] sm:$0x3f] %vm2119_vm12, %v2087_v11  ;;  %v2254_v21 = vmul.f32 %v5175_v22, %v2150_v16 }
 0x36f   :  { %v2216_v18 = vld [vmem:[#allocation4 + $0x70] sm:$0xff]  ;;  %3698 = vmatmul.mubr.msk.f32.gmra.mxu0 %vm218_vm10, %v2434_v12  ;;  %v2395_v20 = vadd.f32 %v2362_v14, %v2324_v13  ;;  %v2292_v24 = vmul.f32 %v5177_v23, %v2183_v17  ;;  %v3599_v40 = vpop.f32.mrf.mxu1  ;;  %v2439_v13 = vadd.f32 %v5186_v37, %v2399_v2 }
 0x370   :  { %3700 = vmatprep.mubr.msk.f32.mxu0 %vm4092_vm3, %v4091_v0  ;;  %v2363_v30 = vmul.f32 %v5179_v25, %v2216_v18 }
 0x371   :  { %v2435_v28 = vadd.f32 %v5186_v37, %v2395_v20  ;;  %v2325_v29 = vadd.f32 %v2292_v24, %v2254_v21  ;;  %v1993_v33 = vpop.f32.mrf.mxu1  ;;  %v2151_v35 = vld [vmem:[#allocation4 + $0x76] sm:$0xff] }
 0x372   :  { %v2184_v36 = vld [vmem:[#allocation4 + $0x77] sm:$0xff]  ;;  %v1994_v34 = vadd.f32 %v5168_v9, %v1993_v33  ;;  %v2255_v41 = vmul.f32 %v5175_v22, %v2151_v35 }
 0x373   :  { %v2217_v38 = vld [vmem:[#allocation4 + $0x78] sm:$0xff]  ;;  %3701 = vmatmul.mubr.msk.f32.gmra.mxu0 %vm218_vm10, %v2435_v28  ;;  %v2396_v46 = vadd.f32 %v2363_v30, %v2325_v29  ;;  %v2293_v42 = vmul.f32 %v5177_v23, %v2184_v36  ;;  %v3602_v43 = vpop.f32.mrf.mxu1 }
 0x374   :  { %3703 = vmatprep.mubr.msk.f32.mxu0 %vm4092_vm3, %v4091_v0  ;;  %v2088_v54 = vmax.f32 %v1994_v34, 0.0  ;;  %v2364_v45 = vmul.f32 %v5179_v25, %v2217_v38 }
 0x375   :  { %v2436_v39 = vadd.f32 %v5186_v37, %v2396_v46  ;;  %v2326_v44 = vadd.f32 %v2293_v42, %v2255_v41  ;;  %v1998_v48 = vpop.f32.mrf.mxu1  ;;  %v2152_v49 = vld [vmem:[#allocation4 + $0x7e] sm:$0xff] }
 0x376   :  { %v2185_v56 = vld [vmem:[#allocation4 + $0x7f] sm:$0xff]  ;;  %2121 = vst.msk [vmem:[#allocation4 + $0x90] sm:$0xff] %vm218_vm10, %v2088_v54  ;;  %v1999_v55 = vadd.f32 %v5168_v9, %v1998_v48  ;;  %v2256_v58 = vmul.f32 %v5175_v22, %v2152_v49 }
 0x377   :  { %v2218_v50 = vld [vmem:[#allocation4 + $0x80] sm:$0xff]  ;;  %3704 = vmatmul.mubr.msk.f32.gmra.mxu0 %vm218_vm10, %v2436_v39  ;;  %v2397_v57 = vadd.f32 %v2364_v45, %v2326_v44  ;;  %v2294_v59 = vmul.f32 %v5177_v23, %v2185_v56  ;;  %v3605_v60 = vpop.f32.mrf.mxu1 }
 0x378   :  { %3706 = vmatprep.mubr.msk.f32.mxu0 %vm4092_vm3, %v4091_v0  ;;  %v2089_v61 = vmax.f32 %v1999_v55, 0.0  ;;  %v2365_v4 = vmul.f32 %v5179_v25, %v2218_v50 }
 0x379   :  { %v2437_v47 = vadd.f32 %v5186_v37, %v2397_v57  ;;  %v2327_v62 = vadd.f32 %v2294_v59, %v2256_v58  ;;  %v2003_v19 = vpop.f32.mrf.mxu1 }
 0x37a   :  { %2122 = vst.msk [vmem:[#allocation4 + $0x98] sm:$0xff] %vm218_vm10, %v2089_v61  ;;  %v2004_v63 = vadd.f32 %v5168_v9, %v2003_v19 }
 0x37b   :  { %3707 = vmatmul.mubr.msk.f32.gmra.mxu0 %vm218_vm10, %v2437_v47  ;;  %v2398_v1 = vadd.f32 %v2365_v4, %v2327_v62  ;;  %v3608_v3 = vpop.f32.mrf.mxu1 }
 0x37c   :  { %3709 = vmatprep.mubr.msk.f32.mxu0 %vm4092_vm3, %v4091_v0  ;;  %v2090_v5 = vmax.f32 %v2004_v63, 0.0 }
 0x37d   :  { %v2438_v6 = vadd.f32 %v5186_v37, %v2398_v1  ;;  %v2008_v7 = vpop.f32.mrf.mxu1  ;;  %v2154_v8 = vld [vmem:[#allocation4 + $0x8e] sm:$0xff] }
 0x37e   :  { %v2187_v10 = vld [vmem:[#allocation4 + $0x8f] sm:$0xff]  ;;  %2123 = vst.msk [vmem:[#allocation4 + $0xa0] sm:$0xff] %vm218_vm10, %v2090_v5  ;;  %v2009_v12 = vadd.f32 %v5168_v9, %v2008_v7  ;;  %v2258_v14 = vmul.f32 %v5175_v22, %v2154_v8 }
 0x37f   :  { %v2220_v11 = vld [vmem:[#allocation4 + $0x90] sm:$0xff]  ;;  %3710 = vmatmul.mubr.msk.f32.gmra.mxu0 %vm218_vm10, %v2438_v6  ;;  %v2296_v15 = vmul.f32 %v5177_v23, %v2187_v10  ;;  %v3611_v16 = vpop.f32.mrf.mxu1 }
 0x380   :  { %3712 = vmatprep.mubr.msk.f32.mxu0 %vm4092_vm3, %v4091_v0  ;;  %v2091_v17 = vmax.f32 %v2009_v12, 0.0  ;;  %v2367_v20 = vmul.f32 %v5179_v25, %v2220_v11 }
 0x381   :  { %v2329_v18 = vadd.f32 %v2296_v15, %v2258_v14  ;;  %v2013_v21 = vpop.f32.mrf.mxu1  ;;  %v2155_v24 = vld [vmem:[#allocation4 + $0x96] sm:$0xff] }
 0x382   :  { %v2188_v26 = vld [vmem:[#allocation4 + $0x97] sm:$0xff]  ;;  %2124 = vst.msk [vmem:[#allocation4 + $0xa8] sm:$0xff] %vm218_vm10, %v2091_v17  ;;  %v2014_v40 = vadd.f32 %v5168_v9, %v2013_v21  ;;  %v2259_v29 = vmul.f32 %v5175_v22, %v2155_v24 }
 0x383   :  { %v2221_v27 = vld [vmem:[#allocation4 + $0x98] sm:$0xff]  ;;  %3713 = vmatmul.mubr.msk.f32.gmra.mxu0 %vm218_vm10, %v2439_v13  ;;  %v2400_v28 = vadd.f32 %v2367_v20, %v2329_v18  ;;  %v2297_v30 = vmul.f32 %v5177_v23, %v2188_v26  ;;  %v3614_v33 = vpop.f32.mrf.mxu1 }
 0x384   :  { %3715 = vmatprep.mubr.msk.f32.mxu0 %vm4092_vm3, %v4091_v0  ;;  %v2092_v35 = vmax.f32 %v2014_v40, 0.0  ;;  %v2368_v31 = vmul.f32 %v5179_v25, %v2221_v27 }
 0x385   :  { %v2440_v36 = vadd.f32 %v5186_v37, %v2400_v28  ;;  %v2330_v38 = vadd.f32 %v2297_v30, %v2259_v29  ;;  %v2018_v32 = vpop.f32.mrf.mxu1  ;;  %v2156_v34 = vld [vmem:[#allocation4 + $0x9e] sm:$0xff] }
 0x386   :  { %v2189_v46 = vld [vmem:[#allocation4 + $0x9f] sm:$0xff]  ;;  %2125 = vst.msk [vmem:[#allocation4 + $0xb0] sm:$0xff] %vm218_vm10, %v2092_v35  ;;  %v2019_v42 = vadd.f32 %v5168_v9, %v2018_v32  ;;  %v2260_v43 = vmul.f32 %v5175_v22, %v2156_v34 }
 0x387   :  { %v2222_v41 = vld [vmem:[#allocation4 + $0xa0] sm:$0xff]  ;;  %3716 = vmatmul.mubr.msk.f32.gmra.mxu0 %vm218_vm10, %v2440_v36  ;;  %v2401_v53 = vadd.f32 %v2368_v31, %v2330_v38  ;;  %v2298_v54 = vmul.f32 %v5177_v23, %v2189_v46  ;;  %v3617_v39 = vpop.f32.mrf.mxu1 }
 0x388   :  { %3718 = vmatprep.mubr.msk.f32.mxu0 %vm4092_vm3, %v4091_v0  ;;  %v2093_v44 = vmax.f32 %v2019_v42, 0.0  ;;  %v2369_v49 = vmul.f32 %v5179_v25, %v2222_v41 }
 0x389   :  { %v2441_v45 = vadd.f32 %v5186_v37, %v2401_v53  ;;  %v2331_v48 = vadd.f32 %v2298_v54, %v2260_v43  ;;  %v2023_v56 = vpop.f32.mrf.mxu1  ;;  %v2157_v50 = vld [vmem:[#allocation4 + $0xa6] sm:$0xff] }
 0x38a   :  { %v2190_v51 = vld [vmem:[#allocation4 + $0xa7] sm:$0xff]  ;;  %2126 = vst.msk [vmem:[#allocation4 + $0xb8] sm:$0xff] %vm218_vm10, %v2093_v44  ;;  %v2024_v55 = vadd.f32 %v5168_v9, %v2023_v56  ;;  %v2261_v58 = vmul.f32 %v5175_v22, %v2157_v50 }
 0x38b   :  { %v2223_v52 = vld [vmem:[#allocation4 + $0xa8] sm:$0xff]  ;;  %3719 = vmatmul.mubr.msk.f32.gmra.mxu0 %vm218_vm10, %v2441_v45  ;;  %v2402_v57 = vadd.f32 %v2369_v49, %v2331_v48  ;;  %v2299_v59 = vmul.f32 %v5177_v23, %v2190_v51  ;;  %v3620_v60 = vpop.f32.mrf.mxu1 }
 0x38c   :  { %3721 = vmatprep.mubr.msk.f32.mxu0 %vm4092_vm3, %v4091_v0  ;;  %v2094_v61 = vmax.f32 %v2024_v55, 0.0  ;;  %v2370_v4 = vmul.f32 %v5179_v25, %v2223_v52 }
 0x38d   :  { %v2442_v47 = vadd.f32 %v5186_v37, %v2402_v57  ;;  %v2332_v62 = vadd.f32 %v2299_v59, %v2261_v58  ;;  %v2028_v19 = vpop.f32.mrf.mxu1  ;;  %v2158_v63 = vld [vmem:[#allocation4 + $0xae] sm:$0xff] }
 0x38e   :  { %v2191_v1 = vld [vmem:[#allocation4 + $0xaf] sm:$0xff]  ;;  %2127 = vst.msk [vmem:[#allocation4 + $0xc0] sm:$0xff] %vm218_vm10, %v2094_v61  ;;  %v2029_v3 = vadd.f32 %v5168_v9, %v2028_v19  ;;  %v2262_v6 = vmul.f32 %v5175_v22, %v2158_v63 }
 0x38f   :  { %v2224_v2 = vld [vmem:[#allocation4 + $0xb0] sm:$0xff]  ;;  %3722 = vmatmul.mubr.msk.f32.gmra.mxu0 %vm218_vm10, %v2442_v47  ;;  %v2403_v5 = vadd.f32 %v2370_v4, %v2332_v62  ;;  %v2300_v7 = vmul.f32 %v5177_v23, %v2191_v1  ;;  %v3623_v8 = vpop.f32.mrf.mxu1 }
 0x390   :  { %3724 = vmatprep.mubr.msk.f32.mxu0 %vm4092_vm3, %v4091_v0  ;;  %v2095_v10 = vmax.f32 %v2029_v3, 0.0  ;;  %v2371_v13 = vmul.f32 %v5179_v25, %v2224_v2 }
 0x391   :  { %v2443_v11 = vadd.f32 %v5186_v37, %v2403_v5  ;;  %v2333_v12 = vadd.f32 %v2300_v7, %v2262_v6  ;;  %v2033_v14 = vpop.f32.mrf.mxu1  ;;  %v2159_v15 = vld [vmem:[#allocation4 + $0xb6] sm:$0xff] }
 0x392   :  { %v2192_v16 = vld [vmem:[#allocation4 + $0xb7] sm:$0xff]  ;;  %2128 = vst.msk [vmem:[#allocation4 + $0xc8] sm:$0xff] %vm218_vm10, %v2095_v10  ;;  %v2034_v18 = vadd.f32 %v5168_v9, %v2033_v14  ;;  %v2263_v21 = vmul.f32 %v5175_v22, %v2159_v15 }
 0x393   :  { %v2225_v17 = vld [vmem:[#allocation4 + $0xb8] sm:$0xff]  ;;  %3725 = vmatmul.mubr.msk.f32.gmra.mxu0 %vm218_vm10, %v2443_v11  ;;  %v2404_v20 = vadd.f32 %v2371_v13, %v2333_v12  ;;  %v2301_v24 = vmul.f32 %v5177_v23, %v2192_v16  ;;  %v3626_v26 = vpop.f32.mrf.mxu1 }
 0x394   :  { %3727 = vmatprep.mubr.msk.f32.mxu0 %vm4092_vm3, %v4091_v0  ;;  %v2096_v27 = vmax.f32 %v2034_v18, 0.0  ;;  %v2372_v29 = vmul.f32 %v5179_v25, %v2225_v17 }
 0x395   :  { %v2444_v40 = vadd.f32 %v5186_v37, %v2404_v20  ;;  %v2334_v28 = vadd.f32 %v2301_v24, %v2263_v21  ;;  %v2038_v30 = vpop.f32.mrf.mxu1  ;;  %v2160_v33 = vld [vmem:[#allocation4 + $0xbe] sm:$0xff] }
 0x396   :  { %v2193_v35 = vld [vmem:[#allocation4 + $0xbf] sm:$0xff]  ;;  %2129 = vst.msk [vmem:[#allocation4 + $0xd0] sm:$0xff] %vm218_vm10, %v2096_v27  ;;  %v2039_v38 = vadd.f32 %v5168_v9, %v2038_v30  ;;  %v2264_v32 = vmul.f32 %v5175_v22, %v2160_v33 }
 0x397   :  { %v2226_v36 = vld [vmem:[#allocation4 + $0xc0] sm:$0xff]  ;;  %3728 = vmatmul.mubr.msk.f32.gmra.mxu0 %vm218_vm10, %v2444_v40  ;;  %v2405_v31 = vadd.f32 %v2372_v29, %v2334_v28  ;;  %v2302_v34 = vmul.f32 %v5177_v23, %v2193_v35  ;;  %v3629_v46 = vpop.f32.mrf.mxu1 }
 0x398   :  { %3730 = vmatprep.mubr.msk.f32.mxu0 %vm4092_vm3, %v4091_v0  ;;  %v2097_v41 = vmax.f32 %v2039_v38, 0.0  ;;  %v2373_v43 = vmul.f32 %v5179_v25, %v2226_v36 }
 0x399   :  { %v2445_v42 = vadd.f32 %v5186_v37, %v2405_v31  ;;  %v2335_v53 = vadd.f32 %v2302_v34, %v2264_v32  ;;  %v2043_v54 = vpop.f32.mrf.mxu1  ;;  %v2161_v39 = vld [vmem:[#allocation4 + $0xc6] sm:$0xff] }
 0x39a   :  { %v2194_v44 = vld [vmem:[#allocation4 + $0xc7] sm:$0xff]  ;;  %2130 = vst.msk [vmem:[#allocation4 + $0xd8] sm:$0xff] %vm218_vm10, %v2097_v41  ;;  %v2044_v48 = vadd.f32 %v5168_v9, %v2043_v54  ;;  %v2265_v56 = vmul.f32 %v5175_v22, %v2161_v39 }
 0x39b   :  { %v2227_v45 = vld [vmem:[#allocation4 + $0xc8] sm:$0xff]  ;;  %3731 = vmatmul.mubr.msk.f32.gmra.mxu0 %vm218_vm10, %v2445_v42  ;;  %v2406_v49 = vadd.f32 %v2373_v43, %v2335_v53  ;;  %v2303_v50 = vmul.f32 %v5177_v23, %v2194_v44  ;;  %v3632_v51 = vpop.f32.mrf.mxu1 }
 0x39c   :  { %3733 = vmatprep.mubr.msk.f32.mxu0 %vm4092_vm3, %v4091_v0  ;;  %v2098_v52 = vmax.f32 %v2044_v48, 0.0  ;;  %v2374_v58 = vmul.f32 %v5179_v25, %v2227_v45 }
 0x39d   :  { %v2446_v55 = vadd.f32 %v5186_v37, %v2406_v49  ;;  %v2336_v57 = vadd.f32 %v2303_v50, %v2265_v56  ;;  %v2048_v59 = vpop.f32.mrf.mxu1  ;;  %v2162_v60 = vld [vmem:[#allocation4 + $0xce] sm:$0xff] }
 0x39e   :  { %v2195_v61 = vld [vmem:[#allocation4 + $0xcf] sm:$0xff]  ;;  %2131 = vst.msk [vmem:[#allocation4 + $0xe0] sm:$0xff] %vm218_vm10, %v2098_v52  ;;  %v2049_v62 = vadd.f32 %v5168_v9, %v2048_v59  ;;  %v2266_v19 = vmul.f32 %v5175_v22, %v2162_v60 }
 0x39f   :  { %v2228_v47 = vld [vmem:[#allocation4 + $0xd0] sm:$0xff]  ;;  %3734 = vmatmul.mubr.msk.f32.gmra.mxu0 %vm218_vm10, %v2446_v55  ;;  %v2407_v4 = vadd.f32 %v2374_v58, %v2336_v57  ;;  %v2304_v63 = vmul.f32 %v5177_v23, %v2195_v61  ;;  %v3635_v1 = vpop.f32.mrf.mxu1 }
 0x3a0   :  { %3736 = vmatprep.mubr.msk.f32.mxu0 %vm4092_vm3, %v4091_v0  ;;  %v2099_v2 = vmax.f32 %v2049_v62, 0.0  ;;  %v2375_v6 = vmul.f32 %v5179_v25, %v2228_v47 }
 0x3a1   :  { %v2447_v3 = vadd.f32 %v5186_v37, %v2407_v4  ;;  %v2337_v5 = vadd.f32 %v2304_v63, %v2266_v19  ;;  %v2053_v7 = vpop.f32.mrf.mxu1  ;;  %v2163_v8 = vld [vmem:[#allocation4 + $0xd6] sm:$0xff] }
 0x3a2   :  { %v2196_v10 = vld [vmem:[#allocation4 + $0xd7] sm:$0xff]  ;;  %2132 = vst.msk [vmem:[#allocation4 + $0xe8] sm:$0xff] %vm218_vm10, %v2099_v2  ;;  %v2054_v12 = vadd.f32 %v5168_v9, %v2053_v7  ;;  %v2267_v14 = vmul.f32 %v5175_v22, %v2163_v8 }
 0x3a3   :  { %v2229_v11 = vld [vmem:[#allocation4 + $0xd8] sm:$0xff]  ;;  %3737 = vmatmul.mubr.msk.f32.gmra.mxu0 %vm218_vm10, %v2447_v3  ;;  %v2408_v13 = vadd.f32 %v2375_v6, %v2337_v5  ;;  %v2305_v15 = vmul.f32 %v5177_v23, %v2196_v10  ;;  %v3638_v16 = vpop.f32.mrf.mxu1 }
 0x3a4   :  { %3739 = vmatprep.mubr.msk.f32.mxu0 %vm4092_vm3, %v4091_v0  ;;  %v2100_v17 = vmax.f32 %v2054_v12, 0.0  ;;  %v2376_v21 = vmul.f32 %v5179_v25, %v2229_v11 }
 0x3a5   :  { %v2448_v18 = vadd.f32 %v5186_v37, %v2408_v13  ;;  %v2338_v20 = vadd.f32 %v2305_v15, %v2267_v14  ;;  %v2058_v24 = vpop.f32.mrf.mxu1  ;;  %v2164_v26 = vld [vmem:[#allocation4 + $0xde] sm:$0xff] }
 0x3a6   :  { %v2197_v27 = vld [vmem:[#allocation4 + $0xdf] sm:$0xff]  ;;  %2133 = vst.msk [vmem:[#allocation4 + $0xf0] sm:$0xff] %vm218_vm10, %v2100_v17  ;;  %v2059_v28 = vadd.f32 %v5168_v9, %v2058_v24  ;;  %v2268_v30 = vmul.f32 %v5175_v22, %v2164_v26 }
 0x3a7   :  { %v2230_v40 = vld [vmem:[#allocation4 + $0xe0] sm:$0xff]  ;;  %3740 = vmatmul.mubr.msk.f32.gmra.mxu0 %vm218_vm10, %v2448_v18  ;;  %v2409_v29 = vadd.f32 %v2376_v21, %v2338_v20  ;;  %v2306_v33 = vmul.f32 %v5177_v23, %v2197_v27  ;;  %v3641_v35 = vpop.f32.mrf.mxu1 }
 0x3a8   :  { %3742 = vmatprep.mubr.msk.f32.mxu0 %vm4092_vm3, %v4091_v0  ;;  %v2101_v36 = vmax.f32 %v2059_v28, 0.0  ;;  %v2377_v32 = vmul.f32 %v5179_v25, %v2230_v40 }
 0x3a9   :  { %v2449_v38 = vadd.f32 %v5186_v37, %v2409_v29  ;;  %v2339_v31 = vadd.f32 %v2306_v33, %v2268_v30  ;;  %v2063_v34 = vpop.f32.mrf.mxu1  ;;  %v2165_v46 = vld [vmem:[#allocation4 + $0xe6] sm:$0xff] }
 0x3aa   :  { %v2198_v41 = vld [vmem:[#allocation4 + $0xe7] sm:$0xff]  ;;  %2134 = vst.msk [vmem:[#allocation4 + $0xf8] sm:$0xff] %vm218_vm10, %v2101_v36  ;;  %v2064_v53 = vadd.f32 %v5168_v9, %v2063_v34  ;;  %v2269_v54 = vmul.f32 %v5175_v22, %v2165_v46  ;;  %v5469_v36 = vld [vmem:[#allocation24] ss:$0 sm:$0xff] }
 0x3ab   :  { %v2231_v42 = vld [vmem:[#allocation4 + $0xe8] sm:$0xff]  ;;  %3743 = vmatmul.mubr.msk.f32.gmra.mxu0 %vm218_vm10, %v2449_v38  ;;  %v2410_v43 = vadd.f32 %v2377_v32, %v2339_v31  ;;  %v2307_v39 = vmul.f32 %v5177_v23, %v2198_v41  ;;  %v3644_v44 = vpop.f32.mrf.mxu1 }
 0x3ac   :  { %3745 = vmatprep.mubr.msk.f32.mxu0 %vm4092_vm3, %v4091_v0  ;;  %v2102_v45 = vmax.f32 %v2064_v53, 0.0  ;;  %v2378_v56 = vmul.f32 %v5179_v25, %v2231_v42 }
 0x3ad   :  { %v2450_v48 = vadd.f32 %v5186_v37, %v2410_v43  ;;  %v2340_v49 = vadd.f32 %v2307_v39, %v2269_v54  ;;  %v2068_v50 = vpop.f32.mrf.mxu1  ;;  %v2166_v51 = vld [vmem:[#allocation4 + $0xee] sm:$0xff] }
 0x3ae   :  { %v2199_v52 = vld [vmem:[#allocation4 + $0xef] sm:$0xff]  ;;  %2135 = vst.msk [vmem:[#allocation4 + $0x100] sm:$0xff] %vm218_vm10, %v2102_v45  ;;  %v2069_v57 = vadd.f32 %v5168_v9, %v2068_v50  ;;  %v2270_v59 = vmul.f32 %v5175_v22, %v2166_v51 }
 0x3af   :  { %v2232_v55 = vld [vmem:[#allocation4 + $0xf0] sm:$0xff]  ;;  %3746 = vmatmul.mubr.msk.f32.gmra.mxu0 %vm218_vm10, %v2450_v48  ;;  %v2411_v58 = vadd.f32 %v2378_v56, %v2340_v49  ;;  %v2308_v60 = vmul.f32 %v5177_v23, %v2199_v52  ;;  %v3647_v61 = vpop.f32.mrf.mxu1 }
 0x3b0   :  { %3748 = vmatprep.mubr.msk.f32.mxu0 %vm4092_vm3, %v4091_v0  ;;  %v2103_v47 = vmax.f32 %v2069_v57, 0.0  ;;  %v2379_v19 = vmul.f32 %v5179_v25, %v2232_v55 }
 0x3b1   :  { %v2451_v62 = vadd.f32 %v5186_v37, %v2411_v58  ;;  %v2341_v4 = vadd.f32 %v2308_v60, %v2270_v59  ;;  %v2167_v63 = vld [vmem:[#allocation4 + $0xf6] sm:$0xff] }
 0x3b2   :  { %v2200_v1 = vld [vmem:[#allocation4 + $0xf7] sm:$0xff]  ;;  %2136 = vst.msk [vmem:[#allocation4 + $0x108] sm:$0x3f] %vm2119_vm12, %v2103_v47  ;;  %v2271_v3 = vmul.f32 %v5175_v22, %v2167_v63 }
 0x3b3   :  { %v2233_v9 = vld [vmem:[#allocation4 + $0xf8] sm:$0xff]  ;;  %3749 = vmatmul.mubr.msk.f32.gmra.mxu0 %vm218_vm10, %v2451_v62  ;;  %v2412_v2 = vadd.f32 %v2379_v19, %v2341_v4  ;;  %v2309_v5 = vmul.f32 %v5177_v23, %v2200_v1 }
 0x3b4   :  { %3751 = vmatprep.mubr.msk.f32.mxu0 %vm4092_vm3, %v4091_v0  ;;  %v2380_v8 = vmul.f32 %v5179_v25, %v2233_v9 }
 0x3b5   :  { %v2452_v6 = vadd.f32 %v5186_v37, %v2412_v2  ;;  %v2342_v7 = vadd.f32 %v2309_v5, %v2271_v3  ;;  %v2168_v10 = vld [vmem:[#allocation4 + $0xfe] sm:$0xff] }
 0x3b6   :  { %v2201_v11 = vld [vmem:[#allocation4 + $0xff] sm:$0xff]  ;;  %v2272_v14 = vmul.f32 %v5175_v22, %v2168_v10 }
 0x3b7   :  { %v2234_v12 = vld [vmem:[#allocation4 + $0x100] sm:$0xff]  ;;  %3752 = vmatmul.mubr.msk.f32.gmra.mxu0 %vm218_vm10, %v2452_v6  ;;  %v2413_v13 = vadd.f32 %v2380_v8, %v2342_v7  ;;  %v2310_v15 = vmul.f32 %v5177_v23, %v2201_v11 }
 0x3b8   :  { %3754 = vmatprep.mubr.msk.f32.mxu0 %vm4092_vm3, %v4091_v0  ;;  %v2381_v18 = vmul.f32 %v5179_v25, %v2234_v12 }
 0x3b9   :  { %v2453_v16 = vadd.f32 %v5186_v37, %v2413_v13  ;;  %v2343_v17 = vadd.f32 %v2310_v15, %v2272_v14  ;;  %v2169_v20 = vld [vmem:[#allocation4 + $0x106] sm:$0xff] }
 0x3ba   :  { %v2202_v21 = vld [vmem:[#allocation4 + $0x107] sm:$0xff]  ;;  %v2273_v27 = vmul.f32 %v5175_v22, %v2169_v20 }
 0x3bb   :  { %v2235_v24 = vld [vmem:[#allocation4 + $0x108] sm:$0xff]  ;;  %3755 = vmatmul.mubr.msk.f32.gmra.mxu0 %vm218_vm10, %v2453_v16  ;;  %v2414_v26 = vadd.f32 %v2381_v18, %v2343_v17  ;;  %v2311_v40 = vmul.f32 %v5177_v23, %v2202_v21 }
 0x3bc   :  { %v2382_v30 = vmul.f32 %v5179_v25, %v2235_v24 }
 0x3bd   :  { %v2454_v28 = vadd.f32 %v5186_v37, %v2414_v26  ;;  %v2344_v29 = vadd.f32 %v2311_v40, %v2273_v27 }
 0x3bf   :  { %3758 = vmatmul.mubr.msk.f32.vlgmr.msra.gmra.mxu1 %vm218_vm10, %v2454_v28  ;;  %v2415_v33 = vadd.f32 %v2382_v30, %v2344_v29 }
 0x3c0   :  { %3760 = vmatprep.mubr.msk.f32.mxu1 %vm4092_vm3, %v4091_v0 }
 0x3c1   :  { %v2455_v35 = vadd.f32 %v5186_v37, %v2415_v33 }
 0x3c3   :  { %3761 = vmatmul.mubr.msk.f32.gmra.mxu1 %vm218_vm10, %v2455_v35 }
 0x403   :  { %v2636_v22 = vpop.f32.mrf.mxu0 }
 0x404   :  { %v2637_v23 = vadd.f32 %v5469_v36, %v2636_v22 }
 0x405   :  { %v3666_v38 = vpop.f32.mrf.mxu0 }
 0x406   :  { %v2799_v34 = vmax.f32 %v2637_v23, 0.0 }
 0x407   :  { %v2641_v31 = vpop.f32.mrf.mxu0 }
 0x408   :  { %v2642_v32 = vadd.f32 %v5469_v36, %v2641_v31 }
 0x409   :  { %v3669_v25 = vpop.f32.mrf.mxu0 }
 0x40a   :  { %v2800_v46 = vmax.f32 %v2642_v32, 0.0 }
 0x40b   :  { %v2646_v41 = vpop.f32.mrf.mxu0 }
 0x40c   :  { %v3233_v42 = vpack.c.bf16 %v2800_v46, %v2799_v34  ;;  %v2647_v0 = vadd.f32 %v5469_v36, %v2646_v41 }
 0x40d   :  { %v3672_v53 = vpop.f32.mrf.mxu0 }
 0x40e   :  { %3234 = vst [vmem:[%s5566_s15] sm:$0xff] %v3233_v42   ;;  %v2801_v39 = vmax.f32 %v2647_v0, 0.0 }
 0x40f   :  { %v2651_v37 = vpop.f32.mrf.mxu0 }
 0x410   :  { %v2652_v43 = vadd.f32 %v5469_v36, %v2651_v37 }
 0x411   :  { %v3675_v54 = vpop.f32.mrf.mxu0 }
 0x412   :  { %v2802_v44 = vmax.f32 %v2652_v43, 0.0 }
 0x413   :  { %v2656_v45 = vpop.f32.mrf.mxu0 }
 0x414   :  { %v3238_v48 = vpack.c.bf16 %v2802_v44, %v2801_v39  ;;  %v2657_v56 = vadd.f32 %v5469_v36, %v2656_v45 }
 0x415   :  { %v3678_v49 = vpop.f32.mrf.mxu0 }
 0x416   :  { %3310 = vst [vmem:[%s5566_s15 + $0x8] sm:$0xff] %v3238_v48   ;;  %v2803_v55 = vmax.f32 %v2657_v56, 0.0 }
 0x417   :  { %v2661_v50 = vpop.f32.mrf.mxu0 }
 0x418   :  { %v2662_v51 = vadd.f32 %v5469_v36, %v2661_v50 }
 0x419   :  { %v3681_v52 = vpop.f32.mrf.mxu0 }
 0x41a   :  { %v2804_v57 = vmax.f32 %v2662_v51, 0.0 }
 0x41b   :  { %v2666_v58 = vpop.f32.mrf.mxu0 }
 0x41c   :  { %v3243_v59 = vpack.c.bf16 %v2804_v57, %v2803_v55  ;;  %v2667_v61 = vadd.f32 %v5469_v36, %v2666_v58 }
 0x41d   :  { %v3684_v60 = vpop.f32.mrf.mxu0 }
 0x41e   :  { %3311 = vst [vmem:[%s5566_s15 + $0x10] sm:$0xff] %v3243_v59   ;;  %v2805_v19 = vmax.f32 %v2667_v61, 0.0 }
 0x41f   :  { %v2671_v47 = vpop.f32.mrf.mxu0 }
 0x420   :  { %v2672_v62 = vadd.f32 %v5469_v36, %v2671_v47 }
 0x421   :  { %v3687_v4 = vpop.f32.mrf.mxu0 }
 0x422   :  { %v2806_v63 = vmax.f32 %v2672_v62, 0.0 }
 0x423   :  { %v2676_v1 = vpop.f32.mrf.mxu0 }
 0x424   :  { %v3248_v9 = vpack.c.bf16 %v2806_v63, %v2805_v19  ;;  %v2677_v3 = vadd.f32 %v5469_v36, %v2676_v1 }
 0x425   :  { %v3690_v2 = vpop.f32.mrf.mxu0 }
 0x426   :  { %3312 = vst [vmem:[%s5566_s15 + $0x18] sm:$0xff] %v3248_v9   ;;  %v2807_v8 = vmax.f32 %v2677_v3, 0.0 }
 0x427   :  { %v2681_v5 = vpop.f32.mrf.mxu0 }
 0x428   :  { %v2682_v6 = vadd.f32 %v5469_v36, %v2681_v5 }
 0x429   :  { %v3693_v7 = vpop.f32.mrf.mxu0 }
 0x42a   :  { %v2808_v10 = vmax.f32 %v2682_v6, 0.0 }
 0x42b   :  { %v2686_v11 = vpop.f32.mrf.mxu0 }
 0x42c   :  { %v3253_v12 = vpack.c.bf16 %v2808_v10, %v2807_v8  ;;  %v2687_v14 = vadd.f32 %v5469_v36, %v2686_v11 }
 0x42d   :  { %v3696_v13 = vpop.f32.mrf.mxu0 }
 0x42e   :  { %3313 = vst [vmem:[%s5566_s15 + $0x20] sm:$0xff] %v3253_v12   ;;  %v2809_v18 = vmax.f32 %v2687_v14, 0.0 }
 0x42f   :  { %v2691_v15 = vpop.f32.mrf.mxu0 }
 0x430   :  { %v2692_v16 = vadd.f32 %v5469_v36, %v2691_v15 }
 0x431   :  { %v3699_v17 = vpop.f32.mrf.mxu0 }
 0x432   :  { %v2810_v20 = vmax.f32 %v2692_v16, 0.0 }
 0x433   :  { %v2696_v21 = vpop.f32.mrf.mxu0 }
 0x434   :  { %v3258_v24 = vpack.c.bf16 %v2810_v20, %v2809_v18  ;;  %v2697_v27 = vadd.f32 %v5469_v36, %v2696_v21 }
 0x435   :  { %v3702_v26 = vpop.f32.mrf.mxu0 }
 0x436   :  { %3314 = vst [vmem:[%s5566_s15 + $0x28] sm:$0xff] %v3258_v24   ;;  %v2811_v30 = vmax.f32 %v2697_v27, 0.0 }
 0x437   :  { %v2701_v40 = vpop.f32.mrf.mxu0 }
 0x438   :  { %v2702_v28 = vadd.f32 %v5469_v36, %v2701_v40 }
 0x439   :  { %v3705_v29 = vpop.f32.mrf.mxu0 }
 0x43a   :  { %v2812_v33 = vmax.f32 %v2702_v28, 0.0 }
 0x43b   :  { %v2706_v35 = vpop.f32.mrf.mxu0 }
 0x43c   :  { %v3263_v22 = vpack.c.bf16 %v2812_v33, %v2811_v30  ;;  %v2707_v23 = vadd.f32 %v5469_v36, %v2706_v35 }
 0x43d   :  { %v3708_v38 = vpop.f32.mrf.mxu0 }
 0x43e   :  { %3315 = vst [vmem:[%s5566_s15 + $0x30] sm:$0xff] %v3263_v22   ;;  %v2813_v34 = vmax.f32 %v2707_v23, 0.0 }
 0x43f   :  { %v2711_v31 = vpop.f32.mrf.mxu0 }
 0x440   :  { %v2712_v32 = vadd.f32 %v5469_v36, %v2711_v31 }
 0x441   :  { %v3711_v25 = vpop.f32.mrf.mxu0 }
 0x442   :  { %v2814_v46 = vmax.f32 %v2712_v32, 0.0 }
 0x443   :  { %v2716_v41 = vpop.f32.mrf.mxu0 }
 0x444   :  { %v3268_v42 = vpack.c.bf16 %v2814_v46, %v2813_v34 }
 0x445   :  { %v3714_v53 = vpop.f32.mrf.mxu0 }
 0x446   :  { %3316 = vst [vmem:[%s5566_s15 + $0x38] sm:$0xff] %v3268_v42  }
 0x447   :  { %v2720_v0 = vpop.f32.mrf.mxu0 }
 0x448   :  { %v2721_v43 = vadd.f32 %v5469_v36, %v2720_v0 }
 0x449   :  { %v3717_v37 = vpop.f32.mrf.mxu0 }
 0x44a   :  { %v2815_v45 = vmax.f32 %v2721_v43, 0.0 }
 0x44b   :  { %v2725_v54 = vpop.f32.mrf.mxu0 }
 0x44c   :  { %v2726_v39 = vadd.f32 %v5469_v36, %v2725_v54 }
 0x44d   :  { %v3720_v44 = vpop.f32.mrf.mxu0 }
 0x44e   :  { %v2816_v48 = vmax.f32 %v2726_v39, 0.0 }
 0x44f   :  { %v2730_v49 = vpop.f32.mrf.mxu0 }
 0x450   :  { %v3273_v56 = vpack.c.bf16 %v2816_v48, %v2815_v45  ;;  %v2731_v51 = vadd.f32 %v5469_v36, %v2730_v49 }
 0x451   :  { %v3723_v50 = vpop.f32.mrf.mxu0 }
 0x452   :  { %3317 = vst [vmem:[%s5566_s15 + $0x40] sm:$0xff] %v3273_v56   ;;  %v2817_v58 = vmax.f32 %v2731_v51, 0.0 }
 0x453   :  { %v2735_v52 = vpop.f32.mrf.mxu0 }
 0x454   :  { %v2736_v55 = vadd.f32 %v5469_v36, %v2735_v52 }
 0x455   :  { %v3726_v57 = vpop.f32.mrf.mxu0 }
 0x456   :  { %v2818_v59 = vmax.f32 %v2736_v55, 0.0 }
 0x457   :  { %v2740_v60 = vpop.f32.mrf.mxu0 }
 0x458   :  { %v3278_v61 = vpack.c.bf16 %v2818_v59, %v2817_v58  ;;  %v2741_v62 = vadd.f32 %v5469_v36, %v2740_v60 }
 0x459   :  { %v3729_v47 = vpop.f32.mrf.mxu0 }
 0x45a   :  { %3318 = vst [vmem:[%s5566_s15 + $0x48] sm:$0xff] %v3278_v61   ;;  %v2819_v1 = vmax.f32 %v2741_v62, 0.0 }
 0x45b   :  { %v2745_v4 = vpop.f32.mrf.mxu0 }
 0x45c   :  { %v2746_v19 = vadd.f32 %v5469_v36, %v2745_v4 }
 0x45d   :  { %v3732_v63 = vpop.f32.mrf.mxu0 }
 0x45e   :  { %v2820_v9 = vmax.f32 %v2746_v19, 0.0 }
 0x45f   :  { %v2750_v2 = vpop.f32.mrf.mxu0 }
 0x460   :  { %v3283_v3 = vpack.c.bf16 %v2820_v9, %v2819_v1  ;;  %v2751_v6 = vadd.f32 %v5469_v36, %v2750_v2 }
 0x461   :  { %v3735_v5 = vpop.f32.mrf.mxu0 }
 0x462   :  { %3319 = vst [vmem:[%s5566_s15 + $0x50] sm:$0xff] %v3283_v3   ;;  %v2821_v11 = vmax.f32 %v2751_v6, 0.0 }
 0x463   :  { %v2755_v7 = vpop.f32.mrf.mxu0 }
 0x464   :  { %v2756_v8 = vadd.f32 %v5469_v36, %v2755_v7 }
 0x465   :  { %v3738_v10 = vpop.f32.mrf.mxu0 }
 0x466   :  { %v2822_v12 = vmax.f32 %v2756_v8, 0.0 }
 0x467   :  { %v2760_v13 = vpop.f32.mrf.mxu0 }
 0x468   :  { %v3288_v14 = vpack.c.bf16 %v2822_v12, %v2821_v11  ;;  %v2761_v16 = vadd.f32 %v5469_v36, %v2760_v13 }
 0x469   :  { %v3741_v15 = vpop.f32.mrf.mxu0 }
 0x46a   :  { %3320 = vst [vmem:[%s5566_s15 + $0x58] sm:$0xff] %v3288_v14   ;;  %v2823_v21 = vmax.f32 %v2761_v16, 0.0 }
 0x46b   :  { %v2765_v17 = vpop.f32.mrf.mxu0 }
 0x46c   :  { %v2766_v18 = vadd.f32 %v5469_v36, %v2765_v17 }
 0x46d   :  { %v3744_v20 = vpop.f32.mrf.mxu0 }
 0x46e   :  { %v2824_v24 = vmax.f32 %v2766_v18, 0.0 }
 0x46f   :  { %v2770_v26 = vpop.f32.mrf.mxu0 }
 0x470   :  { %v3293_v27 = vpack.c.bf16 %v2824_v24, %v2823_v21  ;;  %v2771_v28 = vadd.f32 %v5469_v36, %v2770_v26 }
 0x471   :  { %v3747_v40 = vpop.f32.mrf.mxu0 }
 0x472   :  { %3321 = vst [vmem:[%s5566_s15 + $0x60] sm:$0xff] %v3293_v27   ;;  %v2825_v35 = vmax.f32 %v2771_v28, 0.0 }
 0x473   :  { %v2775_v29 = vpop.f32.mrf.mxu0 }
 0x474   :  { %v2776_v30 = vadd.f32 %v5469_v36, %v2775_v29 }
 0x475   :  { %v3750_v33 = vpop.f32.mrf.mxu0 }
 0x476   :  { %v2826_v22 = vmax.f32 %v2776_v30, 0.0 }
 0x477   :  { %v2780_v38 = vpop.f32.mrf.mxu0 }
 0x478   :  { %v3298_v23 = vpack.c.bf16 %v2826_v22, %v2825_v35  ;;  %v2781_v32 = vadd.f32 %v5469_v36, %v2780_v38 }
 0x479   :  { %v3753_v31 = vpop.f32.mrf.mxu0 }
 0x47a   :  { %3322 = vst [vmem:[%s5566_s15 + $0x68] sm:$0xff] %v3298_v23   ;;  %v2827_v41 = vmax.f32 %v2781_v32, 0.0 }
 0x47b   :  { %v2785_v25 = vpop.f32.mrf.mxu0 }
 0x47c   :  { %v2786_v34 = vadd.f32 %v5469_v36, %v2785_v25 }
 0x47d   :  { %v3756_v46 = vpop.f32.mrf.mxu0 }
 0x47e   :  { %v2828_v42 = vmax.f32 %v2786_v34, 0.0 }
 0x47f   :  { %v2790_v53 = vpop.f32.mrf.mxu1 }
 0x480   :  { %v3303_v0 = vpack.c.bf16 %v2828_v42, %v2827_v41  ;;  %v2791_v43 = vadd.f32 %v5469_v36, %v2790_v53 }
 0x481   :  { %v3759_v37 = vpop.f32.mrf.mxu1 }
 0x482   :  { %3323 = vst [vmem:[%s5566_s15 + $0x70] sm:$0xff] %v3303_v0   ;;  %v2829_v45 = vmax.f32 %v2791_v43, 0.0 }
 0x483   :  { %v2795_v54 = vpop.f32.mrf.mxu1 }
 0x484   :  { %v2796_v39 = vadd.f32 %v5469_v36, %v2795_v54 }
 0x485   :  { %v3762_v44 = vpop.f32.mrf.mxu1 }
 0x486   :  { %v2830_v48 = vmax.f32 %v2796_v39, 0.0 }
 0x488   :  { %v3308_v49 = vpack.c.bf16 %v2830_v48, %v2829_v45 }
 0x48a   :  { %3324 = vst [vmem:[%s5566_s15 + $0x78] sm:$0xff] %v3308_v49  }
 0x48b   :  { %2996 = vsyncpa [#allocation6], 1 }
 0x48c   :  { %2997 = vsyncpa [#allocation8], 1 }
 0x48d   :  { %2998 = vsyncpa [#allocation11], 1 }
 0x48e   :  { %2999 = vsyncpa [#allocation14], 1 }
 0x48f   :  { %3000 = vsyncpa [#allocation17], 1 }
 0x490   :  { %3001 = vsyncpa [#allocation20], 1 }
 0x491   :  { %3002 = vsyncpa [#allocation23], 1 }

</bundles_post_ra>
